<compile_context>
chip_gen: v7x
topology: tpu7x:2x2x1
jax: 0.10.0
libtpu: 0.0.40
codegen_flags: <defaults>
</compile_context>

<pallas_src>
import numpy as np
import jax
import jax.numpy as jnp
from jax.experimental import pallas as pl
from jax.experimental.pallas import tpu as pltpu


def _make_kernel(H, W, C, R, B):
    """Kernel processing B images per grid step via a static inner loop."""
    HW = H * W
    OFF = 128                      # lane-aligned zero padding on each side
    PADW = HW + 2 * OFF
    assert OFF >= W + 1
    # tap order (dy, dx) row-major, matching the (3,3,Cin) -> 9C weight reshape
    SHIFTS = [((dy - 1) * W + (dx - 1), dx) for dy in range(3) for dx in range(3)]

    def kernel(x_ref, lmask_ref, rmask_ref, wcat_ref, shift_ref,
               caw1_ref, cab1_ref, caw2t_ref, cab2_ref,
               w3t_ref, h3_ref, out_ref, F_ref):
        lkeep = lmask_ref[...]          # (1, HW) bf16: 0.0 where col == 0
        rkeep = rmask_ref[...]          # (1, HW) bf16: 0.0 where col == W-1
        # (C, C) identity: flips the (C,1) sublane gate into (1,C) lane form with
        # one broadcast-multiply + sublane reduction (no transpose, no tiny dot).
        eye = (jax.lax.broadcasted_iota(jnp.int32, (C, C), 0) ==
               jax.lax.broadcasted_iota(jnp.int32, (C, C), 1)).astype(jnp.float32)

        def im2col(img, feat_f32):
            # Write the bf16 feature into the zero-padded slab, then pull the 9
            # shifted tap views.  The zero borders give the vertical padding; the
            # two lane masks kill the horizontal wrap of the flattened pixel
            # axis, applied only to the 6 taps with dx != 1 and fused into the
            # extraction (no (9C,HW) mask constant, no separate masked temp).
            F_ref[img, :, OFF:OFF + HW] = feat_f32.astype(jnp.bfloat16)
            taps = []
            for s, dx in SHIFTS:
                v = F_ref[img, :, OFF + s:OFF + s + HW]
                if dx == 0:
                    v = v * lkeep
                elif dx == 2:
                    v = v * rkeep
                taps.append(v)
            return jnp.concatenate(taps, axis=0)            # (9C, HW) bf16

        for img in range(B):           # static loop; images are independent, so
            # the scheduler can overlap one image's CA chain / final matmul with
            # the next image's im2col work (each image has its own pad slab).
            # Zero only the pad columns (interior always rewritten before read);
            # redone every grid step, so safe under "parallel".
            F_ref[img, :, 0:OFF] = jnp.zeros((C, OFF), jnp.bfloat16)
            F_ref[img, :, OFF + HW:PADW] = jnp.zeros((C, OFF), jnp.bfloat16)

            x2d = x_ref[img]                                # (C, HW) f32
            t = x2d                                         # gated feature (residuals)
            patches = im2col(img, x2d)                      # taps of RCAB input
            gate9 = None                                    # prev CA gate, (1,9C) bf16

            for i in range(R):                              # static RCAB loop
                # Fused conv1|conv2 (BN scale folded into weights) as ONE bf16
                # MXU matmul.  The previous RCAB's per-channel CA gate is folded
                # into the 9C weight columns: im2col(b*gate) == im2col(b) scaled
                # per (tap,channel) row, and scaling the tiny (2C,9C) weight is
                # far cheaper than rescaling / re-extracting the (9C,HW) patches.
                w = wcat_ref[i]                             # (2C, 9C) bf16
                if gate9 is not None:
                    w = w * gate9
                y = jnp.dot(w, patches,
                            preferred_element_type=jnp.float32) + shift_ref[i]
                a = jnp.maximum(y[:C, :] + t, 0.0)          # conv1 + residual + ReLU
                b = y[C:, :] + a                            # conv2(RCAB input) + a

                # Taps of the UNGATED b, extracted immediately so the expensive
                # im2col never sits behind the serial CA chain below.
                patches = im2col(img, b)

                # Channel attention: GAP -> 1x1 -> LeakyReLU(0.01) -> 1x1 ->
                # sigmoid.  Tiny; done with broadcasts/reductions in f32.
                pooled = jnp.mean(b, axis=1, keepdims=True)                  # (C,1)
                z = jnp.sum(caw1_ref[i] * pooled, axis=0, keepdims=True)     # (1,Cr)
                z = z + cab1_ref[i]
                z = jnp.where(z > 0, z, 0.01 * z)                            # LeakyReLU
                g = jnp.sum(caw2t_ref[i] * z, axis=1, keepdims=True)         # (C,1)
                g = g + cab2_ref[i]
                gate = pl.reciprocal(1.0 + jnp.exp(-g), approx=True)         # sigmoid (EUP)
                gate_row = jnp.sum(eye * gate, axis=0, keepdims=True)        # (1,C)
                gate9 = jnp.concatenate([gate_row] * 9, axis=1).astype(jnp.bfloat16)
                t = b * gate                                # gated feature (residuals)

            # Final BasicBlock: conv3x3 (no bias) + folded BN + block residual,
            # then the group residual.  Last CA gate folds into w3's columns.
            w3 = w3t_ref[...]                               # (C, 9C) bf16
            if gate9 is not None:
                w3 = w3 * gate9
            res = jnp.dot(w3, patches, preferred_element_type=jnp.float32)
            res = res + h3_ref[...] + t + x2d
            out_ref[img] = res.astype(out_ref.dtype)        # dense (C, HW) store

    return kernel, PADW


def _prep_params(p, H, W):
    """Fold BN scale into the conv weights, fuse conv1|conv2, transpose for the
    channel-major (Cout, 9*Cin) @ (9*Cin, HW) matmul, bf16-cast matmul operands."""
    R = p["w1"].shape[0]
    C = p["w1"].shape[-1]
    HW = H * W
    w1f = p["w1"] * p["s1"][:, None, None, None, :]            # scale out-channels
    w2f = p["w2"] * p["s2"][:, None, None, None, :]
    w1t = jnp.transpose(w1f, (0, 4, 1, 2, 3)).reshape(R, C, 9 * C)
    w2t = jnp.transpose(w2f, (0, 4, 1, 2, 3)).reshape(R, C, 9 * C)
    wcat = jnp.concatenate([w1t, w2t], axis=1).astype(jnp.bfloat16)     # (R,2C,9C)
    shift = jnp.concatenate([p["h1"], p["h2"]], axis=1)[..., None]      # (R,2C,1) f32
    w3t = jnp.transpose(p["w3"] * p["s3"][None, None, None, :],
                        (3, 0, 1, 2)).reshape(C, 9 * C).astype(jnp.bfloat16)
    caw1 = p["caw1"]                                           # (R, C, Cr)
    cab1 = p["cab1"][:, None, :]                               # (R, 1, Cr)
    caw2t = jnp.transpose(p["caw2"], (0, 2, 1))                # (R, C, Cr)
    cab2 = p["cab2"][..., None]                                # (R, C, 1)
    h3 = p["h3"][:, None]                                      # (C, 1)
    # Two (1, HW) lane masks replacing the old (9C, HW) f32 mask: zero the
    # horizontally wrapped pixels of the dx==0 / dx==2 taps.
    col = np.arange(HW) % W
    lmask = jnp.asarray((col != 0).astype(np.float32)[None, :]).astype(jnp.bfloat16)
    rmask = jnp.asarray((col != W - 1).astype(np.float32)[None, :]).astype(jnp.bfloat16)
    return [lmask, rmask, wcat, shift, caw1, cab1, caw2t, cab2, w3t, h3]


def _multi_tensorcore():
    """True on chips with >1 TensorCore per chip (v4 / v5p / v7x)."""
    try:
        kind = jax.devices()[0].device_kind.lower().replace(" ", "")
    except Exception:
        return False
    return any(tag in kind for tag in ("v7", "7x", "v4", "v5p"))


def residual_group_pallas(x_nchw, p):
    N, C, H, W = x_nchw.shape
    HW = H * W
    R = p["w1"].shape[0]

    # Channel-major flattened layout: NCHW -> (N, C, H*W) is a free reshape.
    x = x_nchw.reshape(N, C, HW).astype(jnp.float32)
    params = _prep_params(p, H, W)

    if _multi_tensorcore() and N > 1:
        # Multi-TC chips: one image per "parallel" grid step -> batch sharded
        # across TensorCores.
        # TODO(synk): profile on v7x to confirm "parallel" lands one image per
        # TensorCore; if not, switch to CORE_PARALLEL / pl.core_map.
        B, grid, sem = 1, (N,), ("parallel",)
        xmap = lambda n: (n, 0, 0)
    else:
        # Single-TC chips (v5e / v6e): whole batch in one grid step -> no
        # per-step overhead and cross-image ILP hides the serial CA chain.
        # (Lane-packing the batch was not used: per-image CA gates cannot be
        #  folded into one shared weight matrix.)
        B, grid, sem = N, (1,), ("arbitrary",)
        xmap = lambda n: (0, 0, 0)

    kernel, padw = _make_kernel(H, W, C, R, B)

    def full_spec(arr):
        nd = arr.ndim
        return pl.BlockSpec(arr.shape, lambda n, _nd=nd: (0,) * _nd)

    in_specs = [pl.BlockSpec((B, C, HW), xmap)]
    in_specs += [full_spec(a) for a in params]

    # VMEM per step: x/out blocks + bf16 pad slab + params + live bf16 (9C,HW)
    # patches -- ~0.3 MB at these shapes, far under every generation's limit.
    # If C or H*W are scaled up, re-derive against v7x's 32 MiB default scoped /
    # 64 MiB physical VMEM (patches grow as 9*C*HW*2 bytes) before tuning
    # vmem_limit_bytes.
    out = pl.pallas_call(
        kernel,
        out_shape=jax.ShapeDtypeStruct((N, C, HW), jnp.float32),
        grid_spec=pltpu.PrefetchScalarGridSpec(
            num_scalar_prefetch=0,
            grid=grid,
            in_specs=in_specs,
            out_specs=pl.BlockSpec((B, C, HW), xmap),
            scratch_shapes=[pltpu.VMEM((B, C, padw), jnp.bfloat16)],
        ),
        compiler_params=pltpu.CompilerParams(dimension_semantics=sem),
    )(x, *params)
    return out.reshape(N, C, H, W)


def init_params(key, C, Cr, R, eps=1e-5):
    """Deterministic synthetic parameters; BN folded to per-channel scale/shift."""
    keys = iter(jax.random.split(key, 64))

    def nrm(shape, scale=0.1):
        return (scale * jax.random.normal(next(keys), shape)).astype(jnp.float32)

    def bn_fold(shape, conv_bias):
        gamma = (1.0 + 0.1 * jax.random.normal(next(keys), shape)).astype(jnp.float32)
        beta = nrm(shape)
        mean = nrm(shape)
        var = (0.5 + jax.random.uniform(next(keys), shape)).astype(jnp.float32)
        scale = gamma / jnp.sqrt(var + eps)
        shift = (conv_bias - mean) * scale + beta
        return scale.astype(jnp.float32), shift.astype(jnp.float32)

    w1 = nrm((R, 3, 3, C, C)); b1 = nrm((R, C)); s1, h1 = bn_fold((R, C), b1)
    w2 = nrm((R, 3, 3, C, C)); b2 = nrm((R, C)); s2, h2 = bn_fold((R, C), b2)
    caw1 = nrm((R, C, Cr)); cab1 = nrm((R, Cr))
    caw2 = nrm((R, Cr, C)); cab2 = nrm((R, C))
    w3 = nrm((3, 3, C, C)); s3, h3 = bn_fold((C,), jnp.zeros((C,), jnp.float32))

    return dict(w1=w1, s1=s1, h1=h1, w2=w2, s2=s2, h2=h2,
                caw1=caw1, cab1=cab1, caw2=caw2, cab2=cab2,
                w3=w3, s3=s3, h3=h3)


def residual_group_ref(x_nchw, p):
    """Pure-JAX f32 reference (same folded params) for validation."""
    x = jnp.transpose(x_nchw, (0, 2, 3, 1)).astype(jnp.float32)

    def conv(t, w):
        return jax.lax.conv_general_dilated(
            t, w, (1, 1), "SAME", dimension_numbers=("NHWC", "HWIO", "NHWC"))

    R = p["w1"].shape[0]
    t = x
    for i in range(R):
        a = conv(t, p["w1"][i]) * p["s1"][i] + p["h1"][i]
        a = jnp.maximum(a + t, 0.0)
        b = conv(t, p["w2"][i]) * p["s2"][i] + p["h2"][i] + a
        pooled = jnp.mean(b, axis=(1, 2))
        y1 = pooled @ p["caw1"][i] + p["cab1"][i]
        y1 = jnp.where(y1 > 0, y1, 0.01 * y1)
        gate = jax.nn.sigmoid(y1 @ p["caw2"][i] + p["cab2"][i])
        t = b * gate[:, None, None, :]
    res = conv(t, p["w3"]) * p["s3"] + p["h3"] + t + x
    return jnp.transpose(res, (0, 3, 1, 2))


if __name__ == "__main__":
    # Shapes consistent with the module: n_feat=16, kernel_size=3, reduction=4,
    # n_resblocks=2, batch=2, spatial=16x16.
    N, C, H, W = 2, 16, 16, 16
    reduction = 4
    n_resblocks = 2

    key = jax.random.PRNGKey(0)
    kx, kp = jax.random.split(key)
    x = jax.random.normal(kx, (N, C, H, W), dtype=jnp.float32)
    params = init_params(kp, C, C // reduction, n_resblocks)

    out = jax.block_until_ready(residual_group_pallas(x, params))
    ref = residual_group_ref(x, params)

    assert out.shape == (N, C, H, W)
    # bf16 im2col/weights + approx-reciprocal sigmoid: validate against the f32
    # reference with a scale-normalized tolerance.
    err = float(jnp.max(jnp.abs(out - ref)) / (jnp.max(jnp.abs(ref)) + 1e-6))
    assert err < 5e-2, f"normalized max error = {err}"
    print("KERNEL_OK")
</pallas_src>

<mosaic_0001>
module attributes {stable_mosaic.version = 11 : i64} {
  func.func @kernel(%arg0: i32, %arg1: memref<2x16x256xf32, #tpu.memory_space<vmem>>, %arg2: memref<1x256xbf16, #tpu.memory_space<vmem>>, %arg3: memref<1x256xbf16, #tpu.memory_space<vmem>>, %arg4: memref<2x32x144xbf16, #tpu.memory_space<vmem>>, %arg5: memref<2x32x1xf32, #tpu.memory_space<vmem>>, %arg6: memref<2x16x4xf32, #tpu.memory_space<vmem>>, %arg7: memref<2x1x4xf32, #tpu.memory_space<vmem>>, %arg8: memref<2x16x4xf32, #tpu.memory_space<vmem>>, %arg9: memref<2x16x1xf32, #tpu.memory_space<vmem>>, %arg10: memref<16x144xbf16, #tpu.memory_space<vmem>>, %arg11: memref<16x1xf32, #tpu.memory_space<vmem>>, %arg12: memref<2x16x256xf32, #tpu.memory_space<vmem>>, %arg13: memref<2x16x512xbf16, #tpu.memory_space<vmem>>) attributes {dimension_semantics = [#tpu.dimension_semantics<arbitrary>], iteration_bounds = array<i64: 1>, scalar_prefetch = 0 : i64, scratch_operands = 1 : i64, tpu.core_type = #tpu.core_type<tc>, window_params = [{pipeline_mode = #tpu.pipeline_mode<synchronous>, transform_indices = @transform_0, window_bounds = array<i64: 2, 16, 256>}, {pipeline_mode = #tpu.pipeline_mode<synchronous>, transform_indices = @transform_1, window_bounds = array<i64: 1, 256>}, {pipeline_mode = #tpu.pipeline_mode<synchronous>, transform_indices = @transform_2, window_bounds = array<i64: 1, 256>}, {pipeline_mode = #tpu.pipeline_mode<synchronous>, transform_indices = @transform_3, window_bounds = array<i64: 2, 32, 144>}, {pipeline_mode = #tpu.pipeline_mode<synchronous>, transform_indices = @transform_4, window_bounds = array<i64: 2, 32, 1>}, {pipeline_mode = #tpu.pipeline_mode<synchronous>, transform_indices = @transform_5, window_bounds = array<i64: 2, 16, 4>}, {pipeline_mode = #tpu.pipeline_mode<synchronous>, transform_indices = @transform_6, window_bounds = array<i64: 2, 1, 4>}, {pipeline_mode = #tpu.pipeline_mode<synchronous>, transform_indices = @transform_7, window_bounds = array<i64: 2, 16, 4>}, {pipeline_mode = #tpu.pipeline_mode<synchronous>, transform_indices = @transform_8, window_bounds = array<i64: 2, 16, 1>}, {pipeline_mode = #tpu.pipeline_mode<synchronous>, transform_indices = @transform_9, window_bounds = array<i64: 16, 144>}, {pipeline_mode = #tpu.pipeline_mode<synchronous>, transform_indices = @transform_10, window_bounds = array<i64: 16, 1>}, {pipeline_mode = #tpu.pipeline_mode<synchronous>, transform_indices = @transform_11, window_bounds = array<i64: 2, 16, 256>}]} {
    %c0 = arith.constant 0 : index
    %c0_0 = arith.constant 0 : index
    %0 = vector.load %arg2[%c0, %c0_0] : memref<1x256xbf16, #tpu.memory_space<vmem>>, vector<1x256xbf16>
    %c0_1 = arith.constant 0 : index
    %c0_2 = arith.constant 0 : index
    %1 = vector.load %arg3[%c0_1, %c0_2] : memref<1x256xbf16, #tpu.memory_space<vmem>>, vector<1x256xbf16>
    %2 = tpu.iota {dimensions = array<i32: 0>} : vector<16x16xi32>
    %3 = tpu.iota {dimensions = array<i32: 1>} : vector<16x16xi32>
    %4 = arith.cmpi eq, %2, %3 : vector<16x16xi32>
    %5 = arith.extui %4 : vector<16x16xi1> to vector<16x16xi32>
    %6 = arith.sitofp %5 : vector<16x16xi32> to vector<16x16xf32>
    %cst = arith.constant 0.000000e+00 : bf16
    %7 = vector.broadcast %cst : bf16 to vector<16x128xbf16>
    %c0_3 = arith.constant 0 : index
    %c0_4 = arith.constant 0 : index
    %c0_5 = arith.constant 0 : index
    %8 = vector.load %arg13[%c0_3, %c0_4, %c0_5] : memref<2x16x512xbf16, #tpu.memory_space<vmem>>, vector<1x16x128xbf16>
    %9 = vector.shape_cast %8 : vector<1x16x128xbf16> to vector<16x128xbf16>
    %10 = vector.shape_cast %7 : vector<16x128xbf16> to vector<1x16x128xbf16>
    tpu.vector_store %arg13[%c0_3, %c0_4, %c0_5], %10 {strides = array<i32>} : memref<2x16x512xbf16, #tpu.memory_space<vmem>>, vector<1x16x128xbf16>,
    %cst_6 = arith.constant 0.000000e+00 : bf16
    %11 = vector.broadcast %cst_6 : bf16 to vector<16x128xbf16>
    %c0_7 = arith.constant 0 : index
    %c0_8 = arith.constant 0 : index
    %c384 = arith.constant 384 : index
    %12 = vector.load %arg13[%c0_7, %c0_8, %c384] : memref<2x16x512xbf16, #tpu.memory_space<vmem>>, vector<1x16x128xbf16>
    %13 = vector.shape_cast %12 : vector<1x16x128xbf16> to vector<16x128xbf16>
    %14 = vector.shape_cast %11 : vector<16x128xbf16> to vector<1x16x128xbf16>
    tpu.vector_store %arg13[%c0_7, %c0_8, %c384], %14 {strides = array<i32>} : memref<2x16x512xbf16, #tpu.memory_space<vmem>>, vector<1x16x128xbf16>,
    %c0_9 = arith.constant 0 : index
    %c0_10 = arith.constant 0 : index
    %c0_11 = arith.constant 0 : index
    %15 = vector.load %arg1[%c0_9, %c0_10, %c0_11] : memref<2x16x256xf32, #tpu.memory_space<vmem>>, vector<1x16x256xf32>
    %16 = vector.shape_cast %15 : vector<1x16x256xf32> to vector<16x256xf32>
    %17 = arith.truncf %16 : vector<16x256xf32> to vector<16x256xbf16>
    %c0_12 = arith.constant 0 : index
    %c0_13 = arith.constant 0 : index
    %c128 = arith.constant 128 : index
    %18 = vector.load %arg13[%c0_12, %c0_13, %c128] : memref<2x16x512xbf16, #tpu.memory_space<vmem>>, vector<1x16x256xbf16>
    %19 = vector.shape_cast %18 : vector<1x16x256xbf16> to vector<16x256xbf16>
    %20 = vector.shape_cast %17 : vector<16x256xbf16> to vector<1x16x256xbf16>
    tpu.vector_store %arg13[%c0_12, %c0_13, %c128], %20 {strides = array<i32>} : memref<2x16x512xbf16, #tpu.memory_space<vmem>>, vector<1x16x256xbf16>,
    %c0_14 = arith.constant 0 : index
    %c0_15 = arith.constant 0 : index
    %c111 = arith.constant 111 : index
    %21 = vector.load %arg13[%c0_14, %c0_15, %c111] : memref<2x16x512xbf16, #tpu.memory_space<vmem>>, vector<1x16x256xbf16>
    %22 = vector.shape_cast %21 : vector<1x16x256xbf16> to vector<16x256xbf16>
    %23 = vector.broadcast %0 : vector<1x256xbf16> to vector<16x256xbf16>
    %24 = arith.mulf %22, %23 : vector<16x256xbf16>
    %c0_16 = arith.constant 0 : index
    %c0_17 = arith.constant 0 : index
    %c112 = arith.constant 112 : index
    %25 = vector.load %arg13[%c0_16, %c0_17, %c112] : memref<2x16x512xbf16, #tpu.memory_space<vmem>>, vector<1x16x256xbf16>
    %26 = vector.shape_cast %25 : vector<1x16x256xbf16> to vector<16x256xbf16>
    %c0_18 = arith.constant 0 : index
    %c0_19 = arith.constant 0 : index
    %c113 = arith.constant 113 : index
    %27 = vector.load %arg13[%c0_18, %c0_19, %c113] : memref<2x16x512xbf16, #tpu.memory_space<vmem>>, vector<1x16x256xbf16>
    %28 = vector.shape_cast %27 : vector<1x16x256xbf16> to vector<16x256xbf16>
    %29 = vector.broadcast %1 : vector<1x256xbf16> to vector<16x256xbf16>
    %30 = arith.mulf %28, %29 : vector<16x256xbf16>
    %c0_20 = arith.constant 0 : index
    %c0_21 = arith.constant 0 : index
    %c127 = arith.constant 127 : index
    %31 = vector.load %arg13[%c0_20, %c0_21, %c127] : memref<2x16x512xbf16, #tpu.memory_space<vmem>>, vector<1x16x256xbf16>
    %32 = vector.shape_cast %31 : vector<1x16x256xbf16> to vector<16x256xbf16>
    %33 = vector.broadcast %0 : vector<1x256xbf16> to vector<16x256xbf16>
    %34 = arith.mulf %32, %33 : vector<16x256xbf16>
    %c0_22 = arith.constant 0 : index
    %c0_23 = arith.constant 0 : index
    %c128_24 = arith.constant 128 : index
    %35 = vector.load %arg13[%c0_22, %c0_23, %c128_24] : memref<2x16x512xbf16, #tpu.memory_space<vmem>>, vector<1x16x256xbf16>
    %36 = vector.shape_cast %35 : vector<1x16x256xbf16> to vector<16x256xbf16>
    %c0_25 = arith.constant 0 : index
    %c0_26 = arith.constant 0 : index
    %c129 = arith.constant 129 : index
    %37 = vector.load %arg13[%c0_25, %c0_26, %c129] : memref<2x16x512xbf16, #tpu.memory_space<vmem>>, vector<1x16x256xbf16>
    %38 = vector.shape_cast %37 : vector<1x16x256xbf16> to vector<16x256xbf16>
    %39 = vector.broadcast %1 : vector<1x256xbf16> to vector<16x256xbf16>
    %40 = arith.mulf %38, %39 : vector<16x256xbf16>
    %c0_27 = arith.constant 0 : index
    %c0_28 = arith.constant 0 : index
    %c143 = arith.constant 143 : index
    %41 = vector.load %arg13[%c0_27, %c0_28, %c143] : memref<2x16x512xbf16, #tpu.memory_space<vmem>>, vector<1x16x256xbf16>
    %42 = vector.shape_cast %41 : vector<1x16x256xbf16> to vector<16x256xbf16>
    %43 = vector.broadcast %0 : vector<1x256xbf16> to vector<16x256xbf16>
    %44 = arith.mulf %42, %43 : vector<16x256xbf16>
    %c0_29 = arith.constant 0 : index
    %c0_30 = arith.constant 0 : index
    %c144 = arith.constant 144 : index
    %45 = vector.load %arg13[%c0_29, %c0_30, %c144] : memref<2x16x512xbf16, #tpu.memory_space<vmem>>, vector<1x16x256xbf16>
    %46 = vector.shape_cast %45 : vector<1x16x256xbf16> to vector<16x256xbf16>
    %c0_31 = arith.constant 0 : index
    %c0_32 = arith.constant 0 : index
    %c145 = arith.constant 145 : index
    %47 = vector.load %arg13[%c0_31, %c0_32, %c145] : memref<2x16x512xbf16, #tpu.memory_space<vmem>>, vector<1x16x256xbf16>
    %48 = vector.shape_cast %47 : vector<1x16x256xbf16> to vector<16x256xbf16>
    %49 = vector.broadcast %1 : vector<1x256xbf16> to vector<16x256xbf16>
    %50 = arith.mulf %48, %49 : vector<16x256xbf16>
    %51 = tpu.concatenate %24, %26, %30, %34, %36, %40, %44, %46, %50 in 0 : vector<16x256xbf16>, vector<16x256xbf16>, vector<16x256xbf16>, vector<16x256xbf16>, vector<16x256xbf16>, vector<16x256xbf16>, vector<16x256xbf16>, vector<16x256xbf16>, vector<16x256xbf16> -> vector<144x256xbf16>
    %c0_33 = arith.constant 0 : index
    %c0_34 = arith.constant 0 : index
    %c0_35 = arith.constant 0 : index
    %52 = vector.load %arg4[%c0_33, %c0_34, %c0_35] : memref<2x32x144xbf16, #tpu.memory_space<vmem>>, vector<1x32x144xbf16>
    %53 = vector.shape_cast %52 : vector<1x32x144xbf16> to vector<32x144xbf16>
    %cst_36 = arith.constant dense<0.000000e+00> : vector<32x256xf32>
    %54 = tpu.matmul %53, %51, %cst_36 {dimension_numbers = #tpu.dot_dimension_numbers<[1], [0], [0], [1], [0, 0, 1, 1], [], []>} : vector<32x144xbf16>, vector<144x256xbf16>, vector<32x256xf32> -> vector<32x256xf32>
    %c0_37 = arith.constant 0 : index
    %c0_38 = arith.constant 0 : index
    %c0_39 = arith.constant 0 : index
    %55 = vector.load %arg5[%c0_37, %c0_38, %c0_39] : memref<2x32x1xf32, #tpu.memory_space<vmem>>, vector<1x32x1xf32>
    %56 = vector.shape_cast %55 : vector<1x32x1xf32> to vector<32x1xf32>
    %57 = vector.broadcast %56 : vector<32x1xf32> to vector<32x256xf32>
    %58 = arith.addf %54, %57 : vector<32x256xf32>
    %59 = vector.extract_strided_slice %58 {offsets = [0, 0], sizes = [16, 256], strides = [1, 1]} : vector<32x256xf32> to vector<16x256xf32>
    %60 = arith.addf %59, %16 : vector<16x256xf32>
    %cst_40 = arith.constant 0.000000e+00 : f32
    %61 = vector.broadcast %cst_40 : f32 to vector<16x256xf32>
    %62 = arith.maximumf %60, %61 : vector<16x256xf32>
    %63 = vector.extract_strided_slice %58 {offsets = [16, 0], sizes = [16, 256], strides = [1, 1]} : vector<32x256xf32> to vector<16x256xf32>
    %64 = arith.addf %63, %62 : vector<16x256xf32>
    %65 = arith.truncf %64 : vector<16x256xf32> to vector<16x256xbf16>
    %c0_41 = arith.constant 0 : index
    %c0_42 = arith.constant 0 : index
    %c128_43 = arith.constant 128 : index
    %66 = vector.load %arg13[%c0_41, %c0_42, %c128_43] : memref<2x16x512xbf16, #tpu.memory_space<vmem>>, vector<1x16x256xbf16>
    %67 = vector.shape_cast %66 : vector<1x16x256xbf16> to vector<16x256xbf16>
    %68 = vector.shape_cast %65 : vector<16x256xbf16> to vector<1x16x256xbf16>
    tpu.vector_store %arg13[%c0_41, %c0_42, %c128_43], %68 {strides = array<i32>} : memref<2x16x512xbf16, #tpu.memory_space<vmem>>, vector<1x16x256xbf16>,
    %c0_44 = arith.constant 0 : index
    %c0_45 = arith.constant 0 : index
    %c111_46 = arith.constant 111 : index
    %69 = vector.load %arg13[%c0_44, %c0_45, %c111_46] : memref<2x16x512xbf16, #tpu.memory_space<vmem>>, vector<1x16x256xbf16>
    %70 = vector.shape_cast %69 : vector<1x16x256xbf16> to vector<16x256xbf16>
    %71 = vector.broadcast %0 : vector<1x256xbf16> to vector<16x256xbf16>
    %72 = arith.mulf %70, %71 : vector<16x256xbf16>
    %c0_47 = arith.constant 0 : index
    %c0_48 = arith.constant 0 : index
    %c112_49 = arith.constant 112 : index
    %73 = vector.load %arg13[%c0_47, %c0_48, %c112_49] : memref<2x16x512xbf16, #tpu.memory_space<vmem>>, vector<1x16x256xbf16>
    %74 = vector.shape_cast %73 : vector<1x16x256xbf16> to vector<16x256xbf16>
    %c0_50 = arith.constant 0 : index
    %c0_51 = arith.constant 0 : index
    %c113_52 = arith.constant 113 : index
    %75 = vector.load %arg13[%c0_50, %c0_51, %c113_52] : memref<2x16x512xbf16, #tpu.memory_space<vmem>>, vector<1x16x256xbf16>
    %76 = vector.shape_cast %75 : vector<1x16x256xbf16> to vector<16x256xbf16>
    %77 = vector.broadcast %1 : vector<1x256xbf16> to vector<16x256xbf16>
    %78 = arith.mulf %76, %77 : vector<16x256xbf16>
    %c0_53 = arith.constant 0 : index
    %c0_54 = arith.constant 0 : index
    %c127_55 = arith.constant 127 : index
    %79 = vector.load %arg13[%c0_53, %c0_54, %c127_55] : memref<2x16x512xbf16, #tpu.memory_space<vmem>>, vector<1x16x256xbf16>
    %80 = vector.shape_cast %79 : vector<1x16x256xbf16> to vector<16x256xbf16>
    %81 = vector.broadcast %0 : vector<1x256xbf16> to vector<16x256xbf16>
    %82 = arith.mulf %80, %81 : vector<16x256xbf16>
    %c0_56 = arith.constant 0 : index
    %c0_57 = arith.constant 0 : index
    %c128_58 = arith.constant 128 : index
    %83 = vector.load %arg13[%c0_56, %c0_57, %c128_58] : memref<2x16x512xbf16, #tpu.memory_space<vmem>>, vector<1x16x256xbf16>
    %84 = vector.shape_cast %83 : vector<1x16x256xbf16> to vector<16x256xbf16>
    %c0_59 = arith.constant 0 : index
    %c0_60 = arith.constant 0 : index
    %c129_61 = arith.constant 129 : index
    %85 = vector.load %arg13[%c0_59, %c0_60, %c129_61] : memref<2x16x512xbf16, #tpu.memory_space<vmem>>, vector<1x16x256xbf16>
    %86 = vector.shape_cast %85 : vector<1x16x256xbf16> to vector<16x256xbf16>
    %87 = vector.broadcast %1 : vector<1x256xbf16> to vector<16x256xbf16>
    %88 = arith.mulf %86, %87 : vector<16x256xbf16>
    %c0_62 = arith.constant 0 : index
    %c0_63 = arith.constant 0 : index
    %c143_64 = arith.constant 143 : index
    %89 = vector.load %arg13[%c0_62, %c0_63, %c143_64] : memref<2x16x512xbf16, #tpu.memory_space<vmem>>, vector<1x16x256xbf16>
    %90 = vector.shape_cast %89 : vector<1x16x256xbf16> to vector<16x256xbf16>
    %91 = vector.broadcast %0 : vector<1x256xbf16> to vector<16x256xbf16>
    %92 = arith.mulf %90, %91 : vector<16x256xbf16>
    %c0_65 = arith.constant 0 : index
    %c0_66 = arith.constant 0 : index
    %c144_67 = arith.constant 144 : index
    %93 = vector.load %arg13[%c0_65, %c0_66, %c144_67] : memref<2x16x512xbf16, #tpu.memory_space<vmem>>, vector<1x16x256xbf16>
    %94 = vector.shape_cast %93 : vector<1x16x256xbf16> to vector<16x256xbf16>
    %c0_68 = arith.constant 0 : index
    %c0_69 = arith.constant 0 : index
    %c145_70 = arith.constant 145 : index
    %95 = vector.load %arg13[%c0_68, %c0_69, %c145_70] : memref<2x16x512xbf16, #tpu.memory_space<vmem>>, vector<1x16x256xbf16>
    %96 = vector.shape_cast %95 : vector<1x16x256xbf16> to vector<16x256xbf16>
    %97 = vector.broadcast %1 : vector<1x256xbf16> to vector<16x256xbf16>
    %98 = arith.mulf %96, %97 : vector<16x256xbf16>
    %99 = tpu.concatenate %72, %74, %78, %82, %84, %88, %92, %94, %98 in 0 : vector<16x256xbf16>, vector<16x256xbf16>, vector<16x256xbf16>, vector<16x256xbf16>, vector<16x256xbf16>, vector<16x256xbf16>, vector<16x256xbf16>, vector<16x256xbf16>, vector<16x256xbf16> -> vector<144x256xbf16>
    %cst_71 = arith.constant dense<0.000000e+00> : vector<16xf32>
    %100 = vector.multi_reduction <add>, %64, %cst_71 [1] : vector<16x256xf32> to vector<16xf32>
    %101 = vector.shape_cast %100 : vector<16xf32> to vector<16x1xf32>
    %cst_72 = arith.constant 2.560000e+02 : f32
    %102 = vector.broadcast %cst_72 : f32 to vector<16x1xf32>
    %103 = arith.divf %101, %102 : vector<16x1xf32>
    %c0_73 = arith.constant 0 : index
    %c0_74 = arith.constant 0 : index
    %c0_75 = arith.constant 0 : index
    %104 = vector.load %arg6[%c0_73, %c0_74, %c0_75] : memref<2x16x4xf32, #tpu.memory_space<vmem>>, vector<1x16x4xf32>
    %105 = vector.shape_cast %104 : vector<1x16x4xf32> to vector<16x4xf32>
    %106 = vector.broadcast %103 : vector<16x1xf32> to vector<16x4xf32>
    %107 = arith.mulf %105, %106 : vector<16x4xf32>
    %cst_76 = arith.constant dense<0.000000e+00> : vector<4xf32>
    %108 = vector.multi_reduction <add>, %107, %cst_76 [0] : vector<16x4xf32> to vector<4xf32>
    %109 = vector.shape_cast %108 : vector<4xf32> to vector<1x4xf32>
    %c0_77 = arith.constant 0 : index
    %c0_78 = arith.constant 0 : index
    %c0_79 = arith.constant 0 : index
    %110 = vector.load %arg7[%c0_77, %c0_78, %c0_79] : memref<2x1x4xf32, #tpu.memory_space<vmem>>, vector<1x1x4xf32>
    %111 = vector.shape_cast %110 : vector<1x1x4xf32> to vector<1x4xf32>
    %112 = arith.addf %109, %111 : vector<1x4xf32>
    %cst_80 = arith.constant 0.000000e+00 : f32
    %113 = vector.broadcast %cst_80 : f32 to vector<1x4xf32>
    %114 = arith.cmpf ogt, %112, %113 : vector<1x4xf32>
    %cst_81 = arith.constant 0.00999999977 : f32
    %115 = vector.broadcast %cst_81 : f32 to vector<1x4xf32>
    %116 = arith.mulf %115, %112 : vector<1x4xf32>
    %117 = arith.select %114, %112, %116 : vector<1x4xi1>, vector<1x4xf32>
    %c0_82 = arith.constant 0 : index
    %c0_83 = arith.constant 0 : index
    %c0_84 = arith.constant 0 : index
    %118 = vector.load %arg8[%c0_82, %c0_83, %c0_84] : memref<2x16x4xf32, #tpu.memory_space<vmem>>, vector<1x16x4xf32>
    %119 = vector.shape_cast %118 : vector<1x16x4xf32> to vector<16x4xf32>
    %120 = vector.broadcast %117 : vector<1x4xf32> to vector<16x4xf32>
    %121 = arith.mulf %119, %120 : vector<16x4xf32>
    %cst_85 = arith.constant dense<0.000000e+00> : vector<16xf32>
    %122 = vector.multi_reduction <add>, %121, %cst_85 [1] : vector<16x4xf32> to vector<16xf32>
    %123 = vector.shape_cast %122 : vector<16xf32> to vector<16x1xf32>
    %c0_86 = arith.constant 0 : index
    %c0_87 = arith.constant 0 : index
    %c0_88 = arith.constant 0 : index
    %124 = vector.load %arg9[%c0_86, %c0_87, %c0_88] : memref<2x16x1xf32, #tpu.memory_space<vmem>>, vector<1x16x1xf32>
    %125 = vector.shape_cast %124 : vector<1x16x1xf32> to vector<16x1xf32>
    %126 = arith.addf %123, %125 : vector<16x1xf32>
    %cst_89 = arith.constant 0.000000e+00 : f32
    %127 = vector.broadcast %cst_89 : f32 to vector<16x1xf32>
    %128 = arith.subf %127, %126 : vector<16x1xf32>
    %129 = math.exp %128 : vector<16x1xf32>
    %cst_90 = arith.constant 1.000000e+00 : f32
    %130 = vector.broadcast %cst_90 : f32 to vector<16x1xf32>
    %131 = arith.addf %130, %129 : vector<16x1xf32>
    %132 = tpu.reciprocal %131 {approx = true} : vector<16x1xf32> -> vector<16x1xf32>
    %133 = vector.broadcast %132 : vector<16x1xf32> to vector<16x16xf32>
    %134 = arith.mulf %6, %133 : vector<16x16xf32>
    %cst_91 = arith.constant dense<0.000000e+00> : vector<16xf32>
    %135 = vector.multi_reduction <add>, %134, %cst_91 [0] : vector<16x16xf32> to vector<16xf32>
    %136 = vector.shape_cast %135 : vector<16xf32> to vector<1x16xf32>
    %137 = tpu.concatenate %136, %136, %136, %136, %136, %136, %136, %136, %136 in 1 : vector<1x16xf32>, vector<1x16xf32>, vector<1x16xf32>, vector<1x16xf32>, vector<1x16xf32>, vector<1x16xf32>, vector<1x16xf32>, vector<1x16xf32>, vector<1x16xf32> -> vector<1x144xf32>
    %138 = arith.truncf %137 : vector<1x144xf32> to vector<1x144xbf16>
    %139 = vector.broadcast %132 : vector<16x1xf32> to vector<16x256xf32>
    %140 = arith.mulf %64, %139 : vector<16x256xf32>
    %c1 = arith.constant 1 : index
    %c0_92 = arith.constant 0 : index
    %c0_93 = arith.constant 0 : index
    %141 = vector.load %arg4[%c1, %c0_92, %c0_93] : memref<2x32x144xbf16, #tpu.memory_space<vmem>>, vector<1x32x144xbf16>
    %142 = vector.shape_cast %141 : vector<1x32x144xbf16> to vector<32x144xbf16>
    %143 = vector.broadcast %138 : vector<1x144xbf16> to vector<32x144xbf16>
    %144 = arith.mulf %142, %143 : vector<32x144xbf16>
    %cst_94 = arith.constant dense<0.000000e+00> : vector<32x256xf32>
    %145 = tpu.matmul %144, %99, %cst_94 {dimension_numbers = #tpu.dot_dimension_numbers<[1], [0], [0], [1], [0, 0, 1, 1], [], []>} : vector<32x144xbf16>, vector<144x256xbf16>, vector<32x256xf32> -> vector<32x256xf32>
    %c1_95 = arith.constant 1 : index
    %c0_96 = arith.constant 0 : index
    %c0_97 = arith.constant 0 : index
    %146 = vector.load %arg5[%c1_95, %c0_96, %c0_97] : memref<2x32x1xf32, #tpu.memory_space<vmem>>, vector<1x32x1xf32>
    %147 = vector.shape_cast %146 : vector<1x32x1xf32> to vector<32x1xf32>
    %148 = vector.broadcast %147 : vector<32x1xf32> to vector<32x256xf32>
    %149 = arith.addf %145, %148 : vector<32x256xf32>
    %150 = vector.extract_strided_slice %149 {offsets = [0, 0], sizes = [16, 256], strides = [1, 1]} : vector<32x256xf32> to vector<16x256xf32>
    %151 = arith.addf %150, %140 : vector<16x256xf32>
    %cst_98 = arith.constant 0.000000e+00 : f32
    %152 = vector.broadcast %cst_98 : f32 to vector<16x256xf32>
    %153 = arith.maximumf %151, %152 : vector<16x256xf32>
    %154 = vector.extract_strided_slice %149 {offsets = [16, 0], sizes = [16, 256], strides = [1, 1]} : vector<32x256xf32> to vector<16x256xf32>
    %155 = arith.addf %154, %153 : vector<16x256xf32>
    %156 = arith.truncf %155 : vector<16x256xf32> to vector<16x256xbf16>
    %c0_99 = arith.constant 0 : index
    %c0_100 = arith.constant 0 : index
    %c128_101 = arith.constant 128 : index
    %157 = vector.load %arg13[%c0_99, %c0_100, %c128_101] : memref<2x16x512xbf16, #tpu.memory_space<vmem>>, vector<1x16x256xbf16>
    %158 = vector.shape_cast %157 : vector<1x16x256xbf16> to vector<16x256xbf16>
    %159 = vector.shape_cast %156 : vector<16x256xbf16> to vector<1x16x256xbf16>
    tpu.vector_store %arg13[%c0_99, %c0_100, %c128_101], %159 {strides = array<i32>} : memref<2x16x512xbf16, #tpu.memory_space<vmem>>, vector<1x16x256xbf16>,
    %c0_102 = arith.constant 0 : index
    %c0_103 = arith.constant 0 : index
    %c111_104 = arith.constant 111 : index
    %160 = vector.load %arg13[%c0_102, %c0_103, %c111_104] : memref<2x16x512xbf16, #tpu.memory_space<vmem>>, vector<1x16x256xbf16>
    %161 = vector.shape_cast %160 : vector<1x16x256xbf16> to vector<16x256xbf16>
    %162 = vector.broadcast %0 : vector<1x256xbf16> to vector<16x256xbf16>
    %163 = arith.mulf %161, %162 : vector<16x256xbf16>
    %c0_105 = arith.constant 0 : index
    %c0_106 = arith.constant 0 : index
    %c112_107 = arith.constant 112 : index
    %164 = vector.load %arg13[%c0_105, %c0_106, %c112_107] : memref<2x16x512xbf16, #tpu.memory_space<vmem>>, vector<1x16x256xbf16>
    %165 = vector.shape_cast %164 : vector<1x16x256xbf16> to vector<16x256xbf16>
    %c0_108 = arith.constant 0 : index
    %c0_109 = arith.constant 0 : index
    %c113_110 = arith.constant 113 : index
    %166 = vector.load %arg13[%c0_108, %c0_109, %c113_110] : memref<2x16x512xbf16, #tpu.memory_space<vmem>>, vector<1x16x256xbf16>
    %167 = vector.shape_cast %166 : vector<1x16x256xbf16> to vector<16x256xbf16>
    %168 = vector.broadcast %1 : vector<1x256xbf16> to vector<16x256xbf16>
    %169 = arith.mulf %167, %168 : vector<16x256xbf16>
    %c0_111 = arith.constant 0 : index
    %c0_112 = arith.constant 0 : index
    %c127_113 = arith.constant 127 : index
    %170 = vector.load %arg13[%c0_111, %c0_112, %c127_113] : memref<2x16x512xbf16, #tpu.memory_space<vmem>>, vector<1x16x256xbf16>
    %171 = vector.shape_cast %170 : vector<1x16x256xbf16> to vector<16x256xbf16>
    %172 = vector.broadcast %0 : vector<1x256xbf16> to vector<16x256xbf16>
    %173 = arith.mulf %171, %172 : vector<16x256xbf16>
    %c0_114 = arith.constant 0 : index
    %c0_115 = arith.constant 0 : index
    %c128_116 = arith.constant 128 : index
    %174 = vector.load %arg13[%c0_114, %c0_115, %c128_116] : memref<2x16x512xbf16, #tpu.memory_space<vmem>>, vector<1x16x256xbf16>
    %175 = vector.shape_cast %174 : vector<1x16x256xbf16> to vector<16x256xbf16>
    %c0_117 = arith.constant 0 : index
    %c0_118 = arith.constant 0 : index
    %c129_119 = arith.constant 129 : index
    %176 = vector.load %arg13[%c0_117, %c0_118, %c129_119] : memref<2x16x512xbf16, #tpu.memory_space<vmem>>, vector<1x16x256xbf16>
    %177 = vector.shape_cast %176 : vector<1x16x256xbf16> to vector<16x256xbf16>
    %178 = vector.broadcast %1 : vector<1x256xbf16> to vector<16x256xbf16>
    %179 = arith.mulf %177, %178 : vector<16x256xbf16>
    %c0_120 = arith.constant 0 : index
    %c0_121 = arith.constant 0 : index
    %c143_122 = arith.constant 143 : index
    %180 = vector.load %arg13[%c0_120, %c0_121, %c143_122] : memref<2x16x512xbf16, #tpu.memory_space<vmem>>, vector<1x16x256xbf16>
    %181 = vector.shape_cast %180 : vector<1x16x256xbf16> to vector<16x256xbf16>
    %182 = vector.broadcast %0 : vector<1x256xbf16> to vector<16x256xbf16>
    %183 = arith.mulf %181, %182 : vector<16x256xbf16>
    %c0_123 = arith.constant 0 : index
    %c0_124 = arith.constant 0 : index
    %c144_125 = arith.constant 144 : index
    %184 = vector.load %arg13[%c0_123, %c0_124, %c144_125] : memref<2x16x512xbf16, #tpu.memory_space<vmem>>, vector<1x16x256xbf16>
    %185 = vector.shape_cast %184 : vector<1x16x256xbf16> to vector<16x256xbf16>
    %c0_126 = arith.constant 0 : index
    %c0_127 = arith.constant 0 : index
    %c145_128 = arith.constant 145 : index
    %186 = vector.load %arg13[%c0_126, %c0_127, %c145_128] : memref<2x16x512xbf16, #tpu.memory_space<vmem>>, vector<1x16x256xbf16>
    %187 = vector.shape_cast %186 : vector<1x16x256xbf16> to vector<16x256xbf16>
    %188 = vector.broadcast %1 : vector<1x256xbf16> to vector<16x256xbf16>
    %189 = arith.mulf %187, %188 : vector<16x256xbf16>
    %190 = tpu.concatenate %163, %165, %169, %173, %175, %179, %183, %185, %189 in 0 : vector<16x256xbf16>, vector<16x256xbf16>, vector<16x256xbf16>, vector<16x256xbf16>, vector<16x256xbf16>, vector<16x256xbf16>, vector<16x256xbf16>, vector<16x256xbf16>, vector<16x256xbf16> -> vector<144x256xbf16>
    %cst_129 = arith.constant dense<0.000000e+00> : vector<16xf32>
    %191 = vector.multi_reduction <add>, %155, %cst_129 [1] : vector<16x256xf32> to vector<16xf32>
    %192 = vector.shape_cast %191 : vector<16xf32> to vector<16x1xf32>
    %cst_130 = arith.constant 2.560000e+02 : f32
    %193 = vector.broadcast %cst_130 : f32 to vector<16x1xf32>
    %194 = arith.divf %192, %193 : vector<16x1xf32>
    %c1_131 = arith.constant 1 : index
    %c0_132 = arith.constant 0 : index
    %c0_133 = arith.constant 0 : index
    %195 = vector.load %arg6[%c1_131, %c0_132, %c0_133] : memref<2x16x4xf32, #tpu.memory_space<vmem>>, vector<1x16x4xf32>
    %196 = vector.shape_cast %195 : vector<1x16x4xf32> to vector<16x4xf32>
    %197 = vector.broadcast %194 : vector<16x1xf32> to vector<16x4xf32>
    %198 = arith.mulf %196, %197 : vector<16x4xf32>
    %cst_134 = arith.constant dense<0.000000e+00> : vector<4xf32>
    %199 = vector.multi_reduction <add>, %198, %cst_134 [0] : vector<16x4xf32> to vector<4xf32>
    %200 = vector.shape_cast %199 : vector<4xf32> to vector<1x4xf32>
    %c1_135 = arith.constant 1 : index
    %c0_136 = arith.constant 0 : index
    %c0_137 = arith.constant 0 : index
    %201 = vector.load %arg7[%c1_135, %c0_136, %c0_137] : memref<2x1x4xf32, #tpu.memory_space<vmem>>, vector<1x1x4xf32>
    %202 = vector.shape_cast %201 : vector<1x1x4xf32> to vector<1x4xf32>
    %203 = arith.addf %200, %202 : vector<1x4xf32>
    %cst_138 = arith.constant 0.000000e+00 : f32
    %204 = vector.broadcast %cst_138 : f32 to vector<1x4xf32>
    %205 = arith.cmpf ogt, %203, %204 : vector<1x4xf32>
    %cst_139 = arith.constant 0.00999999977 : f32
    %206 = vector.broadcast %cst_139 : f32 to vector<1x4xf32>
    %207 = arith.mulf %206, %203 : vector<1x4xf32>
    %208 = arith.select %205, %203, %207 : vector<1x4xi1>, vector<1x4xf32>
    %c1_140 = arith.constant 1 : index
    %c0_141 = arith.constant 0 : index
    %c0_142 = arith.constant 0 : index
    %209 = vector.load %arg8[%c1_140, %c0_141, %c0_142] : memref<2x16x4xf32, #tpu.memory_space<vmem>>, vector<1x16x4xf32>
    %210 = vector.shape_cast %209 : vector<1x16x4xf32> to vector<16x4xf32>
    %211 = vector.broadcast %208 : vector<1x4xf32> to vector<16x4xf32>
    %212 = arith.mulf %210, %211 : vector<16x4xf32>
    %cst_143 = arith.constant dense<0.000000e+00> : vector<16xf32>
    %213 = vector.multi_reduction <add>, %212, %cst_143 [1] : vector<16x4xf32> to vector<16xf32>
    %214 = vector.shape_cast %213 : vector<16xf32> to vector<16x1xf32>
    %c1_144 = arith.constant 1 : index
    %c0_145 = arith.constant 0 : index
    %c0_146 = arith.constant 0 : index
    %215 = vector.load %arg9[%c1_144, %c0_145, %c0_146] : memref<2x16x1xf32, #tpu.memory_space<vmem>>, vector<1x16x1xf32>
    %216 = vector.shape_cast %215 : vector<1x16x1xf32> to vector<16x1xf32>
    %217 = arith.addf %214, %216 : vector<16x1xf32>
    %cst_147 = arith.constant 0.000000e+00 : f32
    %218 = vector.broadcast %cst_147 : f32 to vector<16x1xf32>
    %219 = arith.subf %218, %217 : vector<16x1xf32>
    %220 = math.exp %219 : vector<16x1xf32>
    %cst_148 = arith.constant 1.000000e+00 : f32
    %221 = vector.broadcast %cst_148 : f32 to vector<16x1xf32>
    %222 = arith.addf %221, %220 : vector<16x1xf32>
    %223 = tpu.reciprocal %222 {approx = true} : vector<16x1xf32> -> vector<16x1xf32>
    %224 = vector.broadcast %223 : vector<16x1xf32> to vector<16x16xf32>
    %225 = arith.mulf %6, %224 : vector<16x16xf32>
    %cst_149 = arith.constant dense<0.000000e+00> : vector<16xf32>
    %226 = vector.multi_reduction <add>, %225, %cst_149 [0] : vector<16x16xf32> to vector<16xf32>
    %227 = vector.shape_cast %226 : vector<16xf32> to vector<1x16xf32>
    %228 = tpu.concatenate %227, %227, %227, %227, %227, %227, %227, %227, %227 in 1 : vector<1x16xf32>, vector<1x16xf32>, vector<1x16xf32>, vector<1x16xf32>, vector<1x16xf32>, vector<1x16xf32>, vector<1x16xf32>, vector<1x16xf32>, vector<1x16xf32> -> vector<1x144xf32>
    %229 = arith.truncf %228 : vector<1x144xf32> to vector<1x144xbf16>
    %230 = vector.broadcast %223 : vector<16x1xf32> to vector<16x256xf32>
    %231 = arith.mulf %155, %230 : vector<16x256xf32>
    %c0_150 = arith.constant 0 : index
    %c0_151 = arith.constant 0 : index
    %232 = vector.load %arg10[%c0_150, %c0_151] : memref<16x144xbf16, #tpu.memory_space<vmem>>, vector<16x144xbf16>
    %233 = vector.broadcast %229 : vector<1x144xbf16> to vector<16x144xbf16>
    %234 = arith.mulf %232, %233 : vector<16x144xbf16>
    %cst_152 = arith.constant dense<0.000000e+00> : vector<16x256xf32>
    %235 = tpu.matmul %234, %190, %cst_152 {dimension_numbers = #tpu.dot_dimension_numbers<[1], [0], [0], [1], [0, 0, 1, 1], [], []>} : vector<16x144xbf16>, vector<144x256xbf16>, vector<16x256xf32> -> vector<16x256xf32>
    %c0_153 = arith.constant 0 : index
    %c0_154 = arith.constant 0 : index
    %236 = vector.load %arg11[%c0_153, %c0_154] : memref<16x1xf32, #tpu.memory_space<vmem>>, vector<16x1xf32>
    %237 = vector.broadcast %236 : vector<16x1xf32> to vector<16x256xf32>
    %238 = arith.addf %235, %237 : vector<16x256xf32>
    %239 = arith.addf %238, %231 : vector<16x256xf32>
    %240 = arith.addf %239, %16 : vector<16x256xf32>
    %c0_155 = arith.constant 0 : index
    %c0_156 = arith.constant 0 : index
    %c0_157 = arith.constant 0 : index
    %241 = vector.load %arg12[%c0_155, %c0_156, %c0_157] : memref<2x16x256xf32, #tpu.memory_space<vmem>>, vector<1x16x256xf32>
    %242 = vector.shape_cast %241 : vector<1x16x256xf32> to vector<16x256xf32>
    %243 = vector.shape_cast %240 : vector<16x256xf32> to vector<1x16x256xf32>
    tpu.vector_store %arg12[%c0_155, %c0_156, %c0_157], %243 {strides = array<i32>} : memref<2x16x256xf32, #tpu.memory_space<vmem>>, vector<1x16x256xf32>,
    %cst_158 = arith.constant 0.000000e+00 : bf16
    %244 = vector.broadcast %cst_158 : bf16 to vector<16x128xbf16>
    %c1_159 = arith.constant 1 : index
    %c0_160 = arith.constant 0 : index
    %c0_161 = arith.constant 0 : index
    %245 = vector.load %arg13[%c1_159, %c0_160, %c0_161] : memref<2x16x512xbf16, #tpu.memory_space<vmem>>, vector<1x16x128xbf16>
    %246 = vector.shape_cast %245 : vector<1x16x128xbf16> to vector<16x128xbf16>
    %247 = vector.shape_cast %244 : vector<16x128xbf16> to vector<1x16x128xbf16>
    tpu.vector_store %arg13[%c1_159, %c0_160, %c0_161], %247 {strides = array<i32>} : memref<2x16x512xbf16, #tpu.memory_space<vmem>>, vector<1x16x128xbf16>,
    %cst_162 = arith.constant 0.000000e+00 : bf16
    %248 = vector.broadcast %cst_162 : bf16 to vector<16x128xbf16>
    %c1_163 = arith.constant 1 : index
    %c0_164 = arith.constant 0 : index
    %c384_165 = arith.constant 384 : index
    %249 = vector.load %arg13[%c1_163, %c0_164, %c384_165] : memref<2x16x512xbf16, #tpu.memory_space<vmem>>, vector<1x16x128xbf16>
    %250 = vector.shape_cast %249 : vector<1x16x128xbf16> to vector<16x128xbf16>
    %251 = vector.shape_cast %248 : vector<16x128xbf16> to vector<1x16x128xbf16>
    tpu.vector_store %arg13[%c1_163, %c0_164, %c384_165], %251 {strides = array<i32>} : memref<2x16x512xbf16, #tpu.memory_space<vmem>>, vector<1x16x128xbf16>,
    %c1_166 = arith.constant 1 : index
    %c0_167 = arith.constant 0 : index
    %c0_168 = arith.constant 0 : index
    %252 = vector.load %arg1[%c1_166, %c0_167, %c0_168] : memref<2x16x256xf32, #tpu.memory_space<vmem>>, vector<1x16x256xf32>
    %253 = vector.shape_cast %252 : vector<1x16x256xf32> to vector<16x256xf32>
    %254 = arith.truncf %253 : vector<16x256xf32> to vector<16x256xbf16>
    %c1_169 = arith.constant 1 : index
    %c0_170 = arith.constant 0 : index
    %c128_171 = arith.constant 128 : index
    %255 = vector.load %arg13[%c1_169, %c0_170, %c128_171] : memref<2x16x512xbf16, #tpu.memory_space<vmem>>, vector<1x16x256xbf16>
    %256 = vector.shape_cast %255 : vector<1x16x256xbf16> to vector<16x256xbf16>
    %257 = vector.shape_cast %254 : vector<16x256xbf16> to vector<1x16x256xbf16>
    tpu.vector_store %arg13[%c1_169, %c0_170, %c128_171], %257 {strides = array<i32>} : memref<2x16x512xbf16, #tpu.memory_space<vmem>>, vector<1x16x256xbf16>,
    %c1_172 = arith.constant 1 : index
    %c0_173 = arith.constant 0 : index
    %c111_174 = arith.constant 111 : index
    %258 = vector.load %arg13[%c1_172, %c0_173, %c111_174] : memref<2x16x512xbf16, #tpu.memory_space<vmem>>, vector<1x16x256xbf16>
    %259 = vector.shape_cast %258 : vector<1x16x256xbf16> to vector<16x256xbf16>
    %260 = vector.broadcast %0 : vector<1x256xbf16> to vector<16x256xbf16>
    %261 = arith.mulf %259, %260 : vector<16x256xbf16>
    %c1_175 = arith.constant 1 : index
    %c0_176 = arith.constant 0 : index
    %c112_177 = arith.constant 112 : index
    %262 = vector.load %arg13[%c1_175, %c0_176, %c112_177] : memref<2x16x512xbf16, #tpu.memory_space<vmem>>, vector<1x16x256xbf16>
    %263 = vector.shape_cast %262 : vector<1x16x256xbf16> to vector<16x256xbf16>
    %c1_178 = arith.constant 1 : index
    %c0_179 = arith.constant 0 : index
    %c113_180 = arith.constant 113 : index
    %264 = vector.load %arg13[%c1_178, %c0_179, %c113_180] : memref<2x16x512xbf16, #tpu.memory_space<vmem>>, vector<1x16x256xbf16>
    %265 = vector.shape_cast %264 : vector<1x16x256xbf16> to vector<16x256xbf16>
    %266 = vector.broadcast %1 : vector<1x256xbf16> to vector<16x256xbf16>
    %267 = arith.mulf %265, %266 : vector<16x256xbf16>
    %c1_181 = arith.constant 1 : index
    %c0_182 = arith.constant 0 : index
    %c127_183 = arith.constant 127 : index
    %268 = vector.load %arg13[%c1_181, %c0_182, %c127_183] : memref<2x16x512xbf16, #tpu.memory_space<vmem>>, vector<1x16x256xbf16>
    %269 = vector.shape_cast %268 : vector<1x16x256xbf16> to vector<16x256xbf16>
    %270 = vector.broadcast %0 : vector<1x256xbf16> to vector<16x256xbf16>
    %271 = arith.mulf %269, %270 : vector<16x256xbf16>
    %c1_184 = arith.constant 1 : index
    %c0_185 = arith.constant 0 : index
    %c128_186 = arith.constant 128 : index
    %272 = vector.load %arg13[%c1_184, %c0_185, %c128_186] : memref<2x16x512xbf16, #tpu.memory_space<vmem>>, vector<1x16x256xbf16>
    %273 = vector.shape_cast %272 : vector<1x16x256xbf16> to vector<16x256xbf16>
    %c1_187 = arith.constant 1 : index
    %c0_188 = arith.constant 0 : index
    %c129_189 = arith.constant 129 : index
    %274 = vector.load %arg13[%c1_187, %c0_188, %c129_189] : memref<2x16x512xbf16, #tpu.memory_space<vmem>>, vector<1x16x256xbf16>
    %275 = vector.shape_cast %274 : vector<1x16x256xbf16> to vector<16x256xbf16>
    %276 = vector.broadcast %1 : vector<1x256xbf16> to vector<16x256xbf16>
    %277 = arith.mulf %275, %276 : vector<16x256xbf16>
    %c1_190 = arith.constant 1 : index
    %c0_191 = arith.constant 0 : index
    %c143_192 = arith.constant 143 : index
    %278 = vector.load %arg13[%c1_190, %c0_191, %c143_192] : memref<2x16x512xbf16, #tpu.memory_space<vmem>>, vector<1x16x256xbf16>
    %279 = vector.shape_cast %278 : vector<1x16x256xbf16> to vector<16x256xbf16>
    %280 = vector.broadcast %0 : vector<1x256xbf16> to vector<16x256xbf16>
    %281 = arith.mulf %279, %280 : vector<16x256xbf16>
    %c1_193 = arith.constant 1 : index
    %c0_194 = arith.constant 0 : index
    %c144_195 = arith.constant 144 : index
    %282 = vector.load %arg13[%c1_193, %c0_194, %c144_195] : memref<2x16x512xbf16, #tpu.memory_space<vmem>>, vector<1x16x256xbf16>
    %283 = vector.shape_cast %282 : vector<1x16x256xbf16> to vector<16x256xbf16>
    %c1_196 = arith.constant 1 : index
    %c0_197 = arith.constant 0 : index
    %c145_198 = arith.constant 145 : index
    %284 = vector.load %arg13[%c1_196, %c0_197, %c145_198] : memref<2x16x512xbf16, #tpu.memory_space<vmem>>, vector<1x16x256xbf16>
    %285 = vector.shape_cast %284 : vector<1x16x256xbf16> to vector<16x256xbf16>
    %286 = vector.broadcast %1 : vector<1x256xbf16> to vector<16x256xbf16>
    %287 = arith.mulf %285, %286 : vector<16x256xbf16>
    %288 = tpu.concatenate %261, %263, %267, %271, %273, %277, %281, %283, %287 in 0 : vector<16x256xbf16>, vector<16x256xbf16>, vector<16x256xbf16>, vector<16x256xbf16>, vector<16x256xbf16>, vector<16x256xbf16>, vector<16x256xbf16>, vector<16x256xbf16>, vector<16x256xbf16> -> vector<144x256xbf16>
    %c0_199 = arith.constant 0 : index
    %c0_200 = arith.constant 0 : index
    %c0_201 = arith.constant 0 : index
    %289 = vector.load %arg4[%c0_199, %c0_200, %c0_201] : memref<2x32x144xbf16, #tpu.memory_space<vmem>>, vector<1x32x144xbf16>
    %290 = vector.shape_cast %289 : vector<1x32x144xbf16> to vector<32x144xbf16>
    %cst_202 = arith.constant dense<0.000000e+00> : vector<32x256xf32>
    %291 = tpu.matmul %290, %288, %cst_202 {dimension_numbers = #tpu.dot_dimension_numbers<[1], [0], [0], [1], [0, 0, 1, 1], [], []>} : vector<32x144xbf16>, vector<144x256xbf16>, vector<32x256xf32> -> vector<32x256xf32>
    %c0_203 = arith.constant 0 : index
    %c0_204 = arith.constant 0 : index
    %c0_205 = arith.constant 0 : index
    %292 = vector.load %arg5[%c0_203, %c0_204, %c0_205] : memref<2x32x1xf32, #tpu.memory_space<vmem>>, vector<1x32x1xf32>
    %293 = vector.shape_cast %292 : vector<1x32x1xf32> to vector<32x1xf32>
    %294 = vector.broadcast %293 : vector<32x1xf32> to vector<32x256xf32>
    %295 = arith.addf %291, %294 : vector<32x256xf32>
    %296 = vector.extract_strided_slice %295 {offsets = [0, 0], sizes = [16, 256], strides = [1, 1]} : vector<32x256xf32> to vector<16x256xf32>
    %297 = arith.addf %296, %253 : vector<16x256xf32>
    %cst_206 = arith.constant 0.000000e+00 : f32
    %298 = vector.broadcast %cst_206 : f32 to vector<16x256xf32>
    %299 = arith.maximumf %297, %298 : vector<16x256xf32>
    %300 = vector.extract_strided_slice %295 {offsets = [16, 0], sizes = [16, 256], strides = [1, 1]} : vector<32x256xf32> to vector<16x256xf32>
    %301 = arith.addf %300, %299 : vector<16x256xf32>
    %302 = arith.truncf %301 : vector<16x256xf32> to vector<16x256xbf16>
    %c1_207 = arith.constant 1 : index
    %c0_208 = arith.constant 0 : index
    %c128_209 = arith.constant 128 : index
    %303 = vector.load %arg13[%c1_207, %c0_208, %c128_209] : memref<2x16x512xbf16, #tpu.memory_space<vmem>>, vector<1x16x256xbf16>
    %304 = vector.shape_cast %303 : vector<1x16x256xbf16> to vector<16x256xbf16>
    %305 = vector.shape_cast %302 : vector<16x256xbf16> to vector<1x16x256xbf16>
    tpu.vector_store %arg13[%c1_207, %c0_208, %c128_209], %305 {strides = array<i32>} : memref<2x16x512xbf16, #tpu.memory_space<vmem>>, vector<1x16x256xbf16>,
    %c1_210 = arith.constant 1 : index
    %c0_211 = arith.constant 0 : index
    %c111_212 = arith.constant 111 : index
    %306 = vector.load %arg13[%c1_210, %c0_211, %c111_212] : memref<2x16x512xbf16, #tpu.memory_space<vmem>>, vector<1x16x256xbf16>
    %307 = vector.shape_cast %306 : vector<1x16x256xbf16> to vector<16x256xbf16>
    %308 = vector.broadcast %0 : vector<1x256xbf16> to vector<16x256xbf16>
    %309 = arith.mulf %307, %308 : vector<16x256xbf16>
    %c1_213 = arith.constant 1 : index
    %c0_214 = arith.constant 0 : index
    %c112_215 = arith.constant 112 : index
    %310 = vector.load %arg13[%c1_213, %c0_214, %c112_215] : memref<2x16x512xbf16, #tpu.memory_space<vmem>>, vector<1x16x256xbf16>
    %311 = vector.shape_cast %310 : vector<1x16x256xbf16> to vector<16x256xbf16>
    %c1_216 = arith.constant 1 : index
    %c0_217 = arith.constant 0 : index
    %c113_218 = arith.constant 113 : index
    %312 = vector.load %arg13[%c1_216, %c0_217, %c113_218] : memref<2x16x512xbf16, #tpu.memory_space<vmem>>, vector<1x16x256xbf16>
    %313 = vector.shape_cast %312 : vector<1x16x256xbf16> to vector<16x256xbf16>
    %314 = vector.broadcast %1 : vector<1x256xbf16> to vector<16x256xbf16>
    %315 = arith.mulf %313, %314 : vector<16x256xbf16>
    %c1_219 = arith.constant 1 : index
    %c0_220 = arith.constant 0 : index
    %c127_221 = arith.constant 127 : index
    %316 = vector.load %arg13[%c1_219, %c0_220, %c127_221] : memref<2x16x512xbf16, #tpu.memory_space<vmem>>, vector<1x16x256xbf16>
    %317 = vector.shape_cast %316 : vector<1x16x256xbf16> to vector<16x256xbf16>
    %318 = vector.broadcast %0 : vector<1x256xbf16> to vector<16x256xbf16>
    %319 = arith.mulf %317, %318 : vector<16x256xbf16>
    %c1_222 = arith.constant 1 : index
    %c0_223 = arith.constant 0 : index
    %c128_224 = arith.constant 128 : index
    %320 = vector.load %arg13[%c1_222, %c0_223, %c128_224] : memref<2x16x512xbf16, #tpu.memory_space<vmem>>, vector<1x16x256xbf16>
    %321 = vector.shape_cast %320 : vector<1x16x256xbf16> to vector<16x256xbf16>
    %c1_225 = arith.constant 1 : index
    %c0_226 = arith.constant 0 : index
    %c129_227 = arith.constant 129 : index
    %322 = vector.load %arg13[%c1_225, %c0_226, %c129_227] : memref<2x16x512xbf16, #tpu.memory_space<vmem>>, vector<1x16x256xbf16>
    %323 = vector.shape_cast %322 : vector<1x16x256xbf16> to vector<16x256xbf16>
    %324 = vector.broadcast %1 : vector<1x256xbf16> to vector<16x256xbf16>
    %325 = arith.mulf %323, %324 : vector<16x256xbf16>
    %c1_228 = arith.constant 1 : index
    %c0_229 = arith.constant 0 : index
    %c143_230 = arith.constant 143 : index
    %326 = vector.load %arg13[%c1_228, %c0_229, %c143_230] : memref<2x16x512xbf16, #tpu.memory_space<vmem>>, vector<1x16x256xbf16>
    %327 = vector.shape_cast %326 : vector<1x16x256xbf16> to vector<16x256xbf16>
    %328 = vector.broadcast %0 : vector<1x256xbf16> to vector<16x256xbf16>
    %329 = arith.mulf %327, %328 : vector<16x256xbf16>
    %c1_231 = arith.constant 1 : index
    %c0_232 = arith.constant 0 : index
    %c144_233 = arith.constant 144 : index
    %330 = vector.load %arg13[%c1_231, %c0_232, %c144_233] : memref<2x16x512xbf16, #tpu.memory_space<vmem>>, vector<1x16x256xbf16>
    %331 = vector.shape_cast %330 : vector<1x16x256xbf16> to vector<16x256xbf16>
    %c1_234 = arith.constant 1 : index
    %c0_235 = arith.constant 0 : index
    %c145_236 = arith.constant 145 : index
    %332 = vector.load %arg13[%c1_234, %c0_235, %c145_236] : memref<2x16x512xbf16, #tpu.memory_space<vmem>>, vector<1x16x256xbf16>
    %333 = vector.shape_cast %332 : vector<1x16x256xbf16> to vector<16x256xbf16>
    %334 = vector.broadcast %1 : vector<1x256xbf16> to vector<16x256xbf16>
    %335 = arith.mulf %333, %334 : vector<16x256xbf16>
    %336 = tpu.concatenate %309, %311, %315, %319, %321, %325, %329, %331, %335 in 0 : vector<16x256xbf16>, vector<16x256xbf16>, vector<16x256xbf16>, vector<16x256xbf16>, vector<16x256xbf16>, vector<16x256xbf16>, vector<16x256xbf16>, vector<16x256xbf16>, vector<16x256xbf16> -> vector<144x256xbf16>
    %cst_237 = arith.constant dense<0.000000e+00> : vector<16xf32>
    %337 = vector.multi_reduction <add>, %301, %cst_237 [1] : vector<16x256xf32> to vector<16xf32>
    %338 = vector.shape_cast %337 : vector<16xf32> to vector<16x1xf32>
    %cst_238 = arith.constant 2.560000e+02 : f32
    %339 = vector.broadcast %cst_238 : f32 to vector<16x1xf32>
    %340 = arith.divf %338, %339 : vector<16x1xf32>
    %c0_239 = arith.constant 0 : index
    %c0_240 = arith.constant 0 : index
    %c0_241 = arith.constant 0 : index
    %341 = vector.load %arg6[%c0_239, %c0_240, %c0_241] : memref<2x16x4xf32, #tpu.memory_space<vmem>>, vector<1x16x4xf32>
    %342 = vector.shape_cast %341 : vector<1x16x4xf32> to vector<16x4xf32>
    %343 = vector.broadcast %340 : vector<16x1xf32> to vector<16x4xf32>
    %344 = arith.mulf %342, %343 : vector<16x4xf32>
    %cst_242 = arith.constant dense<0.000000e+00> : vector<4xf32>
    %345 = vector.multi_reduction <add>, %344, %cst_242 [0] : vector<16x4xf32> to vector<4xf32>
    %346 = vector.shape_cast %345 : vector<4xf32> to vector<1x4xf32>
    %c0_243 = arith.constant 0 : index
    %c0_244 = arith.constant 0 : index
    %c0_245 = arith.constant 0 : index
    %347 = vector.load %arg7[%c0_243, %c0_244, %c0_245] : memref<2x1x4xf32, #tpu.memory_space<vmem>>, vector<1x1x4xf32>
    %348 = vector.shape_cast %347 : vector<1x1x4xf32> to vector<1x4xf32>
    %349 = arith.addf %346, %348 : vector<1x4xf32>
    %cst_246 = arith.constant 0.000000e+00 : f32
    %350 = vector.broadcast %cst_246 : f32 to vector<1x4xf32>
    %351 = arith.cmpf ogt, %349, %350 : vector<1x4xf32>
    %cst_247 = arith.constant 0.00999999977 : f32
    %352 = vector.broadcast %cst_247 : f32 to vector<1x4xf32>
    %353 = arith.mulf %352, %349 : vector<1x4xf32>
    %354 = arith.select %351, %349, %353 : vector<1x4xi1>, vector<1x4xf32>
    %c0_248 = arith.constant 0 : index
    %c0_249 = arith.constant 0 : index
    %c0_250 = arith.constant 0 : index
    %355 = vector.load %arg8[%c0_248, %c0_249, %c0_250] : memref<2x16x4xf32, #tpu.memory_space<vmem>>, vector<1x16x4xf32>
    %356 = vector.shape_cast %355 : vector<1x16x4xf32> to vector<16x4xf32>
    %357 = vector.broadcast %354 : vector<1x4xf32> to vector<16x4xf32>
    %358 = arith.mulf %356, %357 : vector<16x4xf32>
    %cst_251 = arith.constant dense<0.000000e+00> : vector<16xf32>
    %359 = vector.multi_reduction <add>, %358, %cst_251 [1] : vector<16x4xf32> to vector<16xf32>
    %360 = vector.shape_cast %359 : vector<16xf32> to vector<16x1xf32>
    %c0_252 = arith.constant 0 : index
    %c0_253 = arith.constant 0 : index
    %c0_254 = arith.constant 0 : index
    %361 = vector.load %arg9[%c0_252, %c0_253, %c0_254] : memref<2x16x1xf32, #tpu.memory_space<vmem>>, vector<1x16x1xf32>
    %362 = vector.shape_cast %361 : vector<1x16x1xf32> to vector<16x1xf32>
    %363 = arith.addf %360, %362 : vector<16x1xf32>
    %cst_255 = arith.constant 0.000000e+00 : f32
    %364 = vector.broadcast %cst_255 : f32 to vector<16x1xf32>
    %365 = arith.subf %364, %363 : vector<16x1xf32>
    %366 = math.exp %365 : vector<16x1xf32>
    %cst_256 = arith.constant 1.000000e+00 : f32
    %367 = vector.broadcast %cst_256 : f32 to vector<16x1xf32>
    %368 = arith.addf %367, %366 : vector<16x1xf32>
    %369 = tpu.reciprocal %368 {approx = true} : vector<16x1xf32> -> vector<16x1xf32>
    %370 = vector.broadcast %369 : vector<16x1xf32> to vector<16x16xf32>
    %371 = arith.mulf %6, %370 : vector<16x16xf32>
    %cst_257 = arith.constant dense<0.000000e+00> : vector<16xf32>
    %372 = vector.multi_reduction <add>, %371, %cst_257 [0] : vector<16x16xf32> to vector<16xf32>
    %373 = vector.shape_cast %372 : vector<16xf32> to vector<1x16xf32>
    %374 = tpu.concatenate %373, %373, %373, %373, %373, %373, %373, %373, %373 in 1 : vector<1x16xf32>, vector<1x16xf32>, vector<1x16xf32>, vector<1x16xf32>, vector<1x16xf32>, vector<1x16xf32>, vector<1x16xf32>, vector<1x16xf32>, vector<1x16xf32> -> vector<1x144xf32>
    %375 = arith.truncf %374 : vector<1x144xf32> to vector<1x144xbf16>
    %376 = vector.broadcast %369 : vector<16x1xf32> to vector<16x256xf32>
    %377 = arith.mulf %301, %376 : vector<16x256xf32>
    %c1_258 = arith.constant 1 : index
    %c0_259 = arith.constant 0 : index
    %c0_260 = arith.constant 0 : index
    %378 = vector.load %arg4[%c1_258, %c0_259, %c0_260] : memref<2x32x144xbf16, #tpu.memory_space<vmem>>, vector<1x32x144xbf16>
    %379 = vector.shape_cast %378 : vector<1x32x144xbf16> to vector<32x144xbf16>
    %380 = vector.broadcast %375 : vector<1x144xbf16> to vector<32x144xbf16>
    %381 = arith.mulf %379, %380 : vector<32x144xbf16>
    %cst_261 = arith.constant dense<0.000000e+00> : vector<32x256xf32>
    %382 = tpu.matmul %381, %336, %cst_261 {dimension_numbers = #tpu.dot_dimension_numbers<[1], [0], [0], [1], [0, 0, 1, 1], [], []>} : vector<32x144xbf16>, vector<144x256xbf16>, vector<32x256xf32> -> vector<32x256xf32>
    %c1_262 = arith.constant 1 : index
    %c0_263 = arith.constant 0 : index
    %c0_264 = arith.constant 0 : index
    %383 = vector.load %arg5[%c1_262, %c0_263, %c0_264] : memref<2x32x1xf32, #tpu.memory_space<vmem>>, vector<1x32x1xf32>
    %384 = vector.shape_cast %383 : vector<1x32x1xf32> to vector<32x1xf32>
    %385 = vector.broadcast %384 : vector<32x1xf32> to vector<32x256xf32>
    %386 = arith.addf %382, %385 : vector<32x256xf32>
    %387 = vector.extract_strided_slice %386 {offsets = [0, 0], sizes = [16, 256], strides = [1, 1]} : vector<32x256xf32> to vector<16x256xf32>
    %388 = arith.addf %387, %377 : vector<16x256xf32>
    %cst_265 = arith.constant 0.000000e+00 : f32
    %389 = vector.broadcast %cst_265 : f32 to vector<16x256xf32>
    %390 = arith.maximumf %388, %389 : vector<16x256xf32>
    %391 = vector.extract_strided_slice %386 {offsets = [16, 0], sizes = [16, 256], strides = [1, 1]} : vector<32x256xf32> to vector<16x256xf32>
    %392 = arith.addf %391, %390 : vector<16x256xf32>
    %393 = arith.truncf %392 : vector<16x256xf32> to vector<16x256xbf16>
    %c1_266 = arith.constant 1 : index
    %c0_267 = arith.constant 0 : index
    %c128_268 = arith.constant 128 : index
    %394 = vector.load %arg13[%c1_266, %c0_267, %c128_268] : memref<2x16x512xbf16, #tpu.memory_space<vmem>>, vector<1x16x256xbf16>
    %395 = vector.shape_cast %394 : vector<1x16x256xbf16> to vector<16x256xbf16>
    %396 = vector.shape_cast %393 : vector<16x256xbf16> to vector<1x16x256xbf16>
    tpu.vector_store %arg13[%c1_266, %c0_267, %c128_268], %396 {strides = array<i32>} : memref<2x16x512xbf16, #tpu.memory_space<vmem>>, vector<1x16x256xbf16>,
    %c1_269 = arith.constant 1 : index
    %c0_270 = arith.constant 0 : index
    %c111_271 = arith.constant 111 : index
    %397 = vector.load %arg13[%c1_269, %c0_270, %c111_271] : memref<2x16x512xbf16, #tpu.memory_space<vmem>>, vector<1x16x256xbf16>
    %398 = vector.shape_cast %397 : vector<1x16x256xbf16> to vector<16x256xbf16>
    %399 = vector.broadcast %0 : vector<1x256xbf16> to vector<16x256xbf16>
    %400 = arith.mulf %398, %399 : vector<16x256xbf16>
    %c1_272 = arith.constant 1 : index
    %c0_273 = arith.constant 0 : index
    %c112_274 = arith.constant 112 : index
    %401 = vector.load %arg13[%c1_272, %c0_273, %c112_274] : memref<2x16x512xbf16, #tpu.memory_space<vmem>>, vector<1x16x256xbf16>
    %402 = vector.shape_cast %401 : vector<1x16x256xbf16> to vector<16x256xbf16>
    %c1_275 = arith.constant 1 : index
    %c0_276 = arith.constant 0 : index
    %c113_277 = arith.constant 113 : index
    %403 = vector.load %arg13[%c1_275, %c0_276, %c113_277] : memref<2x16x512xbf16, #tpu.memory_space<vmem>>, vector<1x16x256xbf16>
    %404 = vector.shape_cast %403 : vector<1x16x256xbf16> to vector<16x256xbf16>
    %405 = vector.broadcast %1 : vector<1x256xbf16> to vector<16x256xbf16>
    %406 = arith.mulf %404, %405 : vector<16x256xbf16>
    %c1_278 = arith.constant 1 : index
    %c0_279 = arith.constant 0 : index
    %c127_280 = arith.constant 127 : index
    %407 = vector.load %arg13[%c1_278, %c0_279, %c127_280] : memref<2x16x512xbf16, #tpu.memory_space<vmem>>, vector<1x16x256xbf16>
    %408 = vector.shape_cast %407 : vector<1x16x256xbf16> to vector<16x256xbf16>
    %409 = vector.broadcast %0 : vector<1x256xbf16> to vector<16x256xbf16>
    %410 = arith.mulf %408, %409 : vector<16x256xbf16>
    %c1_281 = arith.constant 1 : index
    %c0_282 = arith.constant 0 : index
    %c128_283 = arith.constant 128 : index
    %411 = vector.load %arg13[%c1_281, %c0_282, %c128_283] : memref<2x16x512xbf16, #tpu.memory_space<vmem>>, vector<1x16x256xbf16>
    %412 = vector.shape_cast %411 : vector<1x16x256xbf16> to vector<16x256xbf16>
    %c1_284 = arith.constant 1 : index
    %c0_285 = arith.constant 0 : index
    %c129_286 = arith.constant 129 : index
    %413 = vector.load %arg13[%c1_284, %c0_285, %c129_286] : memref<2x16x512xbf16, #tpu.memory_space<vmem>>, vector<1x16x256xbf16>
    %414 = vector.shape_cast %413 : vector<1x16x256xbf16> to vector<16x256xbf16>
    %415 = vector.broadcast %1 : vector<1x256xbf16> to vector<16x256xbf16>
    %416 = arith.mulf %414, %415 : vector<16x256xbf16>
    %c1_287 = arith.constant 1 : index
    %c0_288 = arith.constant 0 : index
    %c143_289 = arith.constant 143 : index
    %417 = vector.load %arg13[%c1_287, %c0_288, %c143_289] : memref<2x16x512xbf16, #tpu.memory_space<vmem>>, vector<1x16x256xbf16>
    %418 = vector.shape_cast %417 : vector<1x16x256xbf16> to vector<16x256xbf16>
    %419 = vector.broadcast %0 : vector<1x256xbf16> to vector<16x256xbf16>
    %420 = arith.mulf %418, %419 : vector<16x256xbf16>
    %c1_290 = arith.constant 1 : index
    %c0_291 = arith.constant 0 : index
    %c144_292 = arith.constant 144 : index
    %421 = vector.load %arg13[%c1_290, %c0_291, %c144_292] : memref<2x16x512xbf16, #tpu.memory_space<vmem>>, vector<1x16x256xbf16>
    %422 = vector.shape_cast %421 : vector<1x16x256xbf16> to vector<16x256xbf16>
    %c1_293 = arith.constant 1 : index
    %c0_294 = arith.constant 0 : index
    %c145_295 = arith.constant 145 : index
    %423 = vector.load %arg13[%c1_293, %c0_294, %c145_295] : memref<2x16x512xbf16, #tpu.memory_space<vmem>>, vector<1x16x256xbf16>
    %424 = vector.shape_cast %423 : vector<1x16x256xbf16> to vector<16x256xbf16>
    %425 = vector.broadcast %1 : vector<1x256xbf16> to vector<16x256xbf16>
    %426 = arith.mulf %424, %425 : vector<16x256xbf16>
    %427 = tpu.concatenate %400, %402, %406, %410, %412, %416, %420, %422, %426 in 0 : vector<16x256xbf16>, vector<16x256xbf16>, vector<16x256xbf16>, vector<16x256xbf16>, vector<16x256xbf16>, vector<16x256xbf16>, vector<16x256xbf16>, vector<16x256xbf16>, vector<16x256xbf16> -> vector<144x256xbf16>
    %cst_296 = arith.constant dense<0.000000e+00> : vector<16xf32>
    %428 = vector.multi_reduction <add>, %392, %cst_296 [1] : vector<16x256xf32> to vector<16xf32>
    %429 = vector.shape_cast %428 : vector<16xf32> to vector<16x1xf32>
    %cst_297 = arith.constant 2.560000e+02 : f32
    %430 = vector.broadcast %cst_297 : f32 to vector<16x1xf32>
    %431 = arith.divf %429, %430 : vector<16x1xf32>
    %c1_298 = arith.constant 1 : index
    %c0_299 = arith.constant 0 : index
    %c0_300 = arith.constant 0 : index
    %432 = vector.load %arg6[%c1_298, %c0_299, %c0_300] : memref<2x16x4xf32, #tpu.memory_space<vmem>>, vector<1x16x4xf32>
    %433 = vector.shape_cast %432 : vector<1x16x4xf32> to vector<16x4xf32>
    %434 = vector.broadcast %431 : vector<16x1xf32> to vector<16x4xf32>
    %435 = arith.mulf %433, %434 : vector<16x4xf32>
    %cst_301 = arith.constant dense<0.000000e+00> : vector<4xf32>
    %436 = vector.multi_reduction <add>, %435, %cst_301 [0] : vector<16x4xf32> to vector<4xf32>
    %437 = vector.shape_cast %436 : vector<4xf32> to vector<1x4xf32>
    %c1_302 = arith.constant 1 : index
    %c0_303 = arith.constant 0 : index
    %c0_304 = arith.constant 0 : index
    %438 = vector.load %arg7[%c1_302, %c0_303, %c0_304] : memref<2x1x4xf32, #tpu.memory_space<vmem>>, vector<1x1x4xf32>
    %439 = vector.shape_cast %438 : vector<1x1x4xf32> to vector<1x4xf32>
    %440 = arith.addf %437, %439 : vector<1x4xf32>
    %cst_305 = arith.constant 0.000000e+00 : f32
    %441 = vector.broadcast %cst_305 : f32 to vector<1x4xf32>
    %442 = arith.cmpf ogt, %440, %441 : vector<1x4xf32>
    %cst_306 = arith.constant 0.00999999977 : f32
    %443 = vector.broadcast %cst_306 : f32 to vector<1x4xf32>
    %444 = arith.mulf %443, %440 : vector<1x4xf32>
    %445 = arith.select %442, %440, %444 : vector<1x4xi1>, vector<1x4xf32>
    %c1_307 = arith.constant 1 : index
    %c0_308 = arith.constant 0 : index
    %c0_309 = arith.constant 0 : index
    %446 = vector.load %arg8[%c1_307, %c0_308, %c0_309] : memref<2x16x4xf32, #tpu.memory_space<vmem>>, vector<1x16x4xf32>
    %447 = vector.shape_cast %446 : vector<1x16x4xf32> to vector<16x4xf32>
    %448 = vector.broadcast %445 : vector<1x4xf32> to vector<16x4xf32>
    %449 = arith.mulf %447, %448 : vector<16x4xf32>
    %cst_310 = arith.constant dense<0.000000e+00> : vector<16xf32>
    %450 = vector.multi_reduction <add>, %449, %cst_310 [1] : vector<16x4xf32> to vector<16xf32>
    %451 = vector.shape_cast %450 : vector<16xf32> to vector<16x1xf32>
    %c1_311 = arith.constant 1 : index
    %c0_312 = arith.constant 0 : index
    %c0_313 = arith.constant 0 : index
    %452 = vector.load %arg9[%c1_311, %c0_312, %c0_313] : memref<2x16x1xf32, #tpu.memory_space<vmem>>, vector<1x16x1xf32>
    %453 = vector.shape_cast %452 : vector<1x16x1xf32> to vector<16x1xf32>
    %454 = arith.addf %451, %453 : vector<16x1xf32>
    %cst_314 = arith.constant 0.000000e+00 : f32
    %455 = vector.broadcast %cst_314 : f32 to vector<16x1xf32>
    %456 = arith.subf %455, %454 : vector<16x1xf32>
    %457 = math.exp %456 : vector<16x1xf32>
    %cst_315 = arith.constant 1.000000e+00 : f32
    %458 = vector.broadcast %cst_315 : f32 to vector<16x1xf32>
    %459 = arith.addf %458, %457 : vector<16x1xf32>
    %460 = tpu.reciprocal %459 {approx = true} : vector<16x1xf32> -> vector<16x1xf32>
    %461 = vector.broadcast %460 : vector<16x1xf32> to vector<16x16xf32>
    %462 = arith.mulf %6, %461 : vector<16x16xf32>
    %cst_316 = arith.constant dense<0.000000e+00> : vector<16xf32>
    %463 = vector.multi_reduction <add>, %462, %cst_316 [0] : vector<16x16xf32> to vector<16xf32>
    %464 = vector.shape_cast %463 : vector<16xf32> to vector<1x16xf32>
    %465 = tpu.concatenate %464, %464, %464, %464, %464, %464, %464, %464, %464 in 1 : vector<1x16xf32>, vector<1x16xf32>, vector<1x16xf32>, vector<1x16xf32>, vector<1x16xf32>, vector<1x16xf32>, vector<1x16xf32>, vector<1x16xf32>, vector<1x16xf32> -> vector<1x144xf32>
    %466 = arith.truncf %465 : vector<1x144xf32> to vector<1x144xbf16>
    %467 = vector.broadcast %460 : vector<16x1xf32> to vector<16x256xf32>
    %468 = arith.mulf %392, %467 : vector<16x256xf32>
    %c0_317 = arith.constant 0 : index
    %c0_318 = arith.constant 0 : index
    %469 = vector.load %arg10[%c0_317, %c0_318] : memref<16x144xbf16, #tpu.memory_space<vmem>>, vector<16x144xbf16>
    %470 = vector.broadcast %466 : vector<1x144xbf16> to vector<16x144xbf16>
    %471 = arith.mulf %469, %470 : vector<16x144xbf16>
    %cst_319 = arith.constant dense<0.000000e+00> : vector<16x256xf32>
    %472 = tpu.matmul %471, %427, %cst_319 {dimension_numbers = #tpu.dot_dimension_numbers<[1], [0], [0], [1], [0, 0, 1, 1], [], []>} : vector<16x144xbf16>, vector<144x256xbf16>, vector<16x256xf32> -> vector<16x256xf32>
    %c0_320 = arith.constant 0 : index
    %c0_321 = arith.constant 0 : index
    %473 = vector.load %arg11[%c0_320, %c0_321] : memref<16x1xf32, #tpu.memory_space<vmem>>, vector<16x1xf32>
    %474 = vector.broadcast %473 : vector<16x1xf32> to vector<16x256xf32>
    %475 = arith.addf %472, %474 : vector<16x256xf32>
    %476 = arith.addf %475, %468 : vector<16x256xf32>
    %477 = arith.addf %476, %253 : vector<16x256xf32>
    %c1_322 = arith.constant 1 : index
    %c0_323 = arith.constant 0 : index
    %c0_324 = arith.constant 0 : index
    %478 = vector.load %arg12[%c1_322, %c0_323, %c0_324] : memref<2x16x256xf32, #tpu.memory_space<vmem>>, vector<1x16x256xf32>
    %479 = vector.shape_cast %478 : vector<1x16x256xf32> to vector<16x256xf32>
    %480 = vector.shape_cast %477 : vector<16x256xf32> to vector<1x16x256xf32>
    tpu.vector_store %arg12[%c1_322, %c0_323, %c0_324], %480 {strides = array<i32>} : memref<2x16x256xf32, #tpu.memory_space<vmem>>, vector<1x16x256xf32>,
    return
  }
  func.func @transform_0(%arg0: i32) -> (i32, i32, i32) {
    %c0_i32 = arith.constant 0 : i32
    %c0_i32_0 = arith.constant 0 : i32
    %c0_i32_1 = arith.constant 0 : i32
    %c0_i32_2 = arith.constant 0 : i32
    return %c0_i32, %c0_i32_0, %c0_i32_1 : i32, i32, i32
  }
  func.func @transform_1(%arg0: i32) -> (i32, i32) {
    %c0_i32 = arith.constant 0 : i32
    %c0_i32_0 = arith.constant 0 : i32
    %c0_i32_1 = arith.constant 0 : i32
    return %c0_i32, %c0_i32_0 : i32, i32
  }
  func.func @transform_2(%arg0: i32) -> (i32, i32) {
    %c0_i32 = arith.constant 0 : i32
    %c0_i32_0 = arith.constant 0 : i32
    %c0_i32_1 = arith.constant 0 : i32
    return %c0_i32, %c0_i32_0 : i32, i32
  }
  func.func @transform_3(%arg0: i32) -> (i32, i32, i32) {
    %c0_i32 = arith.constant 0 : i32
    %c0_i32_0 = arith.constant 0 : i32
    %c0_i32_1 = arith.constant 0 : i32
    %c0_i32_2 = arith.constant 0 : i32
    return %c0_i32, %c0_i32_0, %c0_i32_1 : i32, i32, i32
  }
  func.func @transform_4(%arg0: i32) -> (i32, i32, i32) {
    %c0_i32 = arith.constant 0 : i32
    %c0_i32_0 = arith.constant 0 : i32
    %c0_i32_1 = arith.constant 0 : i32
    %c0_i32_2 = arith.constant 0 : i32
    return %c0_i32, %c0_i32_0, %c0_i32_1 : i32, i32, i32
  }
  func.func @transform_5(%arg0: i32) -> (i32, i32, i32) {
    %c0_i32 = arith.constant 0 : i32
    %c0_i32_0 = arith.constant 0 : i32
    %c0_i32_1 = arith.constant 0 : i32
    %c0_i32_2 = arith.constant 0 : i32
    return %c0_i32, %c0_i32_0, %c0_i32_1 : i32, i32, i32
  }
  func.func @transform_6(%arg0: i32) -> (i32, i32, i32) {
    %c0_i32 = arith.constant 0 : i32
    %c0_i32_0 = arith.constant 0 : i32
    %c0_i32_1 = arith.constant 0 : i32
    %c0_i32_2 = arith.constant 0 : i32
    return %c0_i32, %c0_i32_0, %c0_i32_1 : i32, i32, i32
  }
  func.func @transform_7(%arg0: i32) -> (i32, i32, i32) {
    %c0_i32 = arith.constant 0 : i32
    %c0_i32_0 = arith.constant 0 : i32
    %c0_i32_1 = arith.constant 0 : i32
    %c0_i32_2 = arith.constant 0 : i32
    return %c0_i32, %c0_i32_0, %c0_i32_1 : i32, i32, i32
  }
  func.func @transform_8(%arg0: i32) -> (i32, i32, i32) {
    %c0_i32 = arith.constant 0 : i32
    %c0_i32_0 = arith.constant 0 : i32
    %c0_i32_1 = arith.constant 0 : i32
    %c0_i32_2 = arith.constant 0 : i32
    return %c0_i32, %c0_i32_0, %c0_i32_1 : i32, i32, i32
  }
  func.func @transform_9(%arg0: i32) -> (i32, i32) {
    %c0_i32 = arith.constant 0 : i32
    %c0_i32_0 = arith.constant 0 : i32
    %c0_i32_1 = arith.constant 0 : i32
    return %c0_i32, %c0_i32_0 : i32, i32
  }
  func.func @transform_10(%arg0: i32) -> (i32, i32) {
    %c0_i32 = arith.constant 0 : i32
    %c0_i32_0 = arith.constant 0 : i32
    %c0_i32_1 = arith.constant 0 : i32
    return %c0_i32, %c0_i32_0 : i32, i32
  }
  func.func @transform_11(%arg0: i32) -> (i32, i32, i32) {
    %c0_i32 = arith.constant 0 : i32
    %c0_i32_0 = arith.constant 0 : i32
    %c0_i32_1 = arith.constant 0 : i32
    %c0_i32_2 = arith.constant 0 : i32
    return %c0_i32, %c0_i32_0, %c0_i32_1 : i32, i32, i32
  }
}

</mosaic_0001>

<bundles_post_ra>
// kernel: tpu_custom_call.1
= control target key start
LH: loop header
LB: loop body
LE: loop exit
PB: predicated region body
PF: predicated region fallthrough
CT: control target
= control target key end

     0   :  { %v4599_v0 = vlaneseq  ;;  %v2785_v2 = vmov 1966171168   ;;  %v4597_v9 = vmov 0   ;;  %s4585_s0 = inlined_call_operand.vmem [shape: f32[2,16,256], index: 0, kind: input, shape index: {}]   ;;  %s4586_s1 = inlined_call_operand.vmem [shape: bf16[1,256], index: 1, kind: input, shape index: {}]   ;;  %s4587_s2 = inlined_call_operand.vmem [shape: bf16[1,256], index: 2, kind: input, shape index: {}]   ;;  %s4588_s3 = inlined_call_operand.vmem [shape: bf16[2,32,144], index: 3, kind: input, shape index: {}]   ;;  %s4589_s4 = inlined_call_operand.vmem [shape: f32[2,32,1], index: 4, kind: input, shape index: {}]   ;;  %s4590_s5 = inlined_call_operand.vmem [shape: f32[2,16,4], index: 5, kind: input, shape index: {}]   ;;  %s4591_s6 = inlined_call_operand.vmem [shape: f32[2,1,4], index: 6, kind: input, shape index: {}]   ;;  %s4592_s7 = inlined_call_operand.vmem [shape: f32[2,16,4], index: 7, kind: input, shape index: {}]   ;;  %s4593_s8 = inlined_call_operand.vmem [shape: f32[2,16,1], index: 8, kind: input, shape index: {}]   ;;  %s4594_s9 = inlined_call_operand.vmem [shape: bf16[16,144], index: 9, kind: input, shape index: {}]   ;;  %s4595_s10 = inlined_call_operand.vmem [shape: f32[16,1], index: 10, kind: input, shape index: {}]   ;;  %s4596_s11 = inlined_call_operand.hbm [shape: f32[2,16,256], index: 11, kind: output, shape index: {}]  }
   0x1   :  { %v2596_v1 = vld.sshfl [vmem:[%s4587_s2] sm:$0x11 pattern:$0x75316420]  ;;  %v76_v3 = vunpack.c.l.s4 %v2785_v2  ;;  %2687 = vset.pattern.permute.xlu0 %v4597_v9  ;;  %2688 = vset.pattern.permute.xlu1 %v4597_v9 }
   0x2   :  { %v2871_v4 = vshrl.u32 %v4599_v0, 7  ;;  %v2595_v5 = vld.sshfl [vmem:[%s4586_s1] sm:$0x11 pattern:$0x75316420]  ;;  %v125_v7 = vcombine.high %v2596_v1, %v2596_v1 }
   0x3   :  { %v77_v6 = vunpack.c.0.s8 %v76_v3  ;;  %v74_v8 = vcombine.high %v2595_v5, %v2595_v5 }
   0x4   :  { %v2880_v11 = vsub.s32 0, %v2871_v4 }
   0x5   :  { %v80_v10 = vsub.s32 %v77_v6, %v2871_v4 }
   0x7   :  { %v132_v12 = vrot.slane %v2596_v1, %v80_v10  ;;  %v81_v13 = vrot.slane %v2595_v5, %v80_v10  ;;  %v139_v14 = vrot.slane %v125_v7, %v80_v10  ;;  %v88_v15 = vrot.slane %v74_v8, %v80_v10 }
   0x8   :  { %16 = vsyncpa [#allocation4], 0  ;;  %s2787_s1 = smov 113   ;;  %s2788_s2 = smov 127   ;;  %v2893_v24 = vld [vmem:[%s4585_s0] sm:$0xff]  ;;  %v2898_v25 = vld [vmem:[%s4585_s0 + $0x10] sm:$0xff] }
   0x9   :  { %v141_v16 = vpack.i.b16 %v132_v12, %v132_v12  ;;  %v90_v17 = vpack.i.b16 %v81_v13, %v81_v13  ;;  %v148_v18 = vpack.i.b16 %v139_v14, %v139_v14  ;;  %v97_v19 = vpack.i.b16 %v88_v15, %v88_v15  ;;  %s2789_s21 = smov 1   ;;  %s2790_s22 = smov 15   ;;  %v2903_v26 = vld [vmem:[%s4585_s0 + $0x8] sm:$0xff]  ;;  %v2908_v27 = vld [vmem:[%s4585_s0 + $0x18] sm:$0xff] }
   0xa   :  { %s2791_s23 = smov 17   ;;  %s2792_s13 = smov 111   ;;  %v2913_v28 = vpack.c.bf16 %v2898_v25, %v2893_v24  ;;  %v2918_v29 = vpack.c.bf16 %v2908_v27, %v2903_v26  ;;  %vm160_vm0 = vcmask 924672   ;;  %vm172_vm1 = vcmask 1039360  }
   0xb   :  { %v146_v20 = vrot.slane %v141_v16, %v2880_v11  ;;  %v95_v21 = vrot.slane %v90_v17, %v2880_v11  ;;  %v153_v22 = vrot.slane %v148_v18, %v2880_v11  ;;  %v102_v23 = vrot.slane %v97_v19, %v2880_v11  ;;  %s2793_s14 = smov 126   ;;  %s2794_s15 = smov 112  }
   0xc   :  { %s2795_s16 = smov 96   ;;  %s2796_s17 = smov 110   ;;  %vm185_vm2 = vcmask 7168   ;;  %vm197_vm3 = vcmask 121856   ;;  %vm209_vm4 = vcmask 138240   ;;  %vm109_vm5 = vcmask 908288  }
   0xd   :  { %156 = vrot.lane.b32.xlu0 %v146_v20, %s2787_s1  ;;  %168 = vrot.lane.b32.xlu1 %v95_v21, %s2788_s2  ;;  %s2797_s18 = smov 95   ;;  %s2798_s19 = smov 94   ;;  %vm237_vm6 = vcmask 1031168   ;;  %vm249_vm7 = vcmask 916480   ;;  %vm266_vm8 = vcmask 900096   ;;  %vm288_vm9 = vcmask 777216  }
   0xe   :  { %vm278_vm10 = vcmask 785408   ;;  %vm300_vm11 = vcmask 769024   ;;  %vm442_vm12 = vcmask 130048   ;;  %vm633_vm13 = vcmask 31744   ;;  %s2802_s24 = smov 64   ;;  %s2803_s25 = smov 48  }
   0xf   :  { %s4608_s26 = smov 80  }
  0x11   :  { %158 = vrot.lane.b32.xlu0 %v153_v22, %s2787_s1  ;;  %170 = vrot.lane.b32.xlu1 %v102_v23, %s2788_s2 }
  0x15   :  { %181 = vrot.lane.b32.xlu0 %v146_v20, %s2789_s21  ;;  %183 = vrot.lane.b32.xlu1 %v153_v22, %s2789_s21  ;;  %s2800_s21 = smov 32  }
  0x19   :  { %193 = vrot.lane.b32.xlu0 %v95_v21, %s2790_s22  ;;  %195 = vrot.lane.b32.xlu1 %v102_v23, %s2790_s22  ;;  %s2801_s22 = smov 16  }
  0x1d   :  { %205 = vrot.lane.b32.xlu0 %v146_v20, %s2791_s23  ;;  %207 = vrot.lane.b32.xlu1 %v153_v22, %s2791_s23 }
  0x21   :  { %105 = vrot.lane.b32.xlu0 %v95_v21, %s2792_s13  ;;  %107 = vrot.lane.b32.xlu1 %v102_v23, %s2792_s13 }
  0x25   :  { %222 = vrot.lane.b32.xlu0 %v2913_v28, %s2788_s2  ;;  %224 = vrot.lane.b32.xlu1 %v2918_v29, %s2788_s2 }
  0x29   :  { %220 = vrot.lane.b32.xlu0 %v4597_v9, %s2788_s2  ;;  %252 = vrot.lane.b32.xlu1 %v2913_v28, %s2792_s13 }
  0x2d   :  { %254 = vrot.lane.b32.xlu0 %v2918_v29, %s2792_s13 }
  0x7f   :  { %v157_v30 = vpop.permute.xlu0 %156  ;;  %v169_v31 = vpop.permute.xlu1 %168 }
  0x80   :  { %v2930_v32 = vmul.bf16 0, %v157_v30  ;;  %v2949_v39 = vmul.bf16 0, %v169_v31 }
  0x82   :  { %231 = vrot.lane.b32.xlu1 %v2930_v32, %s2793_s14 }
  0x83   :  { %v2934_v33 = vpop.permute.xlu0 %158  ;;  %v2936_v34 = vpop.permute.xlu1 %170 }
  0x84   :  { %4620 = vst [vmem:[#allocation6_spill] sm:$0xff] %v2936_v34  ;;  %v167_v35 = vmul.bf16 %v2934_v33, %v2918_v29  ;;  %v179_v36 = vmul.bf16 %v2936_v34, %v2918_v29  ;;  %v2943_v37 = vsel %vm160_vm0, %v157_v30, %v2934_v33  ;;  %v2964_v45 = vsel %vm172_vm1, %v169_v31, %v2936_v34 }
  0x85   :  { %v166_v40 = vmul.bf16 %v2943_v37, %v2913_v28  ;;  %v178_v47 = vmul.bf16 %v2964_v45, %v2913_v28 }
  0x86   :  { %235 = vrot.lane.b32.xlu0 %v167_v35, %s2793_s14  ;;  %247 = vrot.lane.b32.xlu1 %v179_v36, %s2794_s15 }
  0x87   :  { %v2947_v38 = vpop.permute.xlu0 %181  ;;  %v184_v41 = vpop.permute.xlu1 %183 }
  0x88   :  { %4621 = vst [vmem:[#allocation7_spill] sm:$0xff] %v2947_v38  ;;  %v190_v44 = vmul.bf16 %v2947_v38, %v2913_v28  ;;  %v2966_v46 = vmul.bf16 0, %v184_v41  ;;  %v2980_v51 = vsel %vm185_vm2, %v2947_v38, %v184_v41  ;;  %vm720_vm2 = vcmask 261120  }
  0x89   :  { %4625 = vst [vmem:[#allocation11_spill] sm:$0xff] %v2980_v51  ;;  %v191_v54 = vmul.bf16 %v2980_v51, %v2918_v29 }
  0x8a   :  { %243 = vrot.lane.b32.xlu0 %v2949_v39, %s2794_s15  ;;  %233 = vrot.lane.b32.xlu1 %v166_v40, %s2793_s14  ;;  %4623 = vst [vmem:[#allocation9_spill] sm:$0xff] %v2966_v46 }
  0x8b   :  { %v2956_v42 = vpop.permute.xlu0 %193  ;;  %v196_v48 = vpop.permute.xlu1 %195 }
  0x8c   :  { %4622 = vst [vmem:[#allocation8_spill] sm:$0xff] %v2956_v42  ;;  %v202_v43 = vmul.bf16 %v2956_v42, %v2913_v28  ;;  %v2972_v49 = vmul.bf16 0, %v196_v48  ;;  %v2983_v52 = vsel %vm197_vm3, %v2956_v42, %v196_v48  ;;  %vm722_vm3 = vcmask 392192  }
  0x8d   :  { %4626 = vst [vmem:[#allocation12_spill] sm:$0xff] %v2983_v52  ;;  %v203_v55 = vmul.bf16 %v2983_v52, %v2918_v29 }
  0x8e   :  { %272 = vrot.lane.b32.xlu0 %v202_v43, %s2795_s16  ;;  %260 = vrot.lane.b32.xlu1 %v190_v44, %s2796_s17  ;;  %4624 = vst [vmem:[#allocation10_spill] sm:$0xff] %v2972_v49 }
  0x8f   :  { %v2977_v50 = vpop.permute.xlu0 %205  ;;  %v208_v56 = vpop.permute.xlu1 %207 }
  0x90   :  { %v2997_v57 = vsel %vm209_vm4, %v2977_v50, %v208_v56  ;;  %v214_v60 = vmul.bf16 %v2977_v50, %v2913_v28  ;;  %v3009_v62 = vmul.bf16 0, %v208_v56 }
  0x91   :  { %4627 = vst [vmem:[#allocation13_spill] sm:$0xff] %v2997_v57  ;;  %v215_v61 = vmul.bf16 %v2997_v57, %v2918_v29 }
  0x92   :  { %245 = vrot.lane.b32.xlu0 %v178_v47, %s2794_s15  ;;  %264 = vrot.lane.b32.xlu1 %v2966_v46, %s2796_s17 }
  0x93   :  { %v106_v53 = vpop.permute.xlu0 %105  ;;  %v2999_v59 = vpop.permute.xlu1 %107 }
  0x94   :  { %v3013_v63 = vmul.bf16 0, %v106_v53  ;;  %v116_v3 = vmul.bf16 %v2999_v59, %v2918_v29  ;;  %v3029_v10 = vsel %vm109_vm5, %v106_v53, %v2999_v59 }
  0x95   :  { %v115_v13 = vmul.bf16 %v3029_v10, %v2913_v28 }
  0x96   :  { %282 = vrot.lane.b32.xlu1 %v2913_v28, %s2797_s18  ;;  %276 = vrot.lane.b32.xlu0 %v2972_v49, %s2795_s16 }
  0x97   :  { %v223_v58 = vpop.permute.xlu0 %222  ;;  %v225_v2 = vpop.permute.xlu1 %224 }
  0x98   :  { %v227_v8 = vsel %vm172_vm1, %v223_v58, %v225_v2 }
  0x9a   :  { %262 = vrot.lane.b32.xlu0 %v191_v54, %s2796_s17  ;;  %274 = vrot.lane.b32.xlu1 %v203_v55, %s2795_s16 }
  0x9b   :  { %v221_v1 = vpop.permute.xlu0 %220  ;;  %v253_v6 = vpop.permute.xlu1 %252 }
  0x9c   :  { %v226_v12 = vsel %vm172_vm1, %v221_v1, %v223_v58 }
  0x9e   :  { %284 = vrot.lane.b32.xlu0 %v2918_v29, %s2797_s18  ;;  %286 = vrot.lane.b32.xlu1 %v4597_v9, %s2797_s18 }
  0x9f   :  { %v255_v5 = vpop.permute.xlu0 %254 }
  0xa0   :  { %v256_v7 = vsel %vm109_vm5, %v253_v6, %v255_v5 }
  0xa2   :  { %294 = vrot.lane.b32.xlu0 %v214_v60, %s2798_s19  ;;  %296 = vrot.lane.b32.xlu1 %v215_v61, %s2798_s19  ;;  %v2711_v60 = vld [vmem:[%s4588_s3 + $0x4] ss:$8 sps:$4 sm:$0xff]  }
  0xa3   :  { %2601 = vmatprep.mubr.msk.bf16.mxu0 %vm442_vm12, %v2711_v60 }
  0xa6   :  { %298 = vrot.lane.b32.xlu0 %v3009_v62, %s2798_s19  ;;  %352 = vrot.lane.b32.xlu1 %v3013_v63, %s2791_s23 }
  0xaa   :  { %362 = vrot.lane.b32.xlu1 %v225_v2, %s2791_s23  ;;  %356 = vrot.lane.b32.xlu0 %v116_v3, %s2791_s23 }
  0xae   :  { %378 = vrot.lane.b32.xlu1 %v256_v7, %s2791_s23  ;;  %360 = vrot.lane.b32.xlu0 %v227_v8, %s2791_s23  ;;  %v3075_v8 = vld [vmem:[%s4589_s4 + $0x8] sm:$0xff] }
  0xb2   :  { %376 = vrot.lane.b32.xlu1 %v253_v6, %s2791_s23  ;;  %358 = vrot.lane.b32.xlu0 %v226_v12, %s2791_s23 }
  0xb6   :  { %354 = vrot.lane.b32.xlu1 %v115_v13, %s2791_s23  ;;  %380 = vrot.lane.b32.xlu0 %v255_v5, %s2791_s23  ;;  %v3080_v13 = vld [vmem:[%s4589_s4] sm:$0xff] }
  0xf4   :  { %v232_v14 = vpop.permute.xlu1 %231 }
  0xf8   :  { %v236_v15 = vpop.permute.xlu0 %235  ;;  %v248_v16 = vpop.permute.xlu1 %247 }
  0xf9   :  { %368 = vrot.lane.b32.xlu0 %v236_v15, %s2791_s23  ;;  %374 = vrot.lane.b32.xlu1 %v248_v16, %s2791_s23 }
  0xfc   :  { %v244_v17 = vpop.permute.xlu0 %243  ;;  %v234_v18 = vpop.permute.xlu1 %233 }
  0xfd   :  { %v239_v19 = vsel %vm237_vm6, %v234_v18, %v236_v15  ;;  %v238_v22 = vsel %vm237_vm6, %v232_v14, %v234_v18  ;;  %v3086_v15 = vld [vmem:[%s4589_s4 + $0x10] sm:$0xff] }
  0xfe   :  { %366 = vrot.lane.b32.xlu1 %v239_v19, %s2791_s23 }
 0x100   :  { %v273_v20 = vpop.permute.xlu0 %272  ;;  %v261_v21 = vpop.permute.xlu1 %260 }
 0x101   :  { %382 = vrot.lane.b32.xlu0 %v261_v21, %s2791_s23 }
 0x102   :  { %364 = vrot.lane.b32.xlu1 %v238_v22, %s2791_s23 }
 0x104   :  { %v246_v23 = vpop.permute.xlu0 %245  ;;  %v265_v28 = vpop.permute.xlu1 %264 }
 0x105   :  { %v251_v29 = vsel %vm249_vm7, %v246_v23, %v248_v16  ;;  %v250_v35 = vsel %vm249_vm7, %v244_v17, %v246_v23  ;;  %v3092_v16 = vld [vmem:[%s4589_s4 + $0x18] sm:$0xff] }
 0x106   :  { %388 = vrot.lane.b32.xlu1 %v273_v20, %s2791_s23  ;;  %372 = vrot.lane.b32.xlu0 %v251_v29, %s2791_s23 }
 0x108   :  { %v277_v30 = vpop.permute.xlu0 %276  ;;  %v283_v31 = vpop.permute.xlu1 %282 }
 0x10a   :  { %370 = vrot.lane.b32.xlu0 %v250_v35, %s2791_s23 }
 0x10c   :  { %v263_v36 = vpop.permute.xlu0 %262  ;;  %v275_v40 = vpop.permute.xlu1 %274 }
 0x10d   :  { %v268_v41 = vsel %vm266_vm8, %v263_v36, %v265_v28  ;;  %v279_v48 = vsel %vm278_vm10, %v273_v20, %v275_v40  ;;  %v267_v55 = vsel %vm266_vm8, %v261_v21, %v263_v36  ;;  %v280_v1 = vsel %vm278_vm10, %v275_v40, %v277_v30 }
 0x10e   :  { %386 = vrot.lane.b32.xlu1 %v268_v41, %s2791_s23 }
 0x110   :  { %v285_v43 = vpop.permute.xlu0 %284  ;;  %v287_v44 = vpop.permute.xlu1 %286 }
 0x111   :  { %v289_v47 = vsel %vm288_vm9, %v283_v31, %v285_v43  ;;  %v290_v56 = vsel %vm288_vm9, %v285_v43, %v287_v44 }
 0x112   :  { %396 = vrot.lane.b32.xlu0 %v289_v47, %s2791_s23  ;;  %390 = vrot.lane.b32.xlu1 %v279_v48, %s2791_s23 }
 0x114   :  { %v295_v53 = vpop.permute.xlu0 %294  ;;  %v297_v54 = vpop.permute.xlu1 %296 }
 0x115   :  { %v301_v58 = vsel %vm300_vm11, %v295_v53, %v297_v54 }
 0x116   :  { %384 = vrot.lane.b32.xlu0 %v267_v55, %s2791_s23  ;;  %398 = vrot.lane.b32.xlu1 %v290_v56, %s2791_s23 }
 0x118   :  { %v353_v61 = vpop.permute.xlu1 %352  ;;  %v299_v2 = vpop.permute.xlu0 %298 }
 0x119   :  { %v302_v7 = vsel %vm300_vm11, %v297_v54, %v299_v2 }
 0x11a   :  { %392 = vrot.lane.b32.xlu0 %v280_v1, %s2791_s23  ;;  %402 = vrot.lane.b32.xlu1 %v301_v58, %s2791_s23 }
 0x11c   :  { %v363_v3 = vpop.permute.xlu1 %362  ;;  %v357_v5 = vpop.permute.xlu0 %356 }
 0x11e   :  { %394 = vrot.lane.b32.xlu0 %v283_v31, %s2791_s23  ;;  %400 = vrot.lane.b32.xlu1 %v295_v53, %s2791_s23 }
 0x120   :  { %v379_v6 = vpop.permute.xlu1 %378  ;;  %v361_v12 = vpop.permute.xlu0 %360 }
 0x121   :  { %v409_v21 = vsel %vm209_vm4, %v361_v12, %v363_v3 }
 0x122   :  { %404 = vrot.lane.b32.xlu0 %v302_v7, %s2791_s23  ;;  %318 = vperm.xlu1 %2688, %v3075_v8  }
 0x124   :  { %v377_v14 = vpop.permute.xlu1 %376  ;;  %v359_v20 = vpop.permute.xlu0 %358 }
 0x125   :  { %v408_v22 = vsel %vm209_vm4, %v359_v20, %v361_v12  ;;  %v414_v55 = vsel %vm209_vm4, %v377_v14, %v379_v6 }
 0x126   :  { %313 = vperm.xlu0 %2687, %v3080_v13   ;;  %323 = vperm.xlu1 %2688, %v3086_v15  }
 0x128   :  { %v355_v17 = vpop.permute.xlu1 %354  ;;  %v381_v23 = vpop.permute.xlu0 %380 }
 0x129   :  { %v407_v18 = vsel %vm209_vm4, %v355_v17, %v357_v5  ;;  %v406_v19 = vsel %vm209_vm4, %v353_v61, %v355_v17  ;;  %v415_v53 = vsel %vm209_vm4, %v379_v6, %v381_v23  ;;  %v2712_v23 = vld [vmem:[%s4588_s3 + $0x14] ss:$8 sps:$4 sm:$0xff]  }
 0x12a   :  { %449 = vmatprep.subr.bf16.mxu0 %v407_v18  ;;  %328 = vperm.xlu0 %2687, %v3092_v16  }
 0x12b   :  { %450 = vmatpush1.bf16.msra.mxu0 %v406_v19 }
 0x12c   :  { %451 = vmatprep.subr.bf16.mxu0 %v409_v21 }
 0x12f   :  { %452 = vmatpush1.bf16.msra.mxu0 %v408_v22  ;;  %v2709_v22 = vld [vmem:[%s4588_s3] ss:$8 sps:$4 sm:$0xff]  }
 0x16b   :  { %v375_v28 = vpop.permute.xlu1 %374  ;;  %v369_v29 = vpop.permute.xlu0 %368 }
 0x170   :  { %v367_v30 = vpop.permute.xlu1 %366 }
 0x171   :  { %v411_v31 = vsel %vm209_vm4, %v367_v30, %v369_v29 }
 0x172   :  { %453 = vmatprep.subr.bf16.mxu0 %v411_v31 }
 0x173   :  { %v383_v35 = vpop.permute.xlu0 %382 }
 0x174   :  { %v365_v36 = vpop.permute.xlu1 %364 }
 0x175   :  { %v410_v40 = vsel %vm209_vm4, %v365_v36, %v367_v30 }
 0x176   :  { %454 = vmatpush1.bf16.msra.mxu0 %v410_v40 }
 0x178   :  { %v373_v41 = vpop.permute.xlu0 %372  ;;  %v389_v44 = vpop.permute.xlu1 %388 }
 0x179   :  { %v413_v43 = vsel %vm209_vm4, %v373_v41, %v375_v28  ;;  %v2714_v28 = vld [vmem:[%s4588_s3 + $0x10] ss:$8 sps:$4 sm:$0xff]  }
 0x17a   :  { %455 = vmatprep.subr.bf16.mxu0 %v413_v43 }
 0x17c   :  { %v371_v47 = vpop.permute.xlu0 %370 }
 0x17d   :  { %v412_v48 = vsel %vm209_vm4, %v371_v47, %v373_v41 }
 0x17e   :  { %456 = vmatpush1.bf16.msra.mxu0 %v412_v48 }
 0x17f   :  { %457 = vmatprep.subr.bf16.mxu0 %v415_v53 }
 0x180   :  { %v387_v54 = vpop.permute.xlu1 %386 }
 0x182   :  { %458 = vmatpush1.bf16.msra.mxu0 %v414_v55 }
 0x184   :  { %v397_v56 = vpop.permute.xlu0 %396  ;;  %v391_v58 = vpop.permute.xlu1 %390 }
 0x185   :  { %v418_v12 = vsel %vm209_vm4, %v389_v44, %v391_v58 }
 0x188   :  { %v385_v60 = vpop.permute.xlu0 %384  ;;  %v399_v61 = vpop.permute.xlu1 %398 }
 0x189   :  { %v417_v1 = vsel %vm209_vm4, %v385_v60, %v387_v54  ;;  %v416_v2 = vsel %vm209_vm4, %v383_v35, %v385_v60  ;;  %v421_v6 = vsel %vm209_vm4, %v397_v56, %v399_v61 }
 0x18a   :  { %459 = vmatprep.subr.bf16.mxu0 %v417_v1 }
 0x18b   :  { %460 = vmatpush1.bf16.msra.mxu0 %v416_v2 }
 0x18c   :  { %v393_v3 = vpop.permute.xlu0 %392  ;;  %v403_v5 = vpop.permute.xlu1 %402 }
 0x18d   :  { %v419_v7 = vsel %vm209_vm4, %v391_v58, %v393_v3 }
 0x18e   :  { %461 = vmatprep.subr.bf16.mxu0 %v419_v7 }
 0x18f   :  { %462 = vmatpush1.bf16.msra.mxu0 %v418_v12 }
 0x190   :  { %v395_v14 = vpop.permute.xlu0 %394  ;;  %463 = vmatprep.subr.bf16.mxu0 %v421_v6  ;;  %v401_v18 = vpop.permute.xlu1 %400 }
 0x191   :  { %v420_v17 = vsel %vm209_vm4, %v395_v14, %v397_v56  ;;  %v422_v21 = vsel %vm209_vm4, %v401_v18, %v403_v5 }
 0x193   :  { %464 = vmatpush1.bf16.msra.mxu0 %v420_v17 }
 0x194   :  { %v405_v19 = vpop.permute.xlu0 %404 }
 0x195   :  { %v423_v20 = vsel %vm209_vm4, %v403_v5, %v405_v19 }
 0x196   :  { %465 = vmatprep.subr.bf16.mxu0 %v423_v20 }
 0x197   :  { %466 = vmatpush1.bf16.msra.mxu0 %v422_v21 }
 0x19a   :  { %482 = vmatmul.mubr.bf16.vlgmr.msra.gmra.mrb[0].mxu0 %v2709_v22 }
 0x19b   :  { %2602 = vmatprep.mubr.msk.bf16.mxu0 %vm442_vm12, %v2712_v23 }
 0x1a1   :  { %v319_v31 = vpop.permute.xlu1 %318 }
 0x1a2   :  { %492 = vmatmul.mubr.bf16.gmra.mrb[4].mxu0 %v2714_v28  ;;  %v629_v28 = vld [vmem:[%s4590_s5] sm:$0xff] }
 0x1a5   :  { %v314_v29 = vpop.permute.xlu0 %313  ;;  %v324_v54 = vpop.permute.xlu1 %323 }
 0x1a9   :  { %v329_v3 = vpop.permute.xlu0 %328 }
 0x26d   :  { %v483_v30 = vpop.f32.mrb[0].mxu0 }
 0x26e   :  { %v484_v35 = vadd.f32 %v483_v30, %v314_v29  ;;  %v485_v36 = vpop.f32.mrb[1].mxu0 }
 0x26f   :  { %v486_v40 = vadd.f32 %v485_v36, %v314_v29  ;;  %v487_v41 = vpop.f32.mrb[2].mxu0 }
 0x270   :  { %v488_v43 = vadd.f32 %v487_v41, %v319_v31  ;;  %v489_v44 = vpop.f32.mrb[3].mxu0  ;;  %v502_v48 = vadd.f32 %v484_v35, %v2893_v24 }
 0x271   :  { %v490_v47 = vadd.f32 %v489_v44, %v319_v31  ;;  %v503_v53 = vadd.f32 %v486_v40, %v2903_v26  ;;  %v630_v31 = vld [vmem:[%s4590_s5 + $0x8] sm:$0xff] }
 0x272   :  { %v504_v55 = vadd.f32 %v488_v43, %v2898_v25  ;;  %v506_v60 = vmax.f32 %v502_v48, 0.0 }
 0x273   :  { %v505_v56 = vadd.f32 %v490_v47, %v2908_v27  ;;  %v507_v2 = vmax.f32 %v503_v53, 0.0 }
 0x274   :  { %v508_v14 = vmax.f32 %v504_v55, 0.0 }
 0x275   :  { %v493_v58 = vpop.f32.mrb[4].mxu0  ;;  %v509_v17 = vmax.f32 %v505_v56, 0.0 }
 0x276   :  { %v494_v61 = vadd.f32 %v493_v58, %v324_v54  ;;  %v495_v1 = vpop.f32.mrb[5].mxu0  ;;  %v643_v58 = vld [vmem:[%s4591_s6] sm:$0x1] }
 0x277   :  { %v496_v5 = vadd.f32 %v495_v1, %v324_v54  ;;  %v497_v7 = vpop.f32.mrb[6].mxu0 }
 0x278   :  { %v3128_v12 = vadd.f32 %v506_v60, %v494_v61  ;;  %v498_v6 = vadd.f32 %v497_v7, %v329_v3  ;;  %v499_v24 = vpop.f32.mrb[7].mxu0 }
 0x279   :  { %v3130_v26 = vadd.f32 %v507_v2, %v496_v5  ;;  %v500_v18 = vadd.f32 %v499_v24, %v329_v3  ;;  %v648_v3 = vld [vmem:[%s4592_s7] sm:$0xff]  ;;  %v649_v5 = vld [vmem:[%s4592_s7 + $0x8] sm:$0xff] }
 0x27a   :  { %v3132_v25 = vadd.f32 %v508_v14, %v498_v6 }
 0x27b   :  { %v3134_v27 = vadd.f32 %v509_v17, %v500_v18  ;;  %v620_v19 = vadd.f32 %v3130_v26, %v3128_v12 }
 0x27c   :  { %v3142_v21 = vpack.c.bf16 %v3132_v25, %v3128_v12 }
 0x27d   :  { %621 = vadd.xlane.f32.xlu1 %v620_v19  ;;  %v623_v20 = vadd.f32 %v3134_v27, %v3132_v25  ;;  %v3148_v22 = vpack.c.bf16 %v3134_v27, %v3130_v26 }
 0x27e   :  { %v528_v18 = vmul.bf16 %v3142_v21, %v2964_v45  ;;  %v525_v19 = vmul.bf16 %v3142_v21, %v2943_v37 }
 0x27f   :  { %624 = vadd.xlane.f32.xlu0 %v623_v20  ;;  %v526_v23 = vmul.bf16 %v3148_v22, %v2934_v33  ;;  %v532_v20 = vmul.bf16 %v3148_v22, %v2980_v51 }
 0x28e   :  { %545 = vrot.lane.b32.xlu1 %v3142_v21, %s2788_s2 }
 0x292   :  { %2690 = vrot.lane.b32.xlu1 %v4597_v9, %s2788_s2 }
 0x295   :  { %547 = vrot.lane.b32.xlu0 %v3148_v22, %s2788_s2 }
 0x296   :  { %558 = vrot.lane.b32.xlu1 %v526_v23, %s2793_s14  ;;  %v529_v23 = vmul.bf16 %v3148_v22, %v2936_v34 }
 0x30a   :  { %v622_v29 = vpop.xlane.xlu1 %621 }
 0x30b   :  { %v627_v30 = vmul.f32 0.00390625, %v622_v29  ;;  %v531_v29 = vmul.bf16 %v3142_v21, %v2947_v38 }
 0x30c   :  { %v625_v35 = vpop.xlane.xlu0 %624 }
 0x30d   :  { %v631_v36 = vmul.f32 %v629_v28, %v627_v30  ;;  %v628_v40 = vmul.f32 0.00390625, %v625_v35  ;;  %v534_v28 = vmul.bf16 %v3142_v21, %v2956_v42  ;;  %v537_v30 = vmul.bf16 %v3142_v21, %v2977_v50  ;;  %v3218_v35 = vld [vmem:[%s4585_s0 + $0x28] sm:$0xff] }
 0x30f   :  { %v632_v41 = vmul.f32 %v630_v31, %v628_v40  ;;  %v634_v43 = vsel %vm633_vm13, %v631_v36, 0.0  ;;  %v535_v31 = vmul.bf16 %v3148_v22, %v2983_v52  ;;  %v3223_v36 = vld [vmem:[%s4585_s0 + $0x38] sm:$0xff] }
 0x310   :  { %v3231_v40 = vpack.c.bf16 %v3223_v36, %v3218_v35 }
 0x311   :  { %v635_v44 = vsel %vm633_vm13, %v632_v41, 0.0  ;;  %v3236_v41 = vld [vmem:[%s4585_s0 + $0x20] sm:$0xff] }
 0x312   :  { %v636_v47 = vadd.f32 %v635_v44, %v634_v43  ;;  %v3241_v43 = vld [vmem:[%s4585_s0 + $0x30] sm:$0xff]  ;;  %v1410_v44 = vmul.bf16 %v3231_v40, %v2934_v33 }
 0x314   :  { %v637_v48 = vrot.slane %v636_v47, 4 }
 0x316   :  { %v638_v53 = vadd.f32 %v637_v48, %v636_v47  ;;  %v3251_v47 = vpack.c.bf16 %v3241_v43, %v3236_v41  ;;  %v538_v48 = vmul.bf16 %v3148_v22, %v2997_v57 }
 0x318   :  { %v639_v54 = vrot.slane %v638_v53, 2 }
 0x31a   :  { %v640_v55 = vadd.f32 %v639_v54, %v638_v53  ;;  %v1412_v53 = vmul.bf16 %v3251_v47, %v2964_v45  ;;  %v1409_v54 = vmul.bf16 %v3251_v47, %v2943_v37 }
 0x31c   :  { %v641_v56 = vrot.slane %v640_v55, 1 }
 0x31e   :  { %v642_v60 = vadd.f32 %v641_v56, %v640_v55  ;;  %v1416_v55 = vmul.bf16 %v3231_v40, %v2980_v51  ;;  %v1413_v56 = vmul.bf16 %v3231_v40, %v2936_v34 }
 0x320   :  { %v644_v61 = vadd.f32 %v643_v58, %v642_v60  ;;  %v522_v58 = vmul.bf16 %v3142_v21, %v3029_v10  ;;  %v1415_v60 = vmul.bf16 %v3251_v47, %v2947_v38 }
 0x322   :  { %vm645_vm14 = vcmp.gt.f32.partialorder %v644_v61, 0.0  ;;  %v646_v1 = vmul.f32 0.01, %v644_v61 }
 0x324   :  { %v647_v2 = vsel %vm645_vm14, %v644_v61, %v646_v1  ;;  %v523_v61 = vmul.bf16 %v3148_v22, %v2999_v59  ;;  %v546_v1 = vpop.permute.xlu1 %545  ;;  %vm724_vm14 = vcmask 523264  }
 0x325   :  { %v653_v7 = vrot.slane %v647_v2, %v2880_v11  ;;  %v548_v2 = vpop.permute.xlu0 %547 }
 0x327   :  { %v654_v6 = vmul.f32 %v653_v7, %v648_v3  ;;  %v655_v14 = vmul.f32 %v653_v7, %v649_v5  ;;  %v662_v5 = vld [vmem:[%s4593_s8] sm:$0xff]  ;;  %v663_v7 = vld [vmem:[%s4593_s8 + $0x8] sm:$0xff] }
 0x329   :  { %v656_v24 = vsel %vm633_vm13, %v654_v6, 0.0  ;;  %v659_v17 = vsel %vm633_vm13, %v655_v14, 0.0 }
 0x32a   :  { %657 = vadd.xlane.f32.xlu0 %v656_v24  ;;  %660 = vadd.xlane.f32.xlu1 %v659_v17 }
 0x33b   :  { %567 = vrot.lane.b32.xlu1 %v528_v18, %s2794_s15 }
 0x33f   :  { %565 = vrot.lane.b32.xlu1 %v2949_v39, %s2794_s15 }
 0x340   :  { %556 = vrot.lane.b32.xlu0 %v525_v19, %s2793_s14 }
 0x343   :  { %575 = vrot.lane.b32.xlu1 %v3148_v22, %s2792_s13 }
 0x344   :  { %554 = vrot.lane.b32.xlu0 %v2930_v32, %s2793_s14 }
 0x347   :  { %583 = vrot.lane.b32.xlu1 %v532_v20, %s2796_s17 }
 0x348   :  { %569 = vrot.lane.b32.xlu0 %v529_v23, %s2794_s15 }
 0x34b   :  { %592 = vrot.lane.b32.xlu1 %v534_v28, %s2795_s16 }
 0x34c   :  { %573 = vrot.lane.b32.xlu0 %v3142_v21, %s2792_s13 }
 0x34f   :  { %596 = vrot.lane.b32.xlu1 %v2972_v49, %s2795_s16 }
 0x350   :  { %581 = vrot.lane.b32.xlu0 %v531_v29, %s2796_s17 }
 0x353   :  { %603 = vrot.lane.b32.xlu1 %v3148_v22, %s2797_s18 }
 0x354   :  { %585 = vrot.lane.b32.xlu0 %v2966_v46, %s2796_s17 }
 0x357   :  { %612 = vrot.lane.b32.xlu1 %v537_v30, %s2798_s19 }
 0x358   :  { %594 = vrot.lane.b32.xlu0 %v535_v31, %s2795_s16 }
 0x35b   :  { %616 = vrot.lane.b32.xlu1 %v3009_v62, %s2798_s19 }
 0x35c   :  { %601 = vrot.lane.b32.xlu0 %v3142_v21, %s2797_s18  ;;  %v3290_v21 = vpop.permute.xlu1 %2690 }
 0x35f   :  { %1431 = vrot.lane.b32.xlu1 %v3231_v40, %s2788_s2 }
 0x360   :  { %2695 = vrot.lane.b32.xlu0 %v4597_v9, %s2797_s18  ;;  %v3292_v3 = vpop.permute.xlu1 %558 }
 0x363   :  { %1442 = vrot.lane.b32.xlu1 %v1410_v44, %s2793_s14 }
 0x364   :  { %614 = vrot.lane.b32.xlu0 %v538_v48, %s2798_s19 }
 0x367   :  { %1451 = vrot.lane.b32.xlu1 %v1412_v53, %s2794_s15 }
 0x368   :  { %1429 = vrot.lane.b32.xlu0 %v3251_v47, %s2788_s2 }
 0x36b   :  { %1449 = vrot.lane.b32.xlu1 %v2949_v39, %s2794_s15 }
 0x36c   :  { %1440 = vrot.lane.b32.xlu0 %v1409_v54, %s2793_s14 }
 0x36f   :  { %1459 = vrot.lane.b32.xlu1 %v3231_v40, %s2792_s13 }
 0x370   :  { %1438 = vrot.lane.b32.xlu0 %v2930_v32, %s2793_s14 }
 0x373   :  { %1467 = vrot.lane.b32.xlu1 %v1416_v55, %s2796_s17 }
 0x374   :  { %1453 = vrot.lane.b32.xlu0 %v1413_v56, %s2794_s15 }
 0x377   :  { %815 = vrot.lane.b32.xlu1 %v522_v58, %s2791_s23 }
 0x378   :  { %1457 = vrot.lane.b32.xlu0 %v3251_v47, %s2792_s13 }
 0x37c   :  { %1465 = vrot.lane.b32.xlu0 %v1415_v60, %s2796_s17 }
 0x380   :  { %1469 = vrot.lane.b32.xlu0 %v2966_v46, %s2796_s17 }
 0x384   :  { %817 = vrot.lane.b32.xlu0 %v523_v61, %s2791_s23 }
 0x3b7   :  { %v658_v6 = vpop.xlane.xlu0 %657  ;;  %v661_v14 = vpop.xlane.xlu1 %660 }
 0x3b8   :  { %v664_v24 = vadd.f32 %v662_v5, %v658_v6  ;;  %v665_v22 = vadd.f32 %v663_v7, %v661_v14 }
 0x3ba   :  { %v666_v17 = vsub.f32 0.0, %v664_v24  ;;  %v667_v18 = vsub.f32 0.0, %v665_v22 }
 0x3bb   :  { %v3300_v19 = vpop.permute.xlu1 %567  ;;  %v557_v20 = vpop.permute.xlu0 %556 }
 0x3bc   :  { %v668_v23 = vmul.f32 1.442695, %v666_v17  ;;  %v670_v28 = vmul.f32 1.442695, %v667_v18 }
 0x3be   :  { %2721 = vpow2.f32 %v668_v23  ;;  %v1418_v23 = vmul.bf16 %v3251_v47, %v2956_v42 }
 0x3bf   :  { %2723 = vpow2.f32 %v670_v28  ;;  %v3302_v29 = vpop.permute.xlu1 %565  ;;  %v555_v30 = vpop.permute.xlu0 %554 }
 0x3c0   :  { %v560_v34 = vsel %vm237_vm6, %v555_v30, %v557_v20  ;;  %v571_v30 = vsel %vm249_vm7, %v3302_v29, %v3300_v19 }
 0x3c3   :  { %v3304_v31 = vpop.permute.xlu1 %575  ;;  %v3306_v44 = vpop.permute.xlu0 %569 }
 0x3c7   :  { %v3308_v48 = vpop.permute.xlu1 %583  ;;  %v3310_v53 = vpop.permute.xlu0 %573 }
 0x3c8   :  { %v2722_v54 = vpop.eup %2721 }
 0x3c9   :  { %v2724_v55 = vpop.eup %2723  ;;  %v672_v56 = vadd.f32 1.0, %v2722_v54 }
 0x3ca   :  { %v673_v58 = vadd.f32 1.0, %v2724_v55  ;;  %v1419_v55 = vmul.bf16 %v3231_v40, %v2983_v52 }
 0x3cb   :  { %2725 = vrcp.f32 %v672_v56  ;;  %v3312_v60 = vpop.permute.xlu1 %592  ;;  %v3314_v61 = vpop.permute.xlu0 %581 }
 0x3cc   :  { %2727 = vrcp.f32 %v673_v58 }
 0x3cf   :  { %v3316_v5 = vpop.permute.xlu1 %596  ;;  %v586_v7 = vpop.permute.xlu0 %585 }
 0x3d3   :  { %v3318_v6 = vpop.permute.xlu1 %603  ;;  %v3320_v14 = vpop.permute.xlu0 %594 }
 0x3d5   :  { %v2726_v24 = vpop.eup %2725 }
 0x3d6   :  { %v2728_v22 = vpop.eup %2727  ;;  %678 = vperm.xlu0 %2687, %v2726_v24   ;;  %v2692_v24 = vunpack.i.l.bf16 %v3290_v21 }
 0x3d7   :  { %683 = vperm.xlu1 %2688, %v2728_v22   ;;  %v3322_v17 = vpop.permute.xlu1 %612  ;;  %v3324_v18 = vpop.permute.xlu0 %601  ;;  %v550_v22 = vsel %vm172_vm1, %v546_v1, %v548_v2 }
 0x3da   :  { %1476 = vrot.lane.b32.xlu0 %v1418_v23, %s2795_s16 }
 0x3db   :  { %813 = vrot.lane.b32.xlu1 %v3013_v63, %s2791_s23  ;;  %v3331_v28 = vpop.permute.xlu1 %616  ;;  %v3333_v54 = vpop.permute.xlu0 %2695 }
 0x3de   :  { %1480 = vrot.lane.b32.xlu0 %v2972_v49, %s2795_s16 }
 0x3df   :  { %1478 = vrot.lane.b32.xlu1 %v1419_v55, %s2795_s16  ;;  %v3340_v56 = vpop.permute.xlu1 %1431  ;;  %v3342_v58 = vpop.permute.xlu0 %614  ;;  %v549_v55 = vsel %vm172_vm1, %v2692_v24, %v546_v1  ;;  %v1422_v24 = vmul.bf16 %v3231_v40, %v2997_v57 }
 0x3e2   :  { %823 = vrot.lane.b32.xlu0 %v548_v2, %s2791_s23  ;;  %v561_v2 = vsel %vm237_vm6, %v557_v20, %v3292_v3 }
 0x3e3   :  { %821 = vrot.lane.b32.xlu1 %v550_v22, %s2791_s23  ;;  %v3348_v23 = vpop.permute.xlu1 %1442  ;;  %v3350_v9 = vpop.permute.xlu0 %1429 }
 0x3e6   :  { %1485 = vrot.lane.b32.xlu0 %v3251_v47, %s2797_s18 }
 0x3e7   :  { %819 = vrot.lane.b32.xlu1 %v549_v55, %s2791_s23  ;;  %v3356_v0 = vpop.permute.xlu1 %1451  ;;  %v3358_v52 = vpop.permute.xlu0 %1440  ;;  %v1421_v55 = vmul.bf16 %v3251_v47, %v2977_v50 }
 0x3ea   :  { %827 = vrot.lane.b32.xlu0 %v561_v2, %s2791_s23 }
 0x3eb   :  { %1487 = vrot.lane.b32.xlu1 %v3231_v40, %s2797_s18  ;;  %v3365_v22 = vpop.permute.xlu0 %1438  ;;  %v3368_v38 = vpop.permute.xlu1 %1449 }
 0x3ee   :  { %825 = vrot.lane.b32.xlu0 %v560_v34, %s2791_s23  ;;  %v572_v34 = vsel %vm249_vm7, %v3300_v19, %v3306_v44 }
 0x3ef   :  { %829 = vrot.lane.b32.xlu1 %v3292_v3, %s2791_s23  ;;  %v3373_v1 = vpop.permute.xlu0 %1453  ;;  %v3380_v2 = vpop.permute.xlu1 %1459 }
 0x3f2   :  { %1498 = vrot.lane.b32.xlu0 %v1422_v24, %s2798_s19 }
 0x3f3   :  { %1496 = vrot.lane.b32.xlu1 %v1421_v55, %s2798_s19  ;;  %v3383_v20 = vpop.permute.xlu0 %1457  ;;  %v3396_v24 = vpop.permute.xlu1 %1467 }
 0x3f6   :  { %833 = vrot.lane.b32.xlu0 %v572_v34, %s2791_s23  ;;  %v577_v34 = vsel %vm109_vm5, %v3310_v53, %v3304_v31 }
 0x3f7   :  { %1500 = vrot.lane.b32.xlu1 %v3009_v62, %s2798_s19  ;;  %v3391_v3 = vpop.permute.xlu0 %1465  ;;  %v816_v57 = vpop.permute.xlu1 %815 }
 0x3fa   :  { %831 = vrot.lane.b32.xlu0 %v571_v30, %s2791_s23  ;;  %v588_v30 = vsel %vm266_vm8, %v3308_v48, %v586_v7  ;;  %v599_v7 = vsel %vm278_vm10, %v3320_v14, %v3316_v5  ;;  %v618_v5 = vsel %vm300_vm11, %v3322_v17, %v3342_v58 }
 0x3fb   :  { %835 = vrot.lane.b32.xlu1 %v3306_v44, %s2791_s23  ;;  %v3401_v55 = vpop.permute.xlu0 %1469  ;;  %v598_v44 = vsel %vm278_vm10, %v3312_v60, %v3320_v14  ;;  %v1407_v14 = vmul.bf16 %v3231_v40, %v2999_v59 }
 0x3fe   :  { %841 = vrot.lane.b32.xlu0 %v3304_v31, %s2791_s23  ;;  %v587_v31 = vsel %vm266_vm8, %v3314_v61, %v3308_v48  ;;  %v607_v48 = vsel %vm288_vm9, %v3324_v18, %v3318_v6 }
 0x3ff   :  { %839 = vrot.lane.b32.xlu1 %v577_v34, %s2791_s23  ;;  %v818_v19 = vpop.permute.xlu0 %817 }
 0x400   :  { %v868_v29 = vsel %vm209_vm4, %v816_v57, %v818_v19 }
 0x401   :  { %909 = vmatprep.subr.bf16.mxu1 %v868_v29 }
 0x402   :  { %847 = vrot.lane.b32.xlu0 %v588_v30, %s2791_s23 }
 0x403   :  { %837 = vrot.lane.b32.xlu1 %v3310_v53, %s2791_s23  ;;  %v2697_v53 = vunpack.i.l.bf16 %v3333_v54 }
 0x406   :  { %843 = vrot.lane.b32.xlu0 %v3314_v61, %s2791_s23  ;;  %v608_v61 = vsel %vm288_vm9, %v3318_v6, %v2697_v53  ;;  %v1406_v6 = vmul.bf16 %v3251_v47, %v3029_v10  ;;  %v2799_v47 = vmov 0.0  }
 0x407   :  { %845 = vrot.lane.b32.xlu1 %v587_v31, %s2791_s23 }
 0x40a   :  { %851 = vrot.lane.b32.xlu0 %v598_v44, %s2791_s23 }
 0x40b   :  { %853 = vrot.lane.b32.xlu1 %v599_v7, %s2791_s23 }
 0x40e   :  { %849 = vrot.lane.b32.xlu0 %v3312_v60, %s2791_s23  ;;  %v619_v60 = vsel %vm300_vm11, %v3342_v58, %v3331_v28  ;;  %v44_v58 = vadd.s32 8, %v2871_v4 }
 0x40f   :  { %857 = vrot.lane.b32.xlu1 %v607_v48, %s2791_s23 }
 0x412   :  { %859 = vrot.lane.b32.xlu0 %v608_v61, %s2791_s23 }
 0x413   :  { %855 = vrot.lane.b32.xlu1 %v3324_v18, %s2791_s23  ;;  %v4628_v18 = vlaneseq }
 0x415   :  { %v46_v28 = vand.u32 127, %v4628_v18 }
 0x416   :  { %863 = vrot.lane.b32.xlu0 %v618_v5, %s2791_s23 }
 0x417   :  { %865 = vrot.lane.b32.xlu1 %v619_v60, %s2791_s23  ;;  %vm47_vm15 = vcmp.eq.s32.totalorder %v2871_v4, %v46_v28  ;;  %vm48_vm0 = vcmp.eq.s32.totalorder %v44_v58, %v46_v28 }
 0x418   :  { %v3462_v34 = vsel %vm47_vm15, 1.0, %v2799_v47  ;;  %vm726_vm15 = vcmask 654336  }
 0x41a   :  { %861 = vrot.lane.b32.xlu0 %v3322_v17, %s2791_s23  ;;  %v3464_v17 = vsel %vm48_vm0, 1.0, %v2799_v47 }
 0x41b   :  { %1555 = vrot.lane.b32.xlu1 %v1406_v6, %s2791_s23 }
 0x41e   :  { %1557 = vrot.lane.b32.xlu0 %v1407_v14, %s2791_s23 }
 0x41f   :  { %1553 = vrot.lane.b32.xlu1 %v3013_v63, %s2791_s23 }
 0x455   :  { %v3466_v19 = vpop.permute.xlu0 %678 }
 0x456   :  { %v686_v40 = vmul.f32 %v3462_v34, %v3466_v19  ;;  %v3470_v29 = vpop.permute.xlu1 %683 }
 0x457   :  { %v687_v30 = vmul.f32 %v3464_v17, %v3470_v29 }
 0x458   :  { %v688_v31 = vsel %vm442_vm12, %v686_v40, 0.0 }
 0x459   :  { %v689_v4 = vsel %vm442_vm12, %v687_v30, 0.0  ;;  %v3476_v44 = vpop.permute.xlu0 %1476 }
 0x45a   :  { %v690_v7 = vadd.f32 %v689_v4, %v688_v31  ;;  %v814_v53 = vpop.permute.xlu1 %813 }
 0x45b   :  { %v867_v48 = vsel %vm209_vm4, %v814_v53, %v816_v57 }
 0x45c   :  { %v691_v61 = vrot.slane %v690_v7, 4  ;;  %910 = vmatpush1.bf16.msra.mxu1 %v867_v48 }
 0x45d   :  { %v3479_v5 = vpop.permute.xlu0 %1480 }
 0x45e   :  { %v692_v60 = vadd.f32 %v691_v61, %v690_v7  ;;  %v3481_v6 = vpop.permute.xlu1 %1478 }
 0x460   :  { %v693_v14 = vrot.slane %v692_v60, 2 }
 0x461   :  { %v824_v18 = vpop.permute.xlu0 %823 }
 0x462   :  { %v694_v28 = vadd.f32 %v693_v14, %v692_v60  ;;  %v822_v58 = vpop.permute.xlu1 %821 }
 0x463   :  { %v870_v47 = vsel %vm209_vm4, %v822_v58, %v824_v18 }
 0x464   :  { %v695_v40 = vrot.slane %v694_v28, 1  ;;  %911 = vmatprep.subr.bf16.mxu1 %v870_v47  ;;  %v2693_v47 = vunpack.i.h.bf16 %v3290_v21 }
 0x465   :  { %v3484_v30 = vpop.permute.xlu0 %1485 }
 0x466   :  { %v3486_v31 = vadd.f32 %v695_v40, %v694_v28  ;;  %v820_v57 = vpop.permute.xlu1 %819 }
 0x467   :  { %v869_v4 = vsel %vm209_vm4, %v820_v57, %v822_v58  ;;  %v1434_v58 = vsel %vm172_vm1, %v3350_v9, %v3340_v56 }
 0x468   :  { %701 = vrot.lane.b32.xlu1 %v3486_v31, %s2800_s21  ;;  %698 = vrot.lane.b32.xlu0 %v3486_v31, %s2801_s22 }
 0x469   :  { %912 = vmatpush1.bf16.msra.mxu1 %v869_v4  ;;  %v828_v7 = vpop.permute.xlu0 %827  ;;  %v1433_v4 = vsel %vm172_vm1, %v2693_v47, %v3350_v9 }
 0x46a   :  { %v3493_v53 = vpop.permute.xlu1 %1487 }
 0x46c   :  { %707 = vrot.lane.b32.xlu1 %v3486_v31, %s2802_s24  ;;  %704 = vrot.lane.b32.xlu0 %v3486_v31, %s2803_s25 }
 0x46d   :  { %v826_v48 = vpop.permute.xlu0 %825 }
 0x46e   :  { %v830_v61 = vpop.permute.xlu1 %829  ;;  %v871_v14 = vsel %vm209_vm4, %v826_v48, %v828_v7 }
 0x46f   :  { %v872_v60 = vsel %vm209_vm4, %v828_v7, %v830_v61  ;;  %v1445_v61 = vsel %vm237_vm6, %v3358_v52, %v3348_v23 }
 0x470   :  { %710 = vrot.lane.b32.xlu1 %v3486_v31, %s4608_s26  ;;  %713 = vrot.lane.b32.xlu0 %v3486_v31, %s2795_s16 }
 0x471   :  { %913 = vmatprep.subr.bf16.mxu1 %v872_v60  ;;  %v3505_v18 = vpop.permute.xlu0 %1498 }
 0x472   :  { %914 = vmatpush1.bf16.msra.mxu1 %v871_v14  ;;  %v3507_v28 = vpop.permute.xlu1 %1496  ;;  %v1444_v14 = vsel %vm237_vm6, %v3365_v22, %v3358_v52 }
 0x474   :  { %716 = vrot.lane.b32.xlu1 %v3486_v31, %s2794_s15  ;;  %1561 = vrot.lane.b32.xlu0 %v1434_v58, %s2791_s23  ;;  %v1456_v58 = vsel %vm249_vm7, %v3356_v0, %v3373_v1 }
 0x475   :  { %v834_v40 = vpop.permute.xlu0 %833 }
 0x476   :  { %v3516_v57 = vpop.permute.xlu1 %1500 }
 0x478   :  { %1563 = vrot.lane.b32.xlu1 %v3340_v56, %s2791_s23  ;;  %1559 = vrot.lane.b32.xlu0 %v1433_v4, %s2791_s23  ;;  %v1455_v4 = vsel %vm249_vm7, %v3368_v38, %v3356_v0 }
 0x479   :  { %v832_v7 = vpop.permute.xlu0 %831 }
 0x47a   :  { %v836_v48 = vpop.permute.xlu1 %835  ;;  %v873_v21 = vsel %vm209_vm4, %v832_v7, %v834_v40 }
 0x47b   :  { %v874_v60 = vsel %vm209_vm4, %v834_v40, %v836_v48  ;;  %v1461_v48 = vsel %vm109_vm5, %v3383_v20, %v3380_v2 }
 0x47c   :  { %1567 = vrot.lane.b32.xlu1 %v1445_v61, %s2791_s23  ;;  %1569 = vrot.lane.b32.xlu0 %v3348_v23, %s2791_s23 }
 0x47d   :  { %915 = vmatprep.subr.bf16.mxu1 %v874_v60  ;;  %v842_v9 = vpop.permute.xlu0 %841 }
 0x47e   :  { %916 = vmatpush1.bf16.msra.mxu1 %v873_v21  ;;  %v840_v56 = vpop.permute.xlu1 %839 }
 0x47f   :  { %v876_v47 = vsel %vm209_vm4, %v840_v56, %v842_v9 }
 0x480   :  { %1565 = vrot.lane.b32.xlu1 %v1444_v14, %s2791_s23  ;;  %1573 = vrot.lane.b32.xlu0 %v1456_v58, %s2791_s23  ;;  %v1472_v14 = vsel %vm266_vm8, %v3396_v24, %v3401_v55  ;;  %v1491_v55 = vsel %vm288_vm9, %v3484_v30, %v3493_v53 }
 0x481   :  { %917 = vmatprep.subr.bf16.mxu1 %v876_v47  ;;  %v848_v23 = vpop.permute.xlu0 %847 }
 0x482   :  { %v838_v40 = vpop.permute.xlu1 %837 }
 0x483   :  { %v875_v7 = vsel %vm209_vm4, %v838_v40, %v840_v56  ;;  %v1482_v40 = vsel %vm278_vm10, %v3476_v44, %v3481_v6 }
 0x484   :  { %1575 = vrot.lane.b32.xlu1 %v3373_v1, %s2791_s23  ;;  %1571 = vrot.lane.b32.xlu0 %v1455_v4, %s2791_s23  ;;  %v1471_v1 = vsel %vm266_vm8, %v3391_v3, %v3396_v24 }
 0x485   :  { %918 = vmatpush1.bf16.msra.mxu1 %v875_v7  ;;  %v844_v52 = vpop.permute.xlu0 %843 }
 0x486   :  { %v846_v22 = vpop.permute.xlu1 %845 }
 0x487   :  { %v878_v61 = vsel %vm209_vm4, %v846_v22, %v848_v23  ;;  %v877_v60 = vsel %vm209_vm4, %v844_v52, %v846_v22  ;;  %v1483_v23 = vsel %vm278_vm10, %v3481_v6, %v3479_v5  ;;  %v2698_v6 = vunpack.i.h.bf16 %v3333_v54 }
 0x488   :  { %1579 = vrot.lane.b32.xlu1 %v1461_v48, %s2791_s23  ;;  %1581 = vrot.lane.b32.xlu0 %v3380_v2, %s2791_s23  ;;  %v1503_v54 = vsel %vm300_vm11, %v3505_v18, %v3516_v57  ;;  %v2609_v57 = vld [vmem:[%s4589_s4 + $0x28] sm:$0xff] }
 0x489   :  { %919 = vmatprep.subr.bf16.mxu1 %v878_v61  ;;  %v852_v0 = vpop.permute.xlu0 %851  ;;  %v1492_v22 = vsel %vm288_vm9, %v3493_v53, %v2698_v6  ;;  %v1502_v53 = vsel %vm300_vm11, %v3507_v28, %v3505_v18  ;;  %v2610_v18 = vld [vmem:[%s4589_s4 + $0x30] sm:$0xff] }
 0x48a   :  { %920 = vmatpush1.bf16.msra.mxu1 %v877_v60  ;;  %v854_v38 = vpop.permute.xlu1 %853  ;;  %v2611_v60 = vld [vmem:[%s4589_s4 + $0x38] sm:$0xff] }
 0x48b   :  { %v880_v21 = vsel %vm209_vm4, %v852_v0, %v854_v38 }
 0x48c   :  { %1577 = vrot.lane.b32.xlu1 %v3383_v20, %s2791_s23  ;;  %1585 = vrot.lane.b32.xlu0 %v1471_v1, %s2791_s23 }
 0x48d   :  { %921 = vmatprep.subr.bf16.mxu1 %v880_v21  ;;  %v850_v9 = vpop.permute.xlu0 %849 }
 0x48e   :  { %v858_v56 = vpop.permute.xlu1 %857  ;;  %v879_v2 = vsel %vm209_vm4, %v850_v9, %v852_v0 }
 0x48f   :  { %922 = vmatpush1.bf16.msra.mxu1 %v879_v2 }
 0x490   :  { %1587 = vrot.lane.b32.xlu1 %v1472_v14, %s2791_s23  ;;  %1583 = vrot.lane.b32.xlu0 %v3391_v3, %s2791_s23 }
 0x491   :  { %v860_v58 = vpop.permute.xlu0 %859 }
 0x492   :  { %v856_v47 = vpop.permute.xlu1 %855  ;;  %v882_v20 = vsel %vm209_vm4, %v858_v56, %v860_v58  ;;  %v733_v58 = vpack.c.bf16 %v3486_v31, %v3486_v31 }
 0x493   :  { %923 = vmatprep.subr.bf16.mxu1 %v882_v20  ;;  %v881_v24 = vsel %vm209_vm4, %v856_v47, %v858_v56 }
 0x494   :  { %1593 = vrot.lane.b32.xlu0 %v1483_v23, %s2791_s23  ;;  %1591 = vrot.lane.b32.xlu1 %v1482_v40, %s2791_s23 }
 0x495   :  { %924 = vmatpush1.bf16.msra.mxu1 %v881_v24  ;;  %v864_v3 = vpop.permute.xlu0 %863  ;;  %v751_v24 = vpack.i.b16 %v733_v58, %v733_v58 }
 0x496   :  { %v866_v4 = vpop.permute.xlu1 %865 }
 0x497   :  { %v884_v5 = vsel %vm209_vm4, %v864_v3, %v866_v4  ;;  %v756_v6 = vrot.slane %v751_v24, %v2880_v11 }
 0x498   :  { %1589 = vrot.lane.b32.xlu1 %v3476_v44, %s2791_s23  ;;  %1597 = vrot.lane.b32.xlu0 %v1491_v55, %s2791_s23 }
 0x499   :  { %925 = vmatprep.subr.bf16.mxu1 %v884_v5  ;;  %v862_v7 = vpop.permute.xlu0 %861 }
 0x49a   :  { %v883_v52 = vsel %vm209_vm4, %v862_v7, %v864_v3  ;;  %v3593_v48 = vpop.permute.xlu1 %1555 }
 0x49b   :  { %926 = vmatpush1.bf16.msra.mxu1 %v883_v52  ;;  %v2603_v52 = vld [vmem:[%s4588_s3 + $0x20] sm:$0xff] }
 0x49c   :  { %1599 = vrot.lane.b32.xlu1 %v1492_v22, %s2791_s23  ;;  %1595 = vrot.lane.b32.xlu0 %v3484_v30, %s2791_s23  ;;  %v2608_v30 = vld [vmem:[%s4589_s4 + $0x20] sm:$0xff]  ;;  %v2605_v22 = vld [vmem:[%s4588_s3 + $0x30] sm:$0xff] }
 0x49d   :  { %v1558_v44 = vpop.permute.xlu0 %1557 }
 0x49e   :  { %v1608_v61 = vsel %vm209_vm4, %v3593_v48, %v1558_v44  ;;  %v2606_v44 = vld [vmem:[%s4588_s3 + $0x38] sm:$0xff] }
 0x49f   :  { %1649 = vmatprep.subr.bf16.mxu1 %v1608_v61 }
 0x4a0   :  { %1603 = vrot.lane.b32.xlu1 %v1502_v53, %s2791_s23  ;;  %1605 = vrot.lane.b32.xlu0 %v1503_v54, %s2791_s23 }
 0x4a4   :  { %1601 = vrot.lane.b32.xlu1 %v3507_v28, %s2791_s23  ;;  %774 = vperm.xlu0 %2687, %v2608_v30   ;;  %v4629_v28 = vmov 0  }
 0x4a8   :  { %779 = vperm.xlu1 %2688, %v2609_v57   ;;  %784 = vperm.xlu0 %2687, %v2610_v18  }
 0x4ac   :  { %789 = vperm.xlu1 %2688, %v2611_v60   ;;  %1514 = vperm.xlu0 %2687, %v3080_v13  }
 0x4b0   :  { %1519 = vperm.xlu1 %2688, %v3075_v8   ;;  %1524 = vperm.xlu0 %2687, %v3086_v15   ;;  %v1554_v8 = vpop.permute.xlu1 %1553 }
 0x4b4   :  { %1529 = vperm.xlu1 %2688, %v3092_v16   ;;  %2700 = vrot.lane.b32.xlu0 %v4629_v28, %s2788_s2 }
 0x4b8   :  { %1014 = vrot.lane.b32.xlu1 %v2930_v32, %s2793_s14  ;;  %1025 = vrot.lane.b32.xlu0 %v2949_v39, %s2794_s15 }
 0x4bc   :  { %1045 = vrot.lane.b32.xlu1 %v2966_v46, %s2796_s17  ;;  %1056 = vrot.lane.b32.xlu0 %v2972_v49, %s2795_s16 }
 0x4c0   :  { %2705 = vrot.lane.b32.xlu1 %v4629_v28, %s2797_s18  ;;  %1076 = vrot.lane.b32.xlu0 %v3009_v62, %s2798_s19 }
 0x4c4   :  { %1754 = vrot.lane.b32.xlu1 %v2930_v32, %s2793_s14 }
 0x4da   :  { %v699_v13 = vpop.permute.xlu0 %698  ;;  %v702_v15 = vpop.permute.xlu1 %701 }
 0x4db   :  { %v719_v16 = vsel %vm442_vm12, %v3486_v31, %v699_v13  ;;  %v2604_v31 = vld [vmem:[%s4588_s3 + $0x28] sm:$0xff] }
 0x4dc   :  { %v721_v0 = vsel %vm720_vm2, %v719_v16, %v702_v15 }
 0x4de   :  { %v705_v38 = vpop.permute.xlu0 %704  ;;  %v708_v1 = vpop.permute.xlu1 %707 }
 0x4df   :  { %v723_v21 = vsel %vm722_vm3, %v721_v0, %v705_v38 }
 0x4e0   :  { %v725_v9 = vsel %vm724_vm14, %v723_v21, %v708_v1  ;;  %v1607_v1 = vsel %vm209_vm4, %v1554_v8, %v3593_v48  ;;  %v2717_v48 = vld [vmem:[%s4588_s3 + $0x4] ss:$8 sps:$4 sm:$0xff]  }
 0x4e2   :  { %v714_v56 = vpop.permute.xlu0 %713  ;;  %v711_v2 = vpop.permute.xlu1 %710 }
 0x4e3   :  { %v727_v14 = vsel %vm726_vm15, %v725_v9, %v711_v2 }
 0x4e4   :  { %v729_v20 = vsel %vm278_vm10, %v727_v14, %v714_v56 }
 0x4e6   :  { %v1562_v47 = vpop.permute.xlu0 %1561  ;;  %v717_v23 = vpop.permute.xlu1 %716 }
 0x4e7   :  { %v731_v40 = vsel %vm249_vm7, %v729_v20, %v717_v23 }
 0x4e8   :  { %v732_v3 = vpack.c.bf16 %v731_v40, %v731_v40 }
 0x4ea   :  { %v744_v55 = vpack.i.b16 %v732_v3, %v732_v3  ;;  %v1560_v4 = vpop.permute.xlu0 %1559  ;;  %v1564_v5 = vpop.permute.xlu1 %1563 }
 0x4eb   :  { %v1610_v9 = vsel %vm209_vm4, %v1562_v47, %v1564_v5  ;;  %v1609_v2 = vsel %vm209_vm4, %v1560_v4, %v1562_v47 }
 0x4ec   :  { %v749_v7 = vrot.slane %v744_v55, %v2880_v11 }
 0x4ee   :  { %v2607_v61 = vcombine.low %v749_v7, %v756_v6  ;;  %v1570_v54 = vpop.permute.xlu0 %1569  ;;  %v1568_v53 = vpop.permute.xlu1 %1567 }
 0x4ef   :  { %v1612_v58 = vsel %vm209_vm4, %v1568_v53, %v1570_v54 }
 0x4f0   :  { %v763_v30 = vmul.bf16 %v2607_v61, %v2603_v52  ;;  %v764_v57 = vmul.bf16 %v2607_v61, %v2604_v31  ;;  %v765_v18 = vmul.bf16 %v2607_v61, %v2605_v22  ;;  %v766_v60 = vmul.bf16 %v2607_v61, %v2606_v44 }
 0x4f2   :  { %v1574_v13 = vpop.permute.xlu0 %1573  ;;  %v1566_v15 = vpop.permute.xlu1 %1565  ;;  %v2613_v16 = vcombine.high %v763_v30, %v764_v57  ;;  %v2612_v0 = vcombine.low %v763_v30, %v764_v57  ;;  %v2615_v38 = vcombine.high %v765_v18, %v766_v60  ;;  %v2614_v8 = vcombine.low %v765_v18, %v766_v60 }
 0x4f3   :  { %v1611_v23 = vsel %vm209_vm4, %v1566_v15, %v1568_v53 }
 0x4f4   :  { %2616 = vmatprep.mubr.msk.bf16.mxu1 %vm442_vm12, %v2613_v16 }
 0x4f5   :  { %942 = vmatmul.mubr.bf16.vlgmr.msra.gmra.mrb[0].mxu1 %v2612_v0 }
 0x4f6   :  { %1650 = vmatpush1.bf16.msra.mxu1 %v1607_v1  ;;  %v1572_v21 = vpop.permute.xlu0 %1571  ;;  %2617 = vmatprep.mubr.msk.bf16.mxu1 %vm442_vm12, %v2615_v38  ;;  %v1576_v56 = vpop.permute.xlu1 %1575  ;;  %v2715_v1 = vld [vmem:[%s4588_s3] ss:$8 sps:$4 sm:$0xff]  }
 0x4f7   :  { %1651 = vmatprep.subr.bf16.mxu1 %v1610_v9  ;;  %v1614_v24 = vsel %vm209_vm4, %v1574_v13, %v1576_v56  ;;  %v1613_v47 = vsel %vm209_vm4, %v1572_v21, %v1574_v13  ;;  %v2718_v21 = vld [vmem:[%s4588_s3 + $0x14] ss:$8 sps:$4 sm:$0xff]   ;;  %v2720_v9 = vld [vmem:[%s4588_s3 + $0x10] ss:$8 sps:$4 sm:$0xff]  }
 0x4fa   :  { %1652 = vmatpush1.bf16.msra.mxu1 %v1609_v2  ;;  %v1582_v14 = vpop.permute.xlu0 %1581  ;;  %v1580_v20 = vpop.permute.xlu1 %1579 }
 0x4fb   :  { %1653 = vmatprep.subr.bf16.mxu1 %v1612_v58  ;;  %v1616_v4 = vsel %vm209_vm4, %v1580_v20, %v1582_v14 }
 0x4fd   :  { %952 = vmatmul.mubr.bf16.gmra.mrb[4].mxu1 %v2614_v8 }
 0x4fe   :  { %1654 = vmatpush1.bf16.msra.mxu1 %v1611_v23  ;;  %v1586_v40 = vpop.permute.xlu0 %1585  ;;  %v1578_v3 = vpop.permute.xlu1 %1577  ;;  %2637 = vmatprep.mubr.msk.bf16.mxu1 %vm442_vm12, %v2717_v48  ;;  %v734_v23 = vmul.f32 %v3466_v19, %v3128_v12 }
 0x4ff   :  { %1655 = vmatprep.subr.bf16.mxu1 %v1614_v24  ;;  %v1615_v6 = vsel %vm209_vm4, %v1578_v3, %v1580_v20  ;;  %v735_v3 = vmul.f32 %v3466_v19, %v3130_v26 }
 0x502   :  { %1656 = vmatpush1.bf16.msra.mxu1 %v1613_v47  ;;  %v1584_v55 = vpop.permute.xlu0 %1583  ;;  %v1588_v5 = vpop.permute.xlu1 %1587 }
 0x503   :  { %1657 = vmatprep.subr.bf16.mxu1 %v1616_v4  ;;  %v1618_v52 = vsel %vm209_vm4, %v1586_v40, %v1588_v5  ;;  %v1617_v22 = vsel %vm209_vm4, %v1584_v55, %v1586_v40  ;;  %v736_v4 = vmul.f32 %v3470_v29, %v3132_v25 }
 0x506   :  { %1658 = vmatpush1.bf16.msra.mxu1 %v1615_v6  ;;  %v1594_v7 = vpop.permute.xlu0 %1593  ;;  %v1592_v31 = vpop.permute.xlu1 %1591  ;;  %v737_v6 = vmul.f32 %v3470_v29, %v3134_v27 }
 0x507   :  { %1659 = vmatprep.subr.bf16.mxu1 %v1618_v52  ;;  %v1620_v61 = vsel %vm209_vm4, %v1592_v31, %v1594_v7 }
 0x50a   :  { %1660 = vmatpush1.bf16.msra.mxu1 %v1617_v22  ;;  %v1598_v44 = vpop.permute.xlu0 %1597  ;;  %v1590_v54 = vpop.permute.xlu1 %1589 }
 0x50b   :  { %1661 = vmatprep.subr.bf16.mxu1 %v1620_v61  ;;  %v1619_v53 = vsel %vm209_vm4, %v1590_v54, %v1592_v31 }
 0x50e   :  { %1662 = vmatpush1.bf16.msra.mxu1 %v1619_v53  ;;  %v1596_v30 = vpop.permute.xlu0 %1595  ;;  %v1600_v57 = vpop.permute.xlu1 %1599 }
 0x50f   :  { %v1621_v18 = vsel %vm209_vm4, %v1596_v30, %v1598_v44  ;;  %v1622_v60 = vsel %vm209_vm4, %v1598_v44, %v1600_v57 }
 0x510   :  { %1663 = vmatprep.subr.bf16.mxu1 %v1622_v60 }
 0x512   :  { %v1606_v13 = vpop.permute.xlu0 %1605  ;;  %v1604_v15 = vpop.permute.xlu1 %1603  ;;  %1664 = vmatpush1.bf16.msra.mxu1 %v1621_v18 }
 0x513   :  { %v1624_v16 = vsel %vm209_vm4, %v1604_v15, %v1606_v13 }
 0x514   :  { %1665 = vmatprep.subr.bf16.mxu1 %v1624_v16 }
 0x516   :  { %v1602_v0 = vpop.permute.xlu1 %1601 }
 0x517   :  { %v1623_v38 = vsel %vm209_vm4, %v1602_v0, %v1604_v15 }
 0x518   :  { %1666 = vmatpush1.bf16.msra.mxu1 %v1623_v38 }
 0x51b   :  { %1682 = vmatmul.mubr.bf16.vlgmr.msra.gmra.mrb[8].mxu1 %v2715_v1 }
 0x51c   :  { %2638 = vmatprep.mubr.msk.bf16.mxu1 %vm442_vm12, %v2718_v21 }
 0x523   :  { %1692 = vmatmul.mubr.bf16.gmra.mrb[12].mxu1 %v2720_v9  ;;  %v775_v56 = vpop.permute.xlu0 %774 }
 0x527   :  { %v780_v20 = vpop.permute.xlu1 %779  ;;  %v785_v52 = vpop.permute.xlu0 %784 }
 0x52b   :  { %v790_v54 = vpop.permute.xlu1 %789  ;;  %v1515_v1 = vpop.permute.xlu0 %1514 }
 0x5c8   :  { %v943_v2 = vpop.f32.mrb[0].mxu1 }
 0x5c9   :  { %v944_v14 = vadd.f32 %v943_v2, %v775_v56  ;;  %v945_v58 = vpop.f32.mrb[1].mxu1  ;;  %v1520_v2 = vpop.permute.xlu1 %1519 }
 0x5ca   :  { %v946_v48 = vadd.f32 %v945_v58, %v775_v56  ;;  %v947_v8 = vpop.f32.mrb[2].mxu1 }
 0x5cb   :  { %v948_v40 = vadd.f32 %v947_v8, %v780_v20  ;;  %v949_v24 = vpop.f32.mrb[3].mxu1  ;;  %v962_v55 = vadd.f32 %v944_v14, %v734_v23 }
 0x5cc   :  { %v950_v47 = vadd.f32 %v949_v24, %v780_v20  ;;  %v963_v5 = vadd.f32 %v946_v48, %v735_v3 }
 0x5cd   :  { %v964_v7 = vadd.f32 %v948_v40, %v736_v4  ;;  %v966_v44 = vmax.f32 %v962_v55, 0.0 }
 0x5ce   :  { %v965_v31 = vadd.f32 %v950_v47, %v737_v6  ;;  %v967_v53 = vmax.f32 %v963_v5, 0.0  ;;  %v1525_v47 = vpop.permute.xlu0 %1524 }
 0x5cf   :  { %v968_v19 = vmax.f32 %v964_v7, 0.0 }
 0x5d0   :  { %v953_v22 = vpop.f32.mrb[4].mxu1  ;;  %v969_v60 = vmax.f32 %v965_v31, 0.0 }
 0x5d1   :  { %v954_v12 = vadd.f32 %v953_v22, %v785_v52  ;;  %v955_v61 = vpop.f32.mrb[5].mxu1 }
 0x5d2   :  { %v956_v30 = vadd.f32 %v955_v61, %v785_v52  ;;  %v957_v26 = vpop.f32.mrb[6].mxu1  ;;  %v1530_v52 = vpop.permute.xlu1 %1529 }
 0x5d3   :  { %v3705_v57 = vadd.f32 %v966_v44, %v954_v12  ;;  %v958_v18 = vadd.f32 %v957_v26, %v790_v54  ;;  %v959_v25 = vpop.f32.mrb[7].mxu1 }
 0x5d4   :  { %v3707_v13 = vadd.f32 %v967_v53, %v956_v30  ;;  %v960_v27 = vadd.f32 %v959_v25, %v790_v54 }
 0x5d5   :  { %4630 = vst [vmem:[#allocation14_spill] sm:$0xff] %v3705_v57  ;;  %v3709_v29 = vadd.f32 %v968_v19, %v958_v18 }
 0x5d6   :  { %4631 = vst [vmem:[#allocation15_spill] sm:$0xff] %v3707_v13  ;;  %v3711_v15 = vadd.f32 %v969_v60, %v960_v27  ;;  %v1080_v16 = vadd.f32 %v3707_v13, %v3705_v57 }
 0x5d7   :  { %4632 = vst [vmem:[#allocation16_spill] sm:$0xff] %v3709_v29  ;;  %v3717_v0 = vpack.c.bf16 %v3709_v29, %v3705_v57 }
 0x5d8   :  { %4633 = vst [vmem:[#allocation17_spill] sm:$0xff] %v3711_v15  ;;  %1081 = vadd.xlane.f32.xlu0 %v1080_v16  ;;  %v3727_v38 = vpack.c.bf16 %v3711_v15, %v3707_v13  ;;  %v1083_v25 = vadd.f32 %v3711_v15, %v3709_v29  ;;  %v4634_v16 = vld [vmem:[#allocation7_spill] sm:$0xff] }
 0x5d9   :  { %1005 = vrot.lane.b32.xlu1 %v3717_v0, %s2788_s2  ;;  %v988_v24 = vmul.bf16 %v3717_v0, %v2964_v45  ;;  %v997_v19 = vmul.bf16 %v3717_v0, %v2977_v50  ;;  %v985_v27 = vmul.bf16 %v3717_v0, %v2943_v37 }
 0x5da   :  { %v986_v18 = vmul.bf16 %v3727_v38, %v2934_v33  ;;  %v992_v60 = vmul.bf16 %v3727_v38, %v2980_v51 }
 0x5dd   :  { %1033 = vrot.lane.b32.xlu1 %v3717_v0, %s2792_s13 }
 0x5e1   :  { %1061 = vrot.lane.b32.xlu1 %v3717_v0, %s2797_s18 }
 0x5ee   :  { %v1683_v21 = vpop.f32.mrb[8].mxu1  ;;  %1035 = vrot.lane.b32.xlu0 %v3727_v38, %s2792_s13 }
 0x5ef   :  { %v1684_v9 = vadd.f32 %v1683_v21, %v1515_v1  ;;  %v1685_v56 = vpop.f32.mrb[9].mxu1  ;;  %v4635_v21 = vld [vmem:[#allocation6_spill] sm:$0xff] }
 0x5f0   :  { %v1686_v14 = vadd.f32 %v1685_v56, %v1515_v1  ;;  %v1687_v58 = vpop.f32.mrb[10].mxu1  ;;  %v991_v1 = vmul.bf16 %v3717_v0, %v4634_v16 }
 0x5f1   :  { %v1688_v20 = vadd.f32 %v1687_v58, %v1520_v2  ;;  %v1689_v48 = vpop.f32.mrb[11].mxu1  ;;  %v1702_v23 = vadd.f32 %v3236_v41, %v1684_v9  ;;  %v989_v9 = vmul.bf16 %v3727_v38, %v4635_v21 }
 0x5f2   :  { %v1690_v8 = vadd.f32 %v1689_v48, %v1520_v2  ;;  %1063 = vrot.lane.b32.xlu0 %v3727_v38, %s2797_s18  ;;  %v1703_v40 = vadd.f32 %v3218_v35, %v1686_v14  ;;  %v994_v35 = vmul.bf16 %v3717_v0, %v2956_v42  ;;  %v4636_v2 = vld [vmem:[#allocation12_spill] sm:$0xff] }
 0x5f3   :  { %v1704_v3 = vadd.f32 %v3241_v43, %v1688_v20  ;;  %v1706_v5 = vmax.f32 %v1702_v23, 0.0  ;;  %v995_v14 = vmul.bf16 %v3727_v38, %v4636_v2  ;;  %v4637_v20 = vld [vmem:[#allocation13_spill] sm:$0xff] }
 0x5f4   :  { %v1705_v55 = vadd.f32 %v3223_v36, %v1690_v8  ;;  %v1707_v31 = vmax.f32 %v1703_v40, 0.0  ;;  %v998_v48 = vmul.bf16 %v3727_v38, %v4637_v20 }
 0x5f5   :  { %v1708_v44 = vmax.f32 %v1704_v3, 0.0  ;;  %v3801_v3 = vpop.permute.xlu1 %1014 }
 0x5f6   :  { %v1693_v4 = vpop.f32.mrb[12].mxu1  ;;  %1027 = vrot.lane.b32.xlu0 %v988_v24, %s2794_s15  ;;  %v1709_v54 = vmax.f32 %v1705_v55, 0.0 }
 0x5f7   :  { %v1694_v6 = vadd.f32 %v1693_v4, %v1525_v47  ;;  %v1695_v7 = vpop.f32.mrb[13].mxu1 }
 0x5f8   :  { %v1696_v22 = vadd.f32 %v1695_v7, %v1525_v47  ;;  %v1697_v41 = vpop.f32.mrb[14].mxu1  ;;  %v3803_v47 = vpop.permute.xlu0 %2700 }
 0x5f9   :  { %v3742_v12 = vadd.f32 %v1706_v5, %v1694_v6  ;;  %v1698_v43 = vadd.f32 %v1697_v41, %v1530_v52  ;;  %v1699_v61 = vpop.f32.mrb[15].mxu1  ;;  %v3805_v55 = vpop.permute.xlu1 %1045 }
 0x5fa   :  { %v3744_v36 = vadd.f32 %v1707_v31, %v1696_v22  ;;  %v1700_v53 = vadd.f32 %v1699_v61, %v1530_v52  ;;  %1052 = vrot.lane.b32.xlu0 %v994_v35, %s2795_s16  ;;  %v2618_v61 = vld [vmem:[%s4590_s5 + $0x10] sm:$0xff] }
 0x5fb   :  { %v3747_v30 = vadd.f32 %v1708_v44, %v1698_v43 }
 0x5fc   :  { %v3749_v26 = vadd.f32 %v1709_v54, %v1700_v53  ;;  %v1820_v56 = vadd.f32 %v3744_v36, %v3742_v12  ;;  %v3807_v4 = vpop.permute.xlu0 %1025  ;;  %v2619_v53 = vld [vmem:[%s4590_s5 + $0x18] sm:$0xff] }
 0x5fd   :  { %v3785_v8 = vpack.c.bf16 %v3747_v30, %v3742_v12  ;;  %v3809_v5 = vpop.permute.xlu1 %2705 }
 0x5fe   :  { %1072 = vrot.lane.b32.xlu0 %v997_v19, %s2798_s19  ;;  %v1823_v58 = vadd.f32 %v3749_v26, %v3747_v30  ;;  %v3794_v40 = vpack.c.bf16 %v3749_v26, %v3744_v36 }
 0x5ff   :  { %v1725_v23 = vmul.bf16 %v3785_v8, %v2943_v37  ;;  %v1728_v15 = vmul.bf16 %v3785_v8, %v2964_v45 }
 0x600   :  { %v1726_v24 = vmul.bf16 %v3794_v40, %v2934_v33  ;;  %v3811_v6 = vpop.permute.xlu0 %1056 }
 0x601   :  { %v3813_v7 = vpop.permute.xlu1 %1754 }
 0x602   :  { %1018 = vrot.lane.b32.xlu0 %v986_v18, %s2793_s14 }
 0x604   :  { %v3815_v52 = vpop.permute.xlu0 %1076 }
 0x605   :  { %1084 = vadd.xlane.f32.xlu1 %v1083_v25 }
 0x606   :  { %1043 = vrot.lane.b32.xlu0 %v992_v60, %s2796_s17 }
 0x616   :  { %1007 = vrot.lane.b32.xlu1 %v3727_v38, %s2788_s2 }
 0x61a   :  { %1016 = vrot.lane.b32.xlu1 %v985_v27, %s2793_s14 }
 0x61e   :  { %1041 = vrot.lane.b32.xlu1 %v991_v1, %s2796_s17 }
 0x622   :  { %1029 = vrot.lane.b32.xlu1 %v989_v9, %s2794_s15 }
 0x625   :  { %1821 = vadd.xlane.f32.xlu0 %v1820_v56 }
 0x626   :  { %1054 = vrot.lane.b32.xlu1 %v995_v14, %s2795_s16 }
 0x629   :  { %1824 = vadd.xlane.f32.xlu0 %v1823_v58 }
 0x62a   :  { %1074 = vrot.lane.b32.xlu1 %v998_v48, %s2798_s19 }
 0x62e   :  { %1745 = vrot.lane.b32.xlu1 %v3785_v8, %s2788_s2 }
 0x632   :  { %1756 = vrot.lane.b32.xlu1 %v1725_v23, %s2793_s14 }
 0x63f   :  { %1747 = vrot.lane.b32.xlu0 %v3794_v40, %s2788_s2 }
 0x643   :  { %1758 = vrot.lane.b32.xlu0 %v1726_v24, %s2793_s14 }
 0x64b   :  { %v3817_v31 = vpop.permute.xlu1 %1005 }
 0x64f   :  { %v3819_v41 = vpop.permute.xlu1 %1033 }
 0x653   :  { %v3823_v44 = vpop.permute.xlu1 %1061 }
 0x665   :  { %v1082_v22 = vpop.xlane.xlu0 %1081 }
 0x666   :  { %v1086_v43 = vmul.f32 0.00390625, %v1082_v22 }
 0x668   :  { %v1091_v18 = vmul.f32 %v2618_v61, %v1086_v43  ;;  %v2620_v43 = vld [vmem:[%s4591_s6 + $0x1] sm:$0x1] }
 0x669   :  { %v3821_v35 = vpop.permute.xlu0 %1035 }
 0x66a   :  { %v1093_v1 = vsel %vm633_vm13, %v1091_v18, 0.0 }
 0x66d   :  { %v3828_v54 = vpop.permute.xlu0 %1063 }
 0x671   :  { %v3833_v27 = vpop.permute.xlu0 %1027 }
 0x675   :  { %v3837_v58 = vpop.permute.xlu0 %1052 }
 0x679   :  { %v3839_v22 = vpop.permute.xlu0 %1072 }
 0x692   :  { %v1085_v19 = vpop.xlane.xlu1 %1084 }
 0x693   :  { %v1087_v25 = vmul.f32 0.00390625, %v1085_v19  ;;  %v3844_v19 = vpop.permute.xlu0 %1018 }
 0x695   :  { %v1092_v60 = vmul.f32 %v2619_v53, %v1087_v25 }
 0x697   :  { %v1094_v9 = vsel %vm633_vm13, %v1092_v60, 0.0  ;;  %v2622_v60 = vld [vmem:[%s4592_s7 + $0x18] sm:$0xff] }
 0x698   :  { %v1095_v56 = vadd.f32 %v1094_v9, %v1093_v1  ;;  %v2621_v1 = vld [vmem:[%s4592_s7 + $0x10] sm:$0xff] }
 0x69a   :  { %v1096_v14 = vrot.slane %v1095_v56, 4 }
 0x69c   :  { %v1097_v48 = vadd.f32 %v1096_v14, %v1095_v56 }
 0x69e   :  { %v1098_v23 = vrot.slane %v1097_v48, 2 }
 0x6a0   :  { %v1099_v24 = vadd.f32 %v1098_v23, %v1097_v48  ;;  %v3853_v48 = vpop.permute.xlu0 %1043 }
 0x6a2   :  { %v1100_v13 = vrot.slane %v1099_v24, 1 }
 0x6a4   :  { %v1101_v61 = vadd.f32 %v1100_v13, %v1099_v24 }
 0x6a6   :  { %v1104_v53 = vadd.f32 %v2620_v43, %v1101_v61  ;;  %v1828_v61 = vld [vmem:[%s4590_s5] sm:$0xff] }
 0x6a8   :  { %vm1105_vm0 = vcmp.gt.f32.partialorder %v1104_v53, 0.0  ;;  %v1106_v18 = vmul.f32 0.01, %v1104_v53 }
 0x6aa   :  { %v1107_v25 = vsel %vm1105_vm0, %v1104_v53, %v1106_v18  ;;  %v1829_v53 = vld [vmem:[%s4590_s5 + $0x8] sm:$0xff] }
 0x6ab   :  { %v1114_v9 = vrot.slane %v1107_v25, %v2880_v11 }
 0x6ad   :  { %v1116_v56 = vmul.f32 %v2622_v60, %v1114_v9  ;;  %v1115_v14 = vmul.f32 %v2621_v1, %v1114_v9 }
 0x6af   :  { %v1120_v13 = vsel %vm633_vm13, %v1116_v56, 0.0  ;;  %v1117_v23 = vsel %vm633_vm13, %v1115_v14, 0.0 }
 0x6b0   :  { %1121 = vadd.xlane.f32.xlu0 %v1120_v13  ;;  %1118 = vadd.xlane.f32.xlu1 %v1117_v23  ;;  %v1729_v23 = vmul.bf16 %v3794_v40, %v4635_v21 }
 0x6b2   :  { %v1822_v24 = vpop.xlane.xlu0 %1821 }
 0x6b3   :  { %v1826_v43 = vmul.f32 0.00390625, %v1822_v24 }
 0x6b5   :  { %v1830_v25 = vmul.f32 %v1828_v61, %v1826_v43 }
 0x6b6   :  { %v1825_v18 = vpop.xlane.xlu0 %1824 }
 0x6b7   :  { %v1827_v60 = vmul.f32 0.00390625, %v1825_v18  ;;  %v1832_v9 = vsel %vm633_vm13, %v1830_v25, 0.0 }
 0x6b9   :  { %v1831_v1 = vmul.f32 %v1829_v53, %v1827_v60  ;;  %v1841_v53 = vld [vmem:[%s4591_s6] sm:$0x1] }
 0x6bb   :  { %v1833_v56 = vsel %vm633_vm13, %v1831_v1, 0.0 }
 0x6bc   :  { %v1834_v14 = vadd.f32 %v1833_v56, %v1832_v9  ;;  %v1847_v9 = vld [vmem:[%s4592_s7 + $0x8] sm:$0xff] }
 0x6be   :  { %v1835_v13 = vrot.slane %v1834_v14, 4 }
 0x6c0   :  { %v1836_v24 = vadd.f32 %v1835_v13, %v1834_v14  ;;  %v1731_v13 = vmul.bf16 %v3785_v8, %v4634_v16 }
 0x6c1   :  { %1769 = vrot.lane.b32.xlu1 %v1729_v23, %s2794_s15  ;;  %v983_v23 = vmul.bf16 %v3727_v38, %v2999_v59  ;;  %v1008_v38 = vpop.permute.xlu1 %1007 }
 0x6c2   :  { %v1837_v57 = vrot.slane %v1836_v24, 2 }
 0x6c4   :  { %v1838_v29 = vadd.f32 %v1837_v57, %v1836_v24  ;;  %v1846_v57 = vld [vmem:[%s4592_s7] sm:$0xff]  ;;  %v1732_v24 = vmul.bf16 %v3794_v40, %v2980_v51 }
 0x6c6   :  { %1767 = vrot.lane.b32.xlu0 %v1728_v15, %s2794_s15  ;;  %v1839_v43 = vrot.slane %v1838_v29, 1 }
 0x6c8   :  { %v1840_v61 = vadd.f32 %v1839_v43, %v1838_v29  ;;  %v1734_v43 = vmul.bf16 %v3785_v8, %v2956_v42 }
 0x6ca   :  { %v1842_v18 = vadd.f32 %v1841_v53, %v1840_v61  ;;  %v982_v61 = vmul.bf16 %v3717_v0, %v3029_v10  ;;  %v1735_v53 = vmul.bf16 %v3794_v40, %v4636_v2  ;;  %v1010_v0 = vsel %vm172_vm1, %v3817_v31, %v1008_v38 }
 0x6cc   :  { %v1844_v25 = vmul.f32 0.01, %v1842_v18  ;;  %vm1843_vm0 = vcmp.gt.f32.partialorder %v1842_v18, 0.0 }
 0x6ce   :  { %v1845_v60 = vsel %vm1843_vm0, %v1842_v18, %v1844_v25  ;;  %v2702_v18 = vunpack.i.l.bf16 %v3803_v47  ;;  %v1017_v25 = vpop.permute.xlu1 %1016 }
 0x6cf   :  { %v1851_v1 = vrot.slane %v1845_v60, %v2880_v11 }
 0x6d0   :  { %v1009_v60 = vsel %vm172_vm1, %v2702_v18, %v3817_v31  ;;  %v3942_v31 = vld [vmem:[%s4593_s8 + $0x18] sm:$0xff] }
 0x6d1   :  { %v1853_v15 = vmul.f32 %v1851_v1, %v1847_v9  ;;  %v1852_v29 = vmul.f32 %v1851_v1, %v1846_v57 }
 0x6d2   :  { %v3923_v1 = vpop.permute.xlu1 %1041 }
 0x6d3   :  { %v1857_v56 = vsel %vm633_vm13, %v1853_v15, 0.0  ;;  %v1854_v14 = vsel %vm633_vm13, %v1852_v29, 0.0 }
 0x6d6   :  { %v1030_v9 = vpop.permute.xlu1 %1029 }
 0x6da   :  { %v3927_v57 = vpop.permute.xlu1 %1054 }
 0x6de   :  { %v3929_v15 = vpop.permute.xlu1 %1074 }
 0x6e2   :  { %v3931_v29 = vpop.permute.xlu1 %1745 }
 0x6e5   :  { %1858 = vadd.xlane.f32.xlu0 %v1857_v56  ;;  %1855 = vadd.xlane.f32.xlu1 %v1854_v14  ;;  %v3933_v56 = vpop.permute.xlu0 %1747 }
 0x6e6   :  { %v3935_v14 = vpop.permute.xlu1 %1756 }
 0x6f6   :  { %1773 = vrot.lane.b32.xlu1 %v3785_v8, %s2792_s13 }
 0x6fa   :  { %1781 = vrot.lane.b32.xlu1 %v1731_v13, %s2796_s17  ;;  %v3937_v13 = vpop.permute.xlu0 %1758 }
 0x6fb   :  { %1765 = vrot.lane.b32.xlu0 %v2949_v39, %s2794_s15 }
 0x6fe   :  { %1785 = vrot.lane.b32.xlu1 %v2966_v46, %s2796_s17 }
 0x6ff   :  { %1775 = vrot.lane.b32.xlu0 %v3794_v40, %s2792_s13 }
 0x702   :  { %1246 = vrot.lane.b32.xlu1 %v983_v23, %s2791_s23  ;;  %v3947_v23 = vld [vmem:[%s4593_s8 + $0x10] sm:$0xff] }
 0x703   :  { %1783 = vrot.lane.b32.xlu0 %v1732_v24, %s2796_s17 }
 0x706   :  { %1792 = vrot.lane.b32.xlu1 %v1734_v43, %s2795_s16 }
 0x707   :  { %1244 = vrot.lane.b32.xlu0 %v982_v61, %s2791_s23 }
 0x70a   :  { %1796 = vrot.lane.b32.xlu1 %v2972_v49, %s2795_s16 }
 0x70b   :  { %1242 = vrot.lane.b32.xlu0 %v3013_v63, %s2791_s23 }
 0x70e   :  { %1252 = vrot.lane.b32.xlu1 %v1008_v38, %s2791_s23 }
 0x70f   :  { %1794 = vrot.lane.b32.xlu0 %v1735_v53, %s2795_s16 }
 0x712   :  { %1801 = vrot.lane.b32.xlu1 %v3785_v8, %s2797_s18 }
 0x713   :  { %1250 = vrot.lane.b32.xlu0 %v1010_v0, %s2791_s23 }
 0x717   :  { %1248 = vrot.lane.b32.xlu0 %v1009_v60, %s2791_s23 }
 0x71b   :  { %1803 = vrot.lane.b32.xlu0 %v3794_v40, %s2797_s18 }
 0x73d   :  { %v1122_v24 = vpop.xlane.xlu0 %1121  ;;  %v1119_v43 = vpop.xlane.xlu1 %1118 }
 0x73e   :  { %v1127_v61 = vadd.f32 %v3942_v31, %v1122_v24  ;;  %v1126_v38 = vadd.f32 %v3947_v23, %v1119_v43  ;;  %v1021_v24 = vsel %vm237_vm6, %v1017_v25, %v3844_v19  ;;  %v1737_v43 = vmul.bf16 %v3785_v8, %v2977_v50 }
 0x740   :  { %v1129_v53 = vsub.f32 0.0, %v1127_v61  ;;  %v1128_v0 = vsub.f32 0.0, %v1126_v38 }
 0x742   :  { %v1132_v18 = vmul.f32 1.442695, %v1129_v53  ;;  %v1130_v60 = vmul.f32 1.442695, %v1128_v0 }
 0x744   :  { %2729 = vpow2.f32 %v1132_v18 }
 0x745   :  { %2731 = vpow2.f32 %v1130_v60 }
 0x74e   :  { %v2730_v49 = vpop.eup %2729 }
 0x74f   :  { %v2732_v2 = vpop.eup %2731  ;;  %v1135_v42 = vadd.f32 1.0, %v2730_v49  ;;  %v1032_v49 = vsel %vm249_vm7, %v3833_v27, %v1030_v9 }
 0x750   :  { %v1134_v46 = vadd.f32 1.0, %v2732_v2  ;;  %v1037_v2 = vsel %vm109_vm5, %v3819_v41, %v3821_v35 }
 0x751   :  { %2733 = vrcp.f32 %v1135_v42  ;;  %v1020_v42 = vsel %vm237_vm6, %v3801_v3, %v1017_v25  ;;  %v1031_v3 = vsel %vm249_vm7, %v3807_v4, %v3833_v27  ;;  %v1860_v25 = vld [vmem:[%s4593_s8] sm:$0xff] }
 0x752   :  { %2735 = vrcp.f32 %v1134_v46  ;;  %v1738_v46 = vmul.bf16 %v3794_v40, %v4637_v20 }
 0x75b   :  { %v2734_v51 = vpop.eup %2733 }
 0x75c   :  { %v2736_v16 = vpop.eup %2735  ;;  %1145 = vperm.xlu0 %2687, %v2734_v51   ;;  %v3971_v51 = vpop.permute.xlu0 %1767 }
 0x75d   :  { %1140 = vperm.xlu1 %2688, %v2736_v16   ;;  %v3973_v16 = vpop.permute.xlu1 %1769 }
 0x760   :  { %1258 = vrot.lane.b32.xlu0 %v3844_v19, %s2791_s23  ;;  %v1861_v19 = vld [vmem:[%s4593_s8 + $0x8] sm:$0xff]  ;;  %s4638_s8 = smov 80  }
 0x761   :  { %1256 = vrot.lane.b32.xlu1 %v1021_v24, %s2791_s23 }
 0x764   :  { %1812 = vrot.lane.b32.xlu0 %v1737_v43, %s2798_s19  ;;  %v1047_v43 = vsel %vm266_vm8, %v3923_v1, %v3853_v48 }
 0x765   :  { %1254 = vrot.lane.b32.xlu1 %v1020_v42, %s2791_s23 }
 0x768   :  { %1816 = vrot.lane.b32.xlu0 %v3009_v62, %s2798_s19 }
 0x769   :  { %1814 = vrot.lane.b32.xlu1 %v1738_v46, %s2798_s19 }
 0x76c   :  { %1264 = vrot.lane.b32.xlu0 %v1030_v9, %s2791_s23 }
 0x76d   :  { %1262 = vrot.lane.b32.xlu1 %v1032_v49, %s2791_s23 }
 0x770   :  { %1268 = vrot.lane.b32.xlu0 %v1037_v2, %s2791_s23 }
 0x771   :  { %1260 = vrot.lane.b32.xlu1 %v1031_v3, %s2791_s23 }
 0x772   :  { %v1859_v9 = vpop.xlane.xlu0 %1858  ;;  %v1856_v61 = vpop.xlane.xlu1 %1855 }
 0x773   :  { %v1863_v38 = vadd.f32 %v1861_v19, %v1859_v9  ;;  %v1862_v53 = vadd.f32 %v1860_v25, %v1856_v61 }
 0x774   :  { %1266 = vrot.lane.b32.xlu0 %v3819_v41, %s2791_s23  ;;  %v1048_v41 = vsel %vm266_vm8, %v3853_v48, %v3805_v55 }
 0x775   :  { %v1865_v0 = vsub.f32 0.0, %v1863_v38  ;;  %v1864_v18 = vsub.f32 0.0, %v1862_v53  ;;  %1270 = vrot.lane.b32.xlu1 %v3821_v35, %s2791_s23 }
 0x776   :  { %v3993_v4 = vpop.permute.xlu0 %1765  ;;  %v3995_v27 = vpop.permute.xlu1 %1773 }
 0x777   :  { %v1868_v60 = vmul.f32 1.442695, %v1865_v0  ;;  %v1866_v24 = vmul.f32 1.442695, %v1864_v18 }
 0x778   :  { %1274 = vrot.lane.b32.xlu0 %v1047_v43, %s2791_s23 }
 0x779   :  { %2737 = vpow2.f32 %v1868_v60  ;;  %1276 = vrot.lane.b32.xlu1 %v1048_v41, %s2791_s23 }
 0x77a   :  { %2739 = vpow2.f32 %v1866_v24  ;;  %v4005_v35 = vpop.permute.xlu0 %1775  ;;  %v4007_v42 = vpop.permute.xlu1 %1781 }
 0x77d   :  { %1272 = vrot.lane.b32.xlu1 %v3923_v1, %s2791_s23 }
 0x77e   :  { %v4011_v46 = vpop.permute.xlu0 %1783  ;;  %v4013_v49 = vpop.permute.xlu1 %1785 }
 0x782   :  { %v1245_v2 = vpop.permute.xlu0 %1244  ;;  %v1247_v3 = vpop.permute.xlu1 %1246 }
 0x783   :  { %v2738_v19 = vpop.eup %2737  ;;  %v1297_v55 = vsel %vm209_vm4, %v1245_v2, %v1247_v3 }
 0x784   :  { %v2740_v48 = vpop.eup %2739  ;;  %v1871_v25 = vadd.f32 1.0, %v2738_v19  ;;  %1335 = vmatprep.subr.bf16.mxu0 %v1297_v55  ;;  %v1059_v55 = vsel %vm278_vm10, %v3927_v57, %v3811_v6  ;;  %v1078_v6 = vsel %vm300_vm11, %v3839_v22, %v3929_v15 }
 0x785   :  { %v1870_v9 = vadd.f32 1.0, %v2740_v48  ;;  %v1067_v48 = vsel %vm288_vm9, %v3823_v44, %v3828_v54 }
 0x786   :  { %2741 = vrcp.f32 %v1871_v25  ;;  %v1243_v61 = vpop.permute.xlu0 %1242  ;;  %v4016_v38 = vpop.permute.xlu1 %1792  ;;  %v2707_v25 = vunpack.i.l.bf16 %v3809_v5 }
 0x787   :  { %2743 = vrcp.f32 %v1870_v9  ;;  %v1296_v1 = vsel %vm209_vm4, %v1243_v61, %v1245_v2  ;;  %v1058_v2 = vsel %vm278_vm10, %v3837_v58, %v3927_v57  ;;  %v1760_v57 = vsel %vm237_vm6, %v3813_v7, %v3935_v14 }
 0x788   :  { %1336 = vmatpush1.bf16.msra.mxu0 %v1296_v1  ;;  %v1068_v9 = vsel %vm288_vm9, %v3828_v54, %v2707_v25  ;;  %v1722_v54 = vmul.bf16 %v3785_v8, %v3029_v10  ;;  %v2703_v8 = vunpack.i.h.bf16 %v3803_v47  ;;  %v1772_v47 = vsel %vm249_vm7, %v3971_v51, %v3973_v16 }
 0x78a   :  { %v4019_v53 = vpop.permute.xlu0 %1794  ;;  %v4021_v0 = vpop.permute.xlu1 %1796 }
 0x78e   :  { %v1251_v18 = vpop.permute.xlu0 %1250  ;;  %v1253_v60 = vpop.permute.xlu1 %1252 }
 0x78f   :  { %v1299_v24 = vsel %vm209_vm4, %v1251_v18, %v1253_v60 }
 0x790   :  { %v2742_v43 = vpop.eup %2741  ;;  %1337 = vmatprep.subr.bf16.mxu0 %v1299_v24 }
 0x791   :  { %v2744_v41 = vpop.eup %2743  ;;  %1881 = vperm.xlu1 %2688, %v2742_v43  }
 0x792   :  { %1876 = vperm.xlu0 %2687, %v2744_v41   ;;  %v1249_v3 = vpop.permute.xlu0 %1248 }
 0x793   :  { %v1298_v19 = vsel %vm209_vm4, %v1249_v3, %v1251_v18 }
 0x794   :  { %1338 = vmatpush1.bf16.msra.mxu0 %v1298_v19 }
 0x795   :  { %1280 = vrot.lane.b32.xlu1 %v1058_v2, %s2791_s23 }
 0x796   :  { %1282 = vrot.lane.b32.xlu0 %v1059_v55, %s2791_s23 }
 0x799   :  { %1278 = vrot.lane.b32.xlu1 %v3837_v58, %s2791_s23  ;;  %v1079_v58 = vsel %vm300_vm11, %v3929_v15, %v3815_v52  ;;  %v1750_v52 = vsel %vm172_vm1, %v3931_v29, %v3933_v56  ;;  %v4089_v15 = vpop.permute.xlu0 %1803 }
 0x79a   :  { %1286 = vrot.lane.b32.xlu0 %v1067_v48, %s2791_s23 }
 0x79d   :  { %1288 = vrot.lane.b32.xlu1 %v1068_v9, %s2791_s23 }
 0x79e   :  { %1284 = vrot.lane.b32.xlu0 %v3823_v44, %s2791_s23  ;;  %v1723_v44 = vmul.bf16 %v3794_v40, %v2999_v59  ;;  %v1761_v40 = vsel %vm237_vm6, %v3935_v14, %v3937_v13 }
 0x7a1   :  { %1292 = vrot.lane.b32.xlu1 %v1078_v6, %s2791_s23 }
 0x7a2   :  { %1294 = vrot.lane.b32.xlu0 %v1079_v58, %s2791_s23 }
 0x7a5   :  { %1290 = vrot.lane.b32.xlu1 %v3839_v22, %s2791_s23  ;;  %v1749_v22 = vsel %vm172_vm1, %v2703_v8, %v3931_v29  ;;  %v4091_v29 = vpop.permute.xlu1 %1801 }
 0x7a6   :  { %2005 = vrot.lane.b32.xlu0 %v1722_v54, %s2791_s23 }
 0x7a9   :  { %2007 = vrot.lane.b32.xlu1 %v1723_v44, %s2791_s23 }
 0x7aa   :  { %2003 = vrot.lane.b32.xlu0 %v3013_v63, %s2791_s23 }
 0x7ad   :  { %2011 = vrot.lane.b32.xlu1 %v1750_v52, %s2791_s23 }
 0x7ae   :  { %2013 = vrot.lane.b32.xlu0 %v3933_v56, %s2791_s23 }
 0x7b1   :  { %2009 = vrot.lane.b32.xlu1 %v1749_v22, %s2791_s23 }
 0x7b2   :  { %2017 = vrot.lane.b32.xlu0 %v1761_v40, %s2791_s23 }
 0x7b5   :  { %2019 = vrot.lane.b32.xlu1 %v3937_v13, %s2791_s23 }
 0x7b6   :  { %2015 = vrot.lane.b32.xlu0 %v1760_v57, %s2791_s23 }
 0x7b9   :  { %2023 = vrot.lane.b32.xlu1 %v1772_v47, %s2791_s23 }
 0x7ba   :  { %2025 = vrot.lane.b32.xlu0 %v3973_v16, %s2791_s23 }
 0x7db   :  { %v4093_v56 = vpop.permute.xlu0 %1145 }
 0x7dc   :  { %v1149_v7 = vmul.f32 %v3464_v17, %v4093_v56  ;;  %v4097_v14 = vpop.permute.xlu1 %1140 }
 0x7dd   :  { %v1148_v13 = vmul.f32 %v3462_v34, %v4097_v14 }
 0x7de   :  { %v1151_v61 = vsel %vm442_vm12, %v1149_v7, 0.0 }
 0x7df   :  { %v1150_v1 = vsel %vm442_vm12, %v1148_v13, 0.0  ;;  %v1259_v18 = vpop.permute.xlu0 %1258 }
 0x7e0   :  { %v1152_v16 = vadd.f32 %v1151_v61, %v1150_v1  ;;  %v1257_v60 = vpop.permute.xlu1 %1256 }
 0x7e1   :  { %v1301_v24 = vsel %vm209_vm4, %v1257_v60, %v1259_v18 }
 0x7e2   :  { %v1153_v43 = vrot.slane %v1152_v16, 4  ;;  %1339 = vmatprep.subr.bf16.mxu0 %v1301_v24 }
 0x7e3   :  { %v4104_v41 = vpop.permute.xlu0 %1812 }
 0x7e4   :  { %v1154_v3 = vadd.f32 %v1153_v43, %v1152_v16  ;;  %v1255_v19 = vpop.permute.xlu1 %1254  ;;  %v1771_v16 = vsel %vm249_vm7, %v3993_v4, %v3971_v51  ;;  %v1777_v43 = vsel %vm109_vm5, %v3995_v27, %v4005_v35  ;;  %v1788_v51 = vsel %vm266_vm8, %v4011_v46, %v4013_v49 }
 0x7e5   :  { %v1300_v2 = vsel %vm209_vm4, %v1255_v19, %v1257_v60  ;;  %v1787_v4 = vsel %vm266_vm8, %v4007_v42, %v4011_v46  ;;  %v1798_v49 = vsel %vm278_vm10, %v4016_v38, %v4019_v53 }
 0x7e6   :  { %v1155_v55 = vrot.slane %v1154_v3, 2  ;;  %1340 = vmatpush1.bf16.msra.mxu0 %v1300_v2 }
 0x7e7   :  { %v4107_v48 = vpop.permute.xlu0 %1816 }
 0x7e8   :  { %v1156_v25 = vadd.f32 %v1155_v55, %v1154_v3  ;;  %v4109_v9 = vpop.permute.xlu1 %1814 }
 0x7ea   :  { %v1157_v6 = vrot.slane %v1156_v25, 1 }
 0x7eb   :  { %v1265_v58 = vpop.permute.xlu0 %1264 }
 0x7ec   :  { %v4111_v54 = vadd.f32 %v1157_v6, %v1156_v25  ;;  %v1263_v44 = vpop.permute.xlu1 %1262 }
 0x7ed   :  { %v1303_v52 = vsel %vm209_vm4, %v1263_v44, %v1265_v58 }
 0x7ee   :  { %1163 = vrot.lane.b32.xlu0 %v4111_v54, %s2800_s21  ;;  %1341 = vmatprep.subr.bf16.mxu0 %v1303_v52 }
 0x7ef   :  { %1160 = vrot.lane.b32.xlu1 %v4111_v54, %s2801_s22  ;;  %v1269_v8 = vpop.permute.xlu0 %1268 }
 0x7f0   :  { %v1261_v22 = vpop.permute.xlu1 %1260 }
 0x7f1   :  { %v1302_v40 = vsel %vm209_vm4, %v1261_v22, %v1263_v44 }
 0x7f2   :  { %1169 = vrot.lane.b32.xlu0 %v4111_v54, %s2802_s24  ;;  %1342 = vmatpush1.bf16.msra.mxu0 %v1302_v40 }
 0x7f3   :  { %1166 = vrot.lane.b32.xlu1 %v4111_v54, %s2803_s25  ;;  %v1267_v57 = vpop.permute.xlu0 %1266 }
 0x7f4   :  { %v1304_v47 = vsel %vm209_vm4, %v1267_v57, %v1269_v8  ;;  %v1271_v7 = vpop.permute.xlu1 %1270 }
 0x7f5   :  { %v1305_v13 = vsel %vm209_vm4, %v1269_v8, %v1271_v7 }
 0x7f6   :  { %1172 = vrot.lane.b32.xlu0 %v4111_v54, %s4638_s8  ;;  %1343 = vmatprep.subr.bf16.mxu0 %v1305_v13 }
 0x7f7   :  { %1175 = vrot.lane.b32.xlu1 %v4111_v54, %s2795_s16  ;;  %1344 = vmatpush1.bf16.msra.mxu0 %v1304_v47  ;;  %v1275_v61 = vpop.permute.xlu0 %1274 }
 0x7f8   :  { %v1277_v1 = vpop.permute.xlu1 %1276 }
 0x7f9   :  { %v1307_v18 = vsel %vm209_vm4, %v1275_v61, %v1277_v1 }
 0x7fa   :  { %1178 = vrot.lane.b32.xlu0 %v4111_v54, %s2794_s15  ;;  %1345 = vmatprep.subr.bf16.mxu0 %v1307_v18 }
 0x7fb   :  { %2021 = vrot.lane.b32.xlu1 %v1771_v16, %s2791_s23 }
 0x7fc   :  { %v1273_v60 = vpop.permute.xlu1 %1272 }
 0x7fd   :  { %v1306_v24 = vsel %vm209_vm4, %v1273_v60, %v1275_v61 }
 0x7fe   :  { %2029 = vrot.lane.b32.xlu0 %v1777_v43, %s2791_s23  ;;  %1346 = vmatpush1.bf16.msra.mxu0 %v1306_v24 }
 0x7ff   :  { %2031 = vrot.lane.b32.xlu1 %v4005_v35, %s2791_s23  ;;  %v1799_v35 = vsel %vm278_vm10, %v4019_v53, %v4021_v0 }
 0x802   :  { %2037 = vrot.lane.b32.xlu0 %v1788_v51, %s2791_s23 }
 0x803   :  { %2027 = vrot.lane.b32.xlu1 %v3995_v27, %s2791_s23 }
 0x806   :  { %2033 = vrot.lane.b32.xlu0 %v4007_v42, %s2791_s23 }
 0x807   :  { %2035 = vrot.lane.b32.xlu1 %v1787_v4, %s2791_s23 }
 0x80a   :  { %2043 = vrot.lane.b32.xlu0 %v1799_v35, %s2791_s23  ;;  %v2708_v35 = vunpack.i.h.bf16 %v3809_v5  ;;  %v2645_v5 = vld [vmem:[%s4589_s4 + $0x28] sm:$0xff] }
 0x80b   :  { %2041 = vrot.lane.b32.xlu1 %v1798_v49, %s2791_s23 }
 0x80c   :  { %v1808_v49 = vsel %vm288_vm9, %v4089_v15, %v2708_v35 }
 0x80f   :  { %2039 = vrot.lane.b32.xlu1 %v4016_v38, %s2791_s23 }
 0x810   :  { %v4165_v27 = vpop.permute.xlu1 %1881 }
 0x811   :  { %v4167_v42 = vpop.permute.xlu0 %1876  ;;  %v1885_v46 = vmul.f32 %v3464_v17, %v4165_v27 }
 0x812   :  { %v1884_v0 = vmul.f32 %v3462_v34, %v4167_v42 }
 0x813   :  { %v1887_v3 = vsel %vm442_vm12, %v1885_v46, 0.0  ;;  %v1807_v46 = vsel %vm288_vm9, %v4091_v29, %v4089_v15  ;;  %v1819_v15 = vsel %vm300_vm11, %v4109_v9, %v4107_v48 }
 0x814   :  { %v1886_v19 = vsel %vm442_vm12, %v1884_v0, 0.0  ;;  %v1281_v53 = vpop.permute.xlu1 %1280  ;;  %v1818_v0 = vsel %vm300_vm11, %v4104_v41, %v4109_v9 }
 0x815   :  { %v1888_v2 = vadd.f32 %v1887_v3, %v1886_v19  ;;  %v1283_v55 = vpop.permute.xlu0 %1282  ;;  %v2644_v3 = vld [vmem:[%s4589_s4 + $0x20] sm:$0xff] }
 0x816   :  { %v1309_v25 = vsel %vm209_vm4, %v1281_v53, %v1283_v55 }
 0x817   :  { %v1889_v38 = vrot.slane %v1888_v2, 4  ;;  %1347 = vmatprep.subr.bf16.mxu0 %v1309_v25 }
 0x818   :  { %v1279_v6 = vpop.permute.xlu1 %1278 }
 0x819   :  { %v1890_v58 = vadd.f32 %v1889_v38, %v1888_v2  ;;  %v1287_v44 = vpop.permute.xlu0 %1286  ;;  %v1308_v52 = vsel %vm209_vm4, %v1279_v6, %v1281_v53 }
 0x81a   :  { %1348 = vmatpush1.bf16.msra.mxu0 %v1308_v52 }
 0x81b   :  { %v1891_v8 = vrot.slane %v1890_v58, 2 }
 0x81c   :  { %v1289_v22 = vpop.permute.xlu1 %1288 }
 0x81d   :  { %v1892_v40 = vadd.f32 %v1891_v8, %v1890_v58  ;;  %v1285_v57 = vpop.permute.xlu0 %1284  ;;  %v1311_v47 = vsel %vm209_vm4, %v1287_v44, %v1289_v22 }
 0x81e   :  { %v1310_v7 = vsel %vm209_vm4, %v1285_v57, %v1287_v44  ;;  %1349 = vmatprep.subr.bf16.mxu0 %v1311_v47 }
 0x81f   :  { %v1893_v13 = vrot.slane %v1892_v40, 1  ;;  %1350 = vmatpush1.bf16.msra.mxu0 %v1310_v7 }
 0x820   :  { %v1293_v61 = vpop.permute.xlu1 %1292 }
 0x821   :  { %v4179_v1 = vadd.f32 %v1893_v13, %v1892_v40  ;;  %v1295_v18 = vpop.permute.xlu0 %1294 }
 0x822   :  { %v1313_v16 = vsel %vm209_vm4, %v1293_v61, %v1295_v18  ;;  %v1189_v18 = vpack.c.bf16 %v4111_v54, %v4111_v54 }
 0x823   :  { %1896 = vrot.lane.b32.xlu0 %v4179_v1, %s2801_s22  ;;  %1902 = vrot.lane.b32.xlu1 %v4179_v1, %s2803_s25 }
 0x824   :  { %1351 = vmatprep.subr.bf16.mxu0 %v1313_v16  ;;  %v1291_v60 = vpop.permute.xlu1 %1290 }
 0x825   :  { %v1312_v24 = vsel %vm209_vm4, %v1291_v60, %v1293_v61  ;;  %v4191_v43 = vpop.permute.xlu0 %2005 }
 0x826   :  { %1352 = vmatpush1.bf16.msra.mxu0 %v1312_v24 }
 0x827   :  { %1899 = vrot.lane.b32.xlu0 %v4179_v1, %s2800_s21  ;;  %1908 = vrot.lane.b32.xlu1 %v4179_v1, %s4638_s8 }
 0x828   :  { %v2008_v51 = vpop.permute.xlu1 %2007 }
 0x829   :  { %v2058_v4 = vsel %vm209_vm4, %v4191_v43, %v2008_v51  ;;  %v2004_v19 = vpop.permute.xlu0 %2003 }
 0x82a   :  { %2099 = vmatprep.subr.bf16.mxu0 %v2058_v4  ;;  %v1204_v4 = vpack.i.b16 %v1189_v18, %v1189_v18 }
 0x82b   :  { %1905 = vrot.lane.b32.xlu0 %v4179_v1, %s2802_s24  ;;  %1911 = vrot.lane.b32.xlu1 %v4179_v1, %s2795_s16 }
 0x82c   :  { %v2012_v9 = vpop.permute.xlu1 %2011 }
 0x82d   :  { %v2014_v48 = vpop.permute.xlu0 %2013 }
 0x82f   :  { %1914 = vrot.lane.b32.xlu0 %v4179_v1, %s2794_s15  ;;  %2049 = vrot.lane.b32.xlu1 %v1808_v49, %s2791_s23 }
 0x830   :  { %v2010_v2 = vpop.permute.xlu1 %2009 }
 0x831   :  { %v2018_v53 = vpop.permute.xlu0 %2017 }
 0x833   :  { %2047 = vrot.lane.b32.xlu0 %v1807_v46, %s2791_s23  ;;  %2053 = vrot.lane.b32.xlu1 %v1818_v0, %s2791_s23  ;;  %v1209_v46 = vrot.slane %v1204_v4, %v2880_v11 }
 0x834   :  { %v2020_v25 = vpop.permute.xlu1 %2019 }
 0x835   :  { %v2016_v55 = vpop.permute.xlu0 %2015 }
 0x837   :  { %2045 = vrot.lane.b32.xlu0 %v4091_v29, %s2791_s23  ;;  %2051 = vrot.lane.b32.xlu1 %v4104_v41, %s2791_s23  ;;  %v2647_v29 = vld [vmem:[%s4589_s4 + $0x38] sm:$0xff]  ;;  %v2646_v41 = vld [vmem:[%s4589_s4 + $0x30] sm:$0xff] }
 0x838   :  { %v2024_v6 = vpop.permute.xlu1 %2023 }
 0x839   :  { %v2026_v38 = vpop.permute.xlu0 %2025 }
 0x83b   :  { %2055 = vrot.lane.b32.xlu0 %v1819_v15, %s2791_s23  ;;  %1969 = vperm.xlu1 %2688, %v2645_v5   ;;  %v4248_v5 = vld [vmem:[%s4594_s9] sm:$0xff] }
 0x83f   :  { %1964 = vperm.xlu0 %2687, %v2644_v3   ;;  %1979 = vperm.xlu1 %2688, %v2647_v29  }
 0x843   :  { %1974 = vperm.xlu0 %2687, %v2646_v41  }
 0x860   :  { %v1164_v58 = vpop.permute.xlu0 %1163 }
 0x861   :  { %v1161_v44 = vpop.permute.xlu1 %1160 }
 0x862   :  { %v1181_v52 = vsel %vm442_vm12, %v4111_v54, %v1161_v44  ;;  %v4253_v54 = vld [vmem:[%s4594_s9 + $0x8] sm:$0xff] }
 0x863   :  { %v1182_v22 = vsel %vm720_vm2, %v1181_v52, %v1164_v58  ;;  %v2057_v52 = vsel %vm209_vm4, %v2004_v19, %v4191_v43  ;;  %v2064_v43 = vsel %vm209_vm4, %v2024_v6, %v2026_v38 }
 0x864   :  { %v1170_v8 = vpop.permute.xlu0 %1169 }
 0x865   :  { %v1167_v40 = vpop.permute.xlu1 %1166 }
 0x866   :  { %v1183_v57 = vsel %vm722_vm3, %v1182_v22, %v1167_v40  ;;  %v2060_v22 = vsel %vm209_vm4, %v2012_v9, %v2014_v48 }
 0x867   :  { %v1184_v7 = vsel %vm724_vm14, %v1183_v57, %v1170_v8  ;;  %v2059_v57 = vsel %vm209_vm4, %v2010_v2, %v2012_v9 }
 0x868   :  { %v1173_v47 = vpop.permute.xlu0 %1172 }
 0x869   :  { %v1185_v13 = vsel %vm726_vm15, %v1184_v7, %v1173_v47  ;;  %v1176_v61 = vpop.permute.xlu1 %1175  ;;  %v2062_v47 = vsel %vm209_vm4, %v2018_v53, %v2020_v25 }
 0x86a   :  { %v1186_v16 = vsel %vm278_vm10, %v1185_v13, %v1176_v61  ;;  %v2061_v13 = vsel %vm209_vm4, %v2016_v55, %v2018_v53 }
 0x86c   :  { %v1179_v60 = vpop.permute.xlu0 %1178 }
 0x86d   :  { %v1187_v24 = vsel %vm249_vm7, %v1186_v16, %v1179_v60  ;;  %v2022_v0 = vpop.permute.xlu1 %2021 }
 0x86e   :  { %v1188_v51 = vpack.c.bf16 %v1187_v24, %v1187_v24  ;;  %v2063_v19 = vsel %vm209_vm4, %v2022_v0, %v2024_v6 }
 0x870   :  { %v1197_v35 = vpack.i.b16 %v1188_v51, %v1188_v51  ;;  %v2030_v8 = vpop.permute.xlu0 %2029 }
 0x871   :  { %v2032_v58 = vpop.permute.xlu1 %2031 }
 0x872   :  { %v1202_v49 = vrot.slane %v1197_v35, %v2880_v11  ;;  %v2066_v48 = vsel %vm209_vm4, %v2030_v8, %v2032_v58 }
 0x874   :  { %v2625_v15 = vcombine.low %v1202_v49, %v1209_v46  ;;  %v2038_v7 = vpop.permute.xlu0 %2037 }
 0x875   :  { %v2028_v40 = vpop.permute.xlu1 %2027 }
 0x876   :  { %v1216_v3 = vmul.bf16 %v2625_v15, %v4248_v5  ;;  %v1217_v29 = vmul.bf16 %v2625_v15, %v4253_v54  ;;  %v2065_v2 = vsel %vm209_vm4, %v2028_v40, %v2030_v8 }
 0x878   :  { %v2626_v41 = vcombine.low %v1216_v3, %v1217_v29  ;;  %v2627_v44 = vcombine.high %v1216_v3, %v1217_v29  ;;  %v2034_v18 = vpop.permute.xlu0 %2033 }
 0x879   :  { %v2036_v61 = vpop.permute.xlu1 %2035 }
 0x87a   :  { %2628 = vmatprep.mubr.msk.bf16.mxu0 %vm442_vm12, %v2627_v44  ;;  %v2068_v25 = vsel %vm209_vm4, %v2036_v61, %v2038_v7  ;;  %v2067_v53 = vsel %vm209_vm4, %v2034_v18, %v2036_v61 }
 0x87b   :  { %1368 = vmatmul.mubr.bf16.vlgmr.msra.gmra.mrb[8].mxu0 %v2626_v41  ;;  %v1925_v41 = vpack.c.bf16 %v4179_v1, %v4179_v1 }
 0x87c   :  { %2100 = vmatpush1.bf16.msra.mxu0 %v2057_v52  ;;  %v2044_v16 = vpop.permute.xlu0 %2043 }
 0x87d   :  { %2101 = vmatprep.subr.bf16.mxu0 %v2060_v22  ;;  %v2042_v9 = vpop.permute.xlu1 %2041  ;;  %v1942_v40 = vpack.i.b16 %v1925_v41, %v1925_v41 }
 0x87e   :  { %v2070_v38 = vsel %vm209_vm4, %v2042_v9, %v2044_v16  ;;  %v2641_v16 = vld [vmem:[%s4588_s3 + $0x30] sm:$0xff] }
 0x880   :  { %2102 = vmatpush1.bf16.msra.mxu0 %v2059_v57 }
 0x881   :  { %2103 = vmatprep.subr.bf16.mxu0 %v2062_v47  ;;  %v2040_v55 = vpop.permute.xlu1 %2039 }
 0x882   :  { %v2069_v6 = vsel %vm209_vm4, %v2040_v55, %v2042_v9 }
 0x884   :  { %2104 = vmatpush1.bf16.msra.mxu0 %v2061_v13 }
 0x885   :  { %2105 = vmatprep.subr.bf16.mxu0 %v2064_v43  ;;  %v1947_v43 = vrot.slane %v1942_v40, %v2880_v11 }
 0x888   :  { %2106 = vmatpush1.bf16.msra.mxu0 %v2063_v19  ;;  %v2640_v19 = vld [vmem:[%s4588_s3 + $0x28] sm:$0xff] }
 0x889   :  { %2107 = vmatprep.subr.bf16.mxu0 %v2066_v48 }
 0x88c   :  { %2108 = vmatpush1.bf16.msra.mxu0 %v2065_v2 }
 0x88d   :  { %2109 = vmatprep.subr.bf16.mxu0 %v2068_v25 }
 0x890   :  { %2110 = vmatpush1.bf16.msra.mxu0 %v2067_v53  ;;  %v2642_v53 = vld [vmem:[%s4588_s3 + $0x38] sm:$0xff] }
 0x891   :  { %2111 = vmatprep.subr.bf16.mxu0 %v2070_v38 }
 0x894   :  { %2112 = vmatpush1.bf16.msra.mxu0 %v2069_v6 }
 0x895   :  { %v1897_v60 = vpop.permute.xlu0 %1896  ;;  %v1903_v24 = vpop.permute.xlu1 %1902 }
 0x896   :  { %v1917_v51 = vsel %vm442_vm12, %v4179_v1, %v1897_v60  ;;  %v2639_v1 = vld [vmem:[%s4588_s3 + $0x20] sm:$0xff] }
 0x899   :  { %v1900_v4 = vpop.permute.xlu0 %1899  ;;  %v1909_v35 = vpop.permute.xlu1 %1908 }
 0x89a   :  { %v1918_v49 = vsel %vm720_vm2, %v1917_v51, %v1900_v4 }
 0x89b   :  { %v1919_v0 = vsel %vm722_vm3, %v1918_v49, %v1903_v24 }
 0x89d   :  { %v1906_v46 = vpop.permute.xlu0 %1905  ;;  %v1912_v15 = vpop.permute.xlu1 %1911 }
 0x89e   :  { %v1920_v3 = vsel %vm724_vm14, %v1919_v0, %v1906_v46 }
 0x89f   :  { %v1921_v29 = vsel %vm726_vm15, %v1920_v3, %v1909_v35 }
 0x8a0   :  { %v1922_v58 = vsel %vm278_vm10, %v1921_v29, %v1912_v15 }
 0x8a1   :  { %v1915_v44 = vpop.permute.xlu0 %1914  ;;  %v2050_v52 = vpop.permute.xlu1 %2049 }
 0x8a2   :  { %v1923_v8 = vsel %vm249_vm7, %v1922_v58, %v1915_v44 }
 0x8a3   :  { %v1924_v22 = vpack.c.bf16 %v1923_v8, %v1923_v8 }
 0x8a5   :  { %v1935_v57 = vpack.i.b16 %v1924_v22, %v1924_v22  ;;  %v2048_v47 = vpop.permute.xlu0 %2047  ;;  %v2054_v7 = vpop.permute.xlu1 %2053 }
 0x8a6   :  { %v2072_v13 = vsel %vm209_vm4, %v2048_v47, %v2050_v52 }
 0x8a7   :  { %v1940_v61 = vrot.slane %v1935_v57, %v2880_v11  ;;  %2113 = vmatprep.subr.bf16.mxu0 %v2072_v13  ;;  %v1926_v57 = vmul.f32 %v4167_v42, %v3742_v12  ;;  %v1927_v13 = vmul.f32 %v4167_v42, %v3744_v36 }
 0x8a9   :  { %v2643_v18 = vcombine.low %v1940_v61, %v1947_v43  ;;  %v2046_v48 = vpop.permute.xlu0 %2045  ;;  %v2052_v55 = vpop.permute.xlu1 %2051 }
 0x8aa   :  { %v2071_v9 = vsel %vm209_vm4, %v2046_v48, %v2048_v47  ;;  %v2073_v4 = vsel %vm209_vm4, %v2052_v55, %v2054_v7 }
 0x8ab   :  { %2114 = vmatpush1.bf16.msra.mxu0 %v2071_v9  ;;  %v1954_v2 = vmul.bf16 %v2643_v18, %v2639_v1  ;;  %v1955_v25 = vmul.bf16 %v2643_v18, %v2640_v19  ;;  %v1956_v24 = vmul.bf16 %v2643_v18, %v2641_v16  ;;  %v1957_v51 = vmul.bf16 %v2643_v18, %v2642_v53 }
 0x8ac   :  { %v1928_v1 = vmul.f32 %v4165_v27, %v3747_v30  ;;  %v1929_v18 = vmul.f32 %v4165_v27, %v3749_v26 }
 0x8ad   :  { %v2056_v38 = vpop.permute.xlu0 %2055  ;;  %v2649_v6 = vcombine.high %v1954_v2, %v1955_v25  ;;  %v2648_v35 = vcombine.low %v1954_v2, %v1955_v25  ;;  %v2651_v49 = vcombine.high %v1956_v24, %v1957_v51  ;;  %v2650_v46 = vcombine.low %v1956_v24, %v1957_v51 }
 0x8ae   :  { %v2074_v60 = vsel %vm209_vm4, %v2054_v7, %v2056_v38 }
 0x8af   :  { %2115 = vmatprep.subr.bf16.mxu0 %v2074_v60  ;;  %2652 = vmatprep.mubr.msk.bf16.mxu0 %vm442_vm12, %v2649_v6 }
 0x8b0   :  { %2116 = vmatpush1.bf16.msra.mxu0 %v2073_v4 }
 0x8b3   :  { %2132 = vmatmul.mubr.bf16.vlgmr.msra.gmra.mrb[12].mxu0 %v2648_v35 }
 0x8b4   :  { %2653 = vmatprep.mubr.msk.bf16.mxu0 %vm442_vm12, %v2651_v49 }
 0x8ba   :  { %v1970_v8 = vpop.permute.xlu1 %1969 }
 0x8bb   :  { %2142 = vmatmul.mubr.bf16.gmra.mrb[16].mxu0 %v2650_v46 }
 0x8be   :  { %v1965_v41 = vpop.permute.xlu0 %1964  ;;  %v1980_v55 = vpop.permute.xlu1 %1979 }
 0x8c2   :  { %v1975_v9 = vpop.permute.xlu0 %1974 }
 0x94e   :  { %v4302_v0 = vpop.f32.mrb[8].mxu0 }
 0x94f   :  { %v4304_v15 = vpop.f32.mrb[9].mxu0 }
 0x950   :  { %v4306_v3 = vpop.f32.mrb[10].mxu0 }
 0x951   :  { %v4308_v29 = vpop.f32.mrb[11].mxu0 }
 0x986   :  { %v2133_v58 = vpop.f32.mrb[12].mxu0 }
 0x987   :  { %v2134_v44 = vadd.f32 %v2133_v58, %v1965_v41  ;;  %v2135_v52 = vpop.f32.mrb[13].mxu0 }
 0x988   :  { %v2136_v22 = vadd.f32 %v2135_v52, %v1965_v41  ;;  %v2137_v40 = vpop.f32.mrb[14].mxu0  ;;  %v2654_v52 = vld [vmem:[%s4590_s5 + $0x10] sm:$0xff] }
 0x989   :  { %v2138_v47 = vadd.f32 %v2137_v40, %v1970_v8  ;;  %v2139_v7 = vpop.f32.mrb[15].mxu0  ;;  %v2152_v43 = vadd.f32 %v2134_v44, %v1926_v57  ;;  %v2655_v40 = vld [vmem:[%s4590_s5 + $0x18] sm:$0xff] }
 0x98a   :  { %v2140_v61 = vadd.f32 %v2139_v7, %v1970_v8  ;;  %v2153_v19 = vadd.f32 %v2136_v22, %v1927_v13 }
 0x98b   :  { %v2154_v48 = vadd.f32 %v2138_v47, %v1928_v1  ;;  %v2156_v16 = vmax.f32 %v2152_v43, 0.0 }
 0x98c   :  { %v2155_v2 = vadd.f32 %v2140_v61, %v1929_v18  ;;  %v2157_v38 = vmax.f32 %v2153_v19, 0.0 }
 0x98d   :  { %v2158_v42 = vmax.f32 %v2154_v48, 0.0 }
 0x98e   :  { %v2143_v25 = vpop.f32.mrb[16].mxu0  ;;  %v2159_v51 = vmax.f32 %v2155_v2, 0.0 }
 0x98f   :  { %v2144_v12 = vadd.f32 %v2143_v25, %v1975_v9  ;;  %v2145_v53 = vpop.f32.mrb[17].mxu0 }
 0x990   :  { %v2146_v6 = vadd.f32 %v2145_v53, %v1975_v9  ;;  %v2147_v36 = vpop.f32.mrb[18].mxu0  ;;  %v2656_v9 = vld [vmem:[%s4591_s6 + $0x1] sm:$0x1]  ;;  %v2657_v53 = vld [vmem:[%s4592_s7 + $0x10] sm:$0xff] }
 0x991   :  { %v4318_v60 = vadd.f32 %v2156_v16, %v2144_v12  ;;  %v2148_v24 = vadd.f32 %v2147_v36, %v1980_v55  ;;  %v2149_v30 = vpop.f32.mrb[19].mxu0 }
 0x992   :  { %v4320_v4 = vadd.f32 %v2157_v38, %v2146_v6  ;;  %v2150_v26 = vadd.f32 %v2149_v30, %v1980_v55  ;;  %v2658_v38 = vld [vmem:[%s4592_s7 + $0x18] sm:$0xff] }
 0x993   :  { %v4322_v27 = vadd.f32 %v2158_v42, %v2148_v24 }
 0x994   :  { %v4324_v35 = vadd.f32 %v2159_v51, %v2150_v26  ;;  %v2270_v49 = vadd.f32 %v4320_v4, %v4318_v60 }
 0x995   :  { %v4332_v41 = vpack.c.bf16 %v4322_v27, %v4318_v60 }
 0x996   :  { %2271 = vadd.xlane.f32.xlu0 %v2270_v49  ;;  %v2273_v46 = vadd.f32 %v4324_v35, %v4322_v27  ;;  %v4338_v58 = vpack.c.bf16 %v4324_v35, %v4320_v4 }
 0x997   :  { %v2175_v44 = vmul.bf16 %v4332_v41, %v2943_v37  ;;  %v2178_v51 = vmul.bf16 %v4332_v41, %v2964_v45 }
 0x998   :  { %2274 = vadd.xlane.f32.xlu1 %v2273_v46  ;;  %v2176_v30 = vmul.bf16 %v4338_v58, %v2934_v33 }
 0x9a9   :  { %2195 = vrot.lane.b32.xlu1 %v4332_v41, %s2788_s2 }
 0x9ad   :  { %2197 = vrot.lane.b32.xlu1 %v4338_v58, %s2788_s2 }
 0x9b1   :  { %2206 = vrot.lane.b32.xlu1 %v2175_v44, %s2793_s14 }
 0x9b5   :  { %2204 = vrot.lane.b32.xlu1 %v2930_v32, %s2793_s14 }
 0xa23   :  { %v2272_v8 = vpop.xlane.xlu0 %2271 }
 0xa24   :  { %v2276_v22 = vmul.f32 0.00390625, %v2272_v8 }
 0xa25   :  { %v2275_v57 = vpop.xlane.xlu1 %2274 }
 0xa26   :  { %v2280_v47 = vmul.f32 %v2654_v52, %v2276_v22  ;;  %v2277_v7 = vmul.f32 0.00390625, %v2275_v57 }
 0xa28   :  { %v2281_v13 = vmul.f32 %v2655_v40, %v2277_v7  ;;  %v2282_v37 = vsel %vm633_vm13, %v2280_v47, 0.0 }
 0xa2a   :  { %v2283_v61 = vsel %vm633_vm13, %v2281_v13, 0.0 }
 0xa2b   :  { %v2284_v43 = vadd.f32 %v2283_v61, %v2282_v37  ;;  %v4640_v61 = vld [vmem:[#allocation11_spill] sm:$0xff] }
 0xa2d   :  { %v2285_v32 = vrot.slane %v2284_v43, 4 }
 0xa2f   :  { %v2286_v1 = vadd.f32 %v2285_v32, %v2284_v43  ;;  %v4641_v43 = vld [vmem:[#allocation9_spill] sm:$0xff] }
 0xa31   :  { %v2287_v19 = vrot.slane %v2286_v1, 2 }
 0xa33   :  { %v2288_v18 = vadd.f32 %v2287_v19, %v2286_v1  ;;  %v4643_v1 = vld [vmem:[#allocation12_spill] sm:$0xff] }
 0xa34   :  { %v2185_v19 = vmul.bf16 %v4338_v58, %v4643_v1 }
 0xa35   :  { %v2289_v48 = vrot.slane %v2288_v18, 1 }
 0xa37   :  { %v2290_v2 = vadd.f32 %v2289_v48, %v2288_v18  ;;  %v4644_v18 = vld [vmem:[#allocation10_spill] sm:$0xff]  ;;  %v2196_v48 = vpop.permute.xlu1 %2195 }
 0xa39   :  { %v2292_v25 = vadd.f32 %v2656_v9, %v2290_v2  ;;  %v2187_v9 = vmul.bf16 %v4332_v41, %v2977_v50  ;;  %v2188_v2 = vmul.bf16 %v4338_v58, %v4637_v20  ;;  %v2173_v50 = vmul.bf16 %v4338_v58, %v2999_v59 }
 0xa3b   :  { %vm2293_vm0 = vcmp.gt.f32.partialorder %v2292_v25, 0.0  ;;  %v2294_v16 = vmul.f32 0.01, %v2292_v25 }
 0xa3d   :  { %v2295_v12 = vsel %vm2293_vm0, %v2292_v25, %v2294_v16  ;;  %v2172_v25 = vmul.bf16 %v4332_v41, %v3029_v10  ;;  %v2198_v16 = vpop.permute.xlu1 %2197 }
 0xa3e   :  { %v2301_v55 = vrot.slane %v2295_v12, %v2880_v11  ;;  %v2200_v12 = vsel %vm172_vm1, %v2196_v48, %v2198_v16 }
 0xa40   :  { %v2302_v6 = vmul.f32 %v2657_v53, %v2301_v55  ;;  %v2303_v42 = vmul.f32 %v2658_v38, %v2301_v55 }
 0xa41   :  { %v2207_v20 = vpop.permute.xlu1 %2206 }
 0xa42   :  { %v2304_v36 = vsel %vm633_vm13, %v2302_v6, 0.0  ;;  %v2307_v24 = vsel %vm633_vm13, %v2303_v42, 0.0 }
 0xa43   :  { %2305 = vadd.xlane.f32.xlu0 %v2304_v36 }
 0xa47   :  { %2308 = vadd.xlane.f32.xlu0 %v2307_v24 }
 0xa5d   :  { %2193 = vrot.lane.b32.xlu0 %v4629_v28, %s2788_s2 }
 0xa61   :  { %2208 = vrot.lane.b32.xlu0 %v2176_v30, %s2793_s14 }
 0xa65   :  { %2217 = vrot.lane.b32.xlu0 %v2178_v51, %s2794_s15 }
 0xad0   :  { %v2306_v26 = vpop.xlane.xlu0 %2305 }
 0xad1   :  { %v2312_v49 = vadd.f32 %v3947_v23, %v2306_v26  ;;  %v2179_v23 = vmul.bf16 %v4338_v58, %v4635_v21  ;;  %v2182_v21 = vmul.bf16 %v4338_v58, %v4640_v61 }
 0xad3   :  { %v2314_v46 = vsub.f32 0.0, %v2312_v49 }
 0xad4   :  { %v2309_v44 = vpop.xlane.xlu0 %2308 }
 0xad5   :  { %v2316_v52 = vmul.f32 1.442695, %v2314_v46  ;;  %v2313_v8 = vadd.f32 %v3942_v31, %v2309_v44  ;;  %v4639_v31 = vld [vmem:[#allocation7_spill] sm:$0xff] }
 0xad6   :  { %v2181_v37 = vmul.bf16 %v4332_v41, %v4639_v31 }
 0xad7   :  { %2745 = vpow2.f32 %v2316_v52  ;;  %v2315_v22 = vsub.f32 0.0, %v2313_v8 }
 0xad9   :  { %v2318_v40 = vmul.f32 1.442695, %v2315_v22 }
 0xadb   :  { %2747 = vpow2.f32 %v2318_v40 }
 0xae1   :  { %v2746_v33 = vpop.eup %2745 }
 0xae2   :  { %v2320_v57 = vadd.f32 1.0, %v2746_v33 }
 0xae4   :  { %2749 = vrcp.f32 %v2320_v57 }
 0xae5   :  { %v2748_v47 = vpop.eup %2747 }
 0xae6   :  { %v2321_v7 = vadd.f32 1.0, %v2748_v47 }
 0xae8   :  { %2751 = vrcp.f32 %v2321_v7 }
 0xaee   :  { %v2750_v45 = vpop.eup %2749 }
 0xaef   :  { %2326 = vperm.xlu1 %2688, %v2750_v45  }
 0xaf2   :  { %v2752_v13 = vpop.eup %2751 }
 0xaf3   :  { %2331 = vperm.xlu0 %2687, %v2752_v13   ;;  %2219 = vrot.lane.b32.xlu1 %v2179_v23, %s2794_s15 }
 0xaf7   :  { %2215 = vrot.lane.b32.xlu0 %v2949_v39, %s2794_s15  ;;  %2223 = vrot.lane.b32.xlu1 %v4332_v41, %s2792_s13  ;;  %v4642_v39 = vld [vmem:[#allocation8_spill] sm:$0xff] }
 0xaf8   :  { %v2184_v32 = vmul.bf16 %v4332_v41, %v4642_v39 }
 0xafb   :  { %2225 = vrot.lane.b32.xlu0 %v4338_v58, %s2792_s13  ;;  %2231 = vrot.lane.b32.xlu1 %v2181_v37, %s2796_s17 }
 0xaff   :  { %2233 = vrot.lane.b32.xlu0 %v2182_v21, %s2796_s17  ;;  %2235 = vrot.lane.b32.xlu1 %v4641_v43, %s2796_s17 }
 0xb03   :  { %2242 = vrot.lane.b32.xlu0 %v2184_v32, %s2795_s16  ;;  %2244 = vrot.lane.b32.xlu1 %v2185_v19, %s2795_s16 }
 0xb07   :  { %2246 = vrot.lane.b32.xlu0 %v4644_v18, %s2795_s16  ;;  %2251 = vrot.lane.b32.xlu1 %v4332_v41, %s2797_s18  ;;  %v2205_v41 = vpop.permute.xlu1 %2204 }
 0xb08   :  { %v2210_v59 = vsel %vm237_vm6, %v2205_v41, %v2207_v20 }
 0xb0b   :  { %2253 = vrot.lane.b32.xlu0 %v4338_v58, %s2797_s18  ;;  %2255 = vrot.lane.b32.xlu1 %v4629_v28, %s2797_s18  ;;  %v2194_v28 = vpop.permute.xlu0 %2193 }
 0xb0f   :  { %2262 = vrot.lane.b32.xlu0 %v2187_v9, %s2798_s19  ;;  %2264 = vrot.lane.b32.xlu1 %v2188_v2, %s2798_s19  ;;  %v2209_v53 = vpop.permute.xlu0 %2208 }
 0xb10   :  { %v2211_v10 = vsel %vm237_vm6, %v2207_v20, %v2209_v53 }
 0xb13   :  { %2266 = vrot.lane.b32.xlu0 %v3009_v62, %s2798_s19  ;;  %2430 = vrot.lane.b32.xlu1 %v2172_v25, %s2791_s23  ;;  %v2199_v62 = vsel %vm172_vm1, %v2194_v28, %v2196_v48 }
 0xb17   :  { %2432 = vrot.lane.b32.xlu0 %v2173_v50, %s2791_s23  ;;  %2428 = vrot.lane.b32.xlu1 %v3013_v63, %s2791_s23  ;;  %v2218_v63 = vpop.permute.xlu0 %2217 }
 0xb1b   :  { %2436 = vrot.lane.b32.xlu0 %v2200_v12, %s2791_s23  ;;  %2438 = vrot.lane.b32.xlu1 %v2198_v16, %s2791_s23 }
 0xb1f   :  { %2434 = vrot.lane.b32.xlu0 %v2199_v62, %s2791_s23  ;;  %2442 = vrot.lane.b32.xlu1 %v2211_v10, %s2791_s23 }
 0xb23   :  { %2444 = vrot.lane.b32.xlu0 %v2209_v53, %s2791_s23  ;;  %2440 = vrot.lane.b32.xlu1 %v2210_v59, %s2791_s23 }
 0xb6e   :  { %v4434_v58 = vpop.permute.xlu1 %2326 }
 0xb6f   :  { %v2334_v55 = vmul.f32 %v3462_v34, %v4434_v58 }
 0xb71   :  { %v2336_v24 = vsel %vm442_vm12, %v2334_v55, 0.0 }
 0xb72   :  { %v4438_v38 = vpop.permute.xlu0 %2331  ;;  %v2220_v6 = vpop.permute.xlu1 %2219 }
 0xb73   :  { %v2335_v36 = vmul.f32 %v3464_v17, %v4438_v38  ;;  %v2222_v42 = vsel %vm249_vm7, %v2218_v63, %v2220_v6  ;;  %2450 = vrot.lane.b32.xlu1 %v2220_v6, %s2791_s23 }
 0xb74   :  { %2448 = vrot.lane.b32.xlu0 %v2222_v42, %s2791_s23 }
 0xb75   :  { %v2337_v30 = vsel %vm442_vm12, %v2335_v36, 0.0 }
 0xb76   :  { %v2338_v51 = vadd.f32 %v2337_v30, %v2336_v24  ;;  %v2216_v26 = vpop.permute.xlu0 %2215  ;;  %v2224_v49 = vpop.permute.xlu1 %2223  ;;  %v1219_v24 = vld [vmem:[%s4595_s10 + $0x8] sm:$0xff]  ;;  %v1218_v30 = vld [vmem:[%s4595_s10] sm:$0xff] }
 0xb77   :  { %v2221_v34 = vsel %vm249_vm7, %v2216_v26, %v2218_v63 }
 0xb78   :  { %v2339_v46 = vrot.slane %v2338_v51, 4  ;;  %2446 = vrot.lane.b32.xlu0 %v2221_v34, %s2791_s23 }
 0xb7a   :  { %v2340_v44 = vadd.f32 %v2339_v46, %v2338_v51  ;;  %v2226_v17 = vpop.permute.xlu0 %2225  ;;  %v2232_v52 = vpop.permute.xlu1 %2231 }
 0xb7b   :  { %v2227_v8 = vsel %vm109_vm5, %v2224_v49, %v2226_v17 }
 0xb7c   :  { %2456 = vrot.lane.b32.xlu0 %v2226_v17, %s2791_s23  ;;  %2454 = vrot.lane.b32.xlu1 %v2227_v8, %s2791_s23  ;;  %v2341_v22 = vrot.slane %v2340_v44, 2 }
 0xb7e   :  { %v2234_v40 = vpop.permute.xlu0 %2233  ;;  %v2236_v33 = vpop.permute.xlu1 %2235  ;;  %v2342_v47 = vadd.f32 %v2341_v22, %v2340_v44 }
 0xb7f   :  { %v2238_v57 = vsel %vm266_vm8, %v2234_v40, %v2236_v33  ;;  %v2237_v23 = vsel %vm266_vm8, %v2232_v52, %v2234_v40 }
 0xb80   :  { %2452 = vrot.lane.b32.xlu0 %v2224_v49, %s2791_s23  ;;  %2462 = vrot.lane.b32.xlu1 %v2238_v57, %s2791_s23  ;;  %v2343_v13 = vrot.slane %v2342_v47, 1 }
 0xb82   :  { %v2243_v7 = vpop.permute.xlu0 %2242  ;;  %v2245_v45 = vpop.permute.xlu1 %2244  ;;  %v4462_v43 = vadd.f32 %v2343_v13, %v2342_v47 }
 0xb83   :  { %v2248_v61 = vsel %vm278_vm10, %v2243_v7, %v2245_v45 }
 0xb84   :  { %2460 = vrot.lane.b32.xlu0 %v2237_v23, %s2791_s23  ;;  %2458 = vrot.lane.b32.xlu1 %v2232_v52, %s2791_s23 }
 0xb86   :  { %v2247_v31 = vpop.permute.xlu0 %2246  ;;  %v2252_v37 = vpop.permute.xlu1 %2251 }
 0xb87   :  { %v2249_v21 = vsel %vm278_vm10, %v2245_v45, %v2247_v31 }
 0xb88   :  { %2466 = vrot.lane.b32.xlu0 %v2248_v61, %s2791_s23  ;;  %2468 = vrot.lane.b32.xlu1 %v2249_v21, %s2791_s23 }
 0xb8a   :  { %v2254_v39 = vpop.permute.xlu0 %2253  ;;  %v2256_v32 = vpop.permute.xlu1 %2255 }
 0xb8b   :  { %v2257_v20 = vsel %vm288_vm9, %v2252_v37, %v2254_v39  ;;  %v2258_v12 = vsel %vm288_vm9, %v2254_v39, %v2256_v32 }
 0xb8c   :  { %2464 = vrot.lane.b32.xlu0 %v2243_v7, %s2791_s23  ;;  %2346 = vrot.lane.b32.xlu1 %v4462_v43, %s2801_s22 }
 0xb8e   :  { %v2263_v1 = vpop.permute.xlu0 %2262  ;;  %v2265_v19 = vpop.permute.xlu1 %2264 }
 0xb8f   :  { %v2268_v41 = vsel %vm300_vm11, %v2263_v1, %v2265_v19 }
 0xb90   :  { %2352 = vrot.lane.b32.xlu0 %v4462_v43, %s2803_s25  ;;  %2349 = vrot.lane.b32.xlu1 %v4462_v43, %s2800_s21  ;;  %s2805_s25 = smov [#allocation3]  }
 0xb92   :  { %v2267_v18 = vpop.permute.xlu0 %2266  ;;  %v2431_v48 = vpop.permute.xlu1 %2430 }
 0xb93   :  { %v2269_v6 = vsel %vm300_vm11, %v2265_v19, %v2267_v18 }
 0xb94   :  { %2358 = vrot.lane.b32.xlu0 %v4462_v43, %s4638_s8  ;;  %2355 = vrot.lane.b32.xlu1 %v4462_v43, %s2802_s24  ;;  %s2582_s8 = sshll.u32 %s2805_s25, 4  ;;  %s2583_s8 = int_to_ptr.vmem [resolvable:$true] %s2582_s8 }
 0xb95   :  { %s2761_s1 = scalar_lea.vmem %s2583_s8, 1024  ;;  %p2766_p1 = scmp.lt.s32.totalorder %s2583_s8, %s2583_s8 }
 0xb96   :  { %v2433_v9 = vpop.permute.xlu0 %2432  ;;  %v2429_v2 = vpop.permute.xlu1 %2428  ;;  %p2762_p0 = scmp.ne.s32.totalorder %s2583_s8, %s2761_s1  ;;  %p2767_p2 = scmp.lt.s32.totalorder %s2761_s1, %s2761_s1 }
 0xb97   :  { %v2482_v25 = vsel %vm209_vm4, %v2429_v2, %v2431_v48  ;;  %v2483_v16 = vsel %vm209_vm4, %v2431_v48, %v2433_v9  ;;  %v2375_v2 = vpack.c.bf16 %v4462_v43, %v4462_v43 }
 0xb98   :  { %2361 = vrot.lane.b32.xlu0 %v4462_v43, %s2795_s16  ;;  %2364 = vrot.lane.b32.xlu1 %v4462_v43, %s2794_s15  ;;  %p2768_p3 = por %p2767_p2, %p2766_p1 }
 0xb99   :  { %2521 = vmatprep.subr.bf16.mxu1 %v2483_v16 }
 0xb9a   :  { %2522 = vmatpush1.bf16.msra.mxu1 %v2482_v25  ;;  %v2437_v28 = vpop.permute.xlu0 %2436  ;;  %v2439_v50 = vpop.permute.xlu1 %2438  ;;  %p2769_p4 = pnand %p2768_p3, %p2762_p0 }
 0xb9b   :  { %v2485_v53 = vsel %vm209_vm4, %v2437_v28, %v2439_v50 }
 0xb9c   :  { %2474 = vrot.lane.b32.xlu0 %v2258_v12, %s2791_s23  ;;  %2472 = vrot.lane.b32.xlu1 %v2257_v20, %s2791_s23  ;;  %v2390_v12 = vpack.i.b16 %v2375_v2, %v2375_v2 }
 0xb9d   :  { %2523 = vmatprep.subr.bf16.mxu1 %v2485_v53 }
 0xb9e   :  { %v2435_v62 = vpop.permute.xlu0 %2434  ;;  %v2443_v10 = vpop.permute.xlu1 %2442 }
 0xb9f   :  { %v2484_v59 = vsel %vm209_vm4, %v2435_v62, %v2437_v28 }
 0xba0   :  { %2478 = vrot.lane.b32.xlu0 %v2268_v41, %s2791_s23  ;;  %2470 = vrot.lane.b32.xlu1 %v2252_v37, %s2791_s23 }
 0xba1   :  { %2524 = vmatpush1.bf16.msra.mxu1 %v2484_v59 }
 0xba2   :  { %v2445_v63 = vpop.permute.xlu0 %2444  ;;  %v2441_v55 = vpop.permute.xlu1 %2440 }
 0xba3   :  { %v2486_v36 = vsel %vm209_vm4, %v2441_v55, %v2443_v10  ;;  %v2487_v42 = vsel %vm209_vm4, %v2443_v10, %v2445_v63  ;;  %v2395_v63 = vrot.slane %v2390_v12, %v2880_v11 }
 0xba4   :  { %2476 = vrot.lane.b32.xlu0 %v2263_v1, %s2791_s23  ;;  %2480 = vrot.lane.b32.xlu1 %v2269_v6, %s2791_s23 }
 0xba5   :  { %2525 = vmatprep.subr.bf16.mxu1 %v2487_v42 }
 0xba6   :  { %2526 = vmatpush1.bf16.msra.mxu1 %v2486_v36 }
 0xba8   :  { %1227 = vperm.xlu0 %2687, %v1219_v24   ;;  %1222 = vperm.xlu1 %2688, %v1218_v30  }
 0xbac   :  { %2413 = vperm.xlu0 %2687, %v1219_v24   ;;  %2408 = vperm.xlu1 %2688, %v1218_v30  }
 0xbe5   :  { %v2451_v51 = vpop.permute.xlu1 %2450 }
 0xbe6   :  { %v2449_v26 = vpop.permute.xlu0 %2448 }
 0xbe7   :  { %v2489_v49 = vsel %vm209_vm4, %v2449_v26, %v2451_v51 }
 0xbe8   :  { %2527 = vmatprep.subr.bf16.mxu1 %v2489_v49 }
 0xbea   :  { %v2447_v34 = vpop.permute.xlu0 %2446 }
 0xbeb   :  { %v2488_v46 = vsel %vm209_vm4, %v2447_v34, %v2449_v26 }
 0xbec   :  { %2528 = vmatpush1.bf16.msra.mxu1 %v2488_v46 }
 0xbee   :  { %v2457_v44 = vpop.permute.xlu0 %2456  ;;  %v2455_v17 = vpop.permute.xlu1 %2454 }
 0xbef   :  { %v2491_v52 = vsel %vm209_vm4, %v2455_v17, %v2457_v44  ;;  %v4645_v44 = vld [vmem:[#allocation16_spill] sm:$0xff] }
 0xbf0   :  { %2529 = vmatprep.subr.bf16.mxu1 %v2491_v52  ;;  %v4646_v52 = vld [vmem:[#allocation17_spill] sm:$0xff] }
 0xbf2   :  { %v2453_v8 = vpop.permute.xlu0 %2452  ;;  %v2463_v22 = vpop.permute.xlu1 %2462 }
 0xbf3   :  { %v2490_v40 = vsel %vm209_vm4, %v2453_v8, %v2455_v17  ;;  %v1192_v17 = vmul.f32 %v4093_v56, %v4645_v44  ;;  %v4647_v8 = vld [vmem:[#allocation14_spill] sm:$0xff] }
 0xbf4   :  { %2530 = vmatpush1.bf16.msra.mxu1 %v2490_v40  ;;  %v4648_v40 = vld [vmem:[#allocation15_spill] sm:$0xff] }
 0xbf6   :  { %v2461_v33 = vpop.permute.xlu0 %2460  ;;  %v2459_v57 = vpop.permute.xlu1 %2458 }
 0xbf7   :  { %v2492_v47 = vsel %vm209_vm4, %v2459_v57, %v2461_v33  ;;  %v2493_v7 = vsel %vm209_vm4, %v2461_v33, %v2463_v22  ;;  %v1190_v22 = vmul.f32 %v4097_v14, %v4647_v8  ;;  %v1191_v33 = vmul.f32 %v4097_v14, %v4648_v40  ;;  %v2754_v14 = vld [vmem:[%s4585_s0 + $0x18] sm:$0xff] }
 0xbf8   :  { %2531 = vmatprep.subr.bf16.mxu1 %v2493_v7 }
 0xbf9   :  { %2532 = vmatpush1.bf16.msra.mxu1 %v2492_v47 }
 0xbfa   :  { %v2467_v45 = vpop.permute.xlu0 %2466  ;;  %v2469_v23 = vpop.permute.xlu1 %2468 }
 0xbfb   :  { %v2495_v13 = vsel %vm209_vm4, %v2467_v45, %v2469_v23 }
 0xbfc   :  { %2533 = vmatprep.subr.bf16.mxu1 %v2495_v13 }
 0xbfe   :  { %v2465_v31 = vpop.permute.xlu0 %2464  ;;  %v2347_v37 = vpop.permute.xlu1 %2346 }
 0xbff   :  { %v2494_v61 = vsel %vm209_vm4, %v2465_v31, %v2467_v45  ;;  %v2367_v21 = vsel %vm442_vm12, %v4462_v43, %v2347_v37 }
 0xc00   :  { %2534 = vmatpush1.bf16.msra.mxu1 %v2494_v61  ;;  %v2753_v61 = vld [vmem:[%s4585_s0 + $0x10] sm:$0xff] }
 0xc02   :  { %v2353_v39 = vpop.permute.xlu0 %2352  ;;  %v2350_v32 = vpop.permute.xlu1 %2349 }
 0xc03   :  { %v2368_v1 = vsel %vm720_vm2, %v2367_v21, %v2350_v32 }
 0xc04   :  { %v2369_v18 = vsel %vm722_vm3, %v2368_v1, %v2353_v39 }
 0xc06   :  { %v2359_v19 = vpop.permute.xlu0 %2358  ;;  %v2356_v48 = vpop.permute.xlu1 %2355 }
 0xc07   :  { %v2370_v9 = vsel %vm724_vm14, %v2369_v18, %v2356_v48 }
 0xc08   :  { %v2371_v16 = vsel %vm726_vm15, %v2370_v9, %v2359_v19  ;;  %v2376_v19 = vmul.f32 %v4434_v58, %v4318_v60  ;;  %v2377_v9 = vmul.f32 %v4434_v58, %v4320_v4  ;;  %v2757_v60 = vld [vmem:[%s4585_s0 + $0x20] sm:$0xff] }
 0xc0a   :  { %v2362_v25 = vpop.permute.xlu0 %2361  ;;  %v2365_v28 = vpop.permute.xlu1 %2364 }
 0xc0b   :  { %v2372_v50 = vsel %vm278_vm10, %v2371_v16, %v2362_v25 }
 0xc0c   :  { %v2373_v20 = vsel %vm249_vm7, %v2372_v50, %v2365_v28  ;;  %v2378_v28 = vmul.f32 %v4438_v38, %v4322_v27  ;;  %v2758_v27 = vld [vmem:[%s4585_s0 + $0x28] sm:$0xff] }
 0xc0d   :  { %v2374_v53 = vpack.c.bf16 %v2373_v20, %v2373_v20 }
 0xc0e   :  { %v2475_v62 = vpop.permute.xlu0 %2474  ;;  %v2473_v10 = vpop.permute.xlu1 %2472 }
 0xc0f   :  { %v2383_v41 = vpack.i.b16 %v2374_v53, %v2374_v53  ;;  %v2497_v59 = vsel %vm209_vm4, %v2473_v10, %v2475_v62  ;;  %v2379_v53 = vmul.f32 %v4438_v38, %v4324_v35  ;;  %v2759_v35 = vld [vmem:[%s4585_s0 + $0x30] sm:$0xff] }
 0xc10   :  { %2535 = vmatprep.subr.bf16.mxu1 %v2497_v59 }
 0xc11   :  { %v2388_v43 = vrot.slane %v2383_v41, %v2880_v11 }
 0xc12   :  { %v2479_v55 = vpop.permute.xlu0 %2478  ;;  %v2471_v6 = vpop.permute.xlu1 %2470 }
 0xc13   :  { %v2661_v36 = vcombine.low %v2388_v43, %v2395_v63  ;;  %v2496_v42 = vsel %vm209_vm4, %v2471_v6, %v2473_v10  ;;  %v2760_v63 = vld [vmem:[%s4585_s0 + $0x38] sm:$0xff] }
 0xc14   :  { %2536 = vmatpush1.bf16.msra.mxu1 %v2496_v42 }
 0xc15   :  { %v2402_v24 = vmul.bf16 %v2661_v36, %v4248_v5  ;;  %v2403_v30 = vmul.bf16 %v2661_v36, %v4253_v54  ;;  %v1193_v5 = vmul.f32 %v4093_v56, %v4646_v52 }
 0xc16   :  { %v2477_v51 = vpop.permute.xlu0 %2476  ;;  %v2481_v26 = vpop.permute.xlu1 %2480 }
 0xc17   :  { %v2498_v49 = vsel %vm209_vm4, %v2477_v51, %v2479_v55  ;;  %v2499_v34 = vsel %vm209_vm4, %v2479_v55, %v2481_v26  ;;  %v2663_v46 = vcombine.high %v2402_v24, %v2403_v30  ;;  %v2662_v11 = vcombine.low %v2402_v24, %v2403_v30 }
 0xc18   :  { %2537 = vmatprep.subr.bf16.mxu1 %v2499_v34 }
 0xc19   :  { %2538 = vmatpush1.bf16.msra.mxu1 %v2498_v49  ;;  %2664 = vmatprep.mubr.msk.bf16.mxu1 %vm442_vm12, %v2663_v46 }
 0xc1c   :  { %2554 = vmatmul.mubr.bf16.vlgmr.msra.gmra.mrb[16].mxu1 %v2662_v11 }
 0xc27   :  { %v1228_v54 = vpop.permute.xlu0 %1227  ;;  %v1223_v57 = vpop.permute.xlu1 %1222 }
 0xc28   :  { %v1374_v47 = vadd.f32 %v4306_v3, %v1228_v54  ;;  %v1376_v7 = vadd.f32 %v4308_v29, %v1228_v54  ;;  %v1370_v45 = vadd.f32 %v4302_v0, %v1223_v57  ;;  %v1372_v23 = vadd.f32 %v4304_v15, %v1223_v57  ;;  %v2755_v0 = vld [vmem:[%s4585_s0] sm:$0xff]  ;;  %v2756_v15 = vld [vmem:[%s4585_s0 + $0x8] sm:$0xff] }
 0xc2a   :  { %v1380_v13 = vadd.f32 %v1374_v47, %v1192_v17  ;;  %v1381_v31 = vadd.f32 %v1376_v7, %v1193_v5  ;;  %v1378_v37 = vadd.f32 %v1370_v45, %v1190_v22  ;;  %v1379_v56 = vadd.f32 %v1372_v23, %v1191_v33 }
 0xc2b   :  { %v2409_v32 = vpop.permute.xlu1 %2408  ;;  %v2414_v2 = vpop.permute.xlu0 %2413 }
 0xc2c   :  { %v1384_v21 = vadd.f32 %v2753_v61, %v1380_v13  ;;  %v1385_v3 = vadd.f32 %v2754_v14, %v1381_v31  ;;  %v1382_v29 = vadd.f32 %v2755_v0, %v1378_v37  ;;  %v1383_v39 = vadd.f32 %v2756_v15, %v1379_v56 }
 0xc2e   :  { %1388 = vst [vmem:[#allocation3 + $0x10] sm:$0xff] %v1384_v21  ;;  %1389 = vst [vmem:[#allocation3 + $0x18] sm:$0xff] %v1385_v3 }
 0xc2f   :  { %1386 = vst [vmem:[#allocation3] sm:$0xff] %v1382_v29  ;;  %1387 = vst [vmem:[#allocation3 + $0x8] sm:$0xff] %v1383_v39 }
 0xcef   :  { %v2555_v1 = vpop.f32.mrb[16].mxu1 }
 0xcf0   :  { %v2556_v18 = vadd.f32 %v2555_v1, %v2409_v32  ;;  %v2557_v48 = vpop.f32.mrb[17].mxu1 }
 0xcf1   :  { %v2558_v25 = vadd.f32 %v2557_v48, %v2409_v32  ;;  %v2559_v16 = vpop.f32.mrb[18].mxu1 }
 0xcf2   :  { %v2564_v50 = vadd.f32 %v2556_v18, %v2376_v19  ;;  %v2560_v20 = vadd.f32 %v2559_v16, %v2414_v2  ;;  %v2561_v12 = vpop.f32.mrb[19].mxu1 }
 0xcf3   :  { %v2565_v62 = vadd.f32 %v2558_v25, %v2377_v9  ;;  %v2562_v10 = vadd.f32 %v2561_v12, %v2414_v2 }
 0xcf4   :  { %v2568_v41 = vadd.f32 %v2757_v60, %v2564_v50  ;;  %v2566_v4 = vadd.f32 %v2560_v20, %v2378_v28 }
 0xcf5   :  { %v2569_v58 = vadd.f32 %v2758_v27, %v2565_v62  ;;  %v2567_v59 = vadd.f32 %v2562_v10, %v2379_v53 }
 0xcf6   :  { %2573 = vst [vmem:[#allocation3 + $0x20] sm:$0xff] %v2568_v41  ;;  %v2570_v38 = vadd.f32 %v2759_v35, %v2566_v4 }
 0xcf7   :  { %2574 = vst [vmem:[#allocation3 + $0x28] sm:$0xff] %v2569_v58  ;;  %v2571_v43 = vadd.f32 %v2760_v63, %v2567_v59 }
 0xcf8   :  { %2575 = vst [vmem:[#allocation3 + $0x30] sm:$0xff] %v2570_v38 }
 0xcf9   :  { %2576 = vst [vmem:[#allocation3 + $0x38] sm:$0xff] %v2571_v43 }
 0xcfa   :  { %2772 = shalt.err (!%p2769_p4)
}
 0xcfb   :  { %s2773_s27 = scalar_lea.hbm %s4596_s11, 1024 }
 0xcfc   :  { %p2774_p5 = scmp.ne.s32.totalorder %s4596_s11, %s2773_s27  ;;  %p2777_p6 = scmp.lt.u32.totalorder %s2773_s27, %s4596_s11 }
 0xcfe   :  { %p2779_p7 = pnand %p2777_p6, %p2774_p5 }
 0xd00   :  { %2782 = shalt.err (!%p2779_p7)
}
 0xd01   :  { %s2806_s7 = smov 256  }
 0xd02   :  { %2588 = dma.vmem_to_hbm [thread:$0]  %s2583_s8, 1024, %s4596_s11, [#allocation4], %s2806_s7, %s2806_s7, %s2801_s22  }
 0xd03   :  { %2783 = dma.done.wait [#allocation4], 1024  }
 0xd04   :  { %2784 = vsyncadd [#allocation4], 4294966272 }
 0xd05   :  { %2592 = vsyncpa [#allocation4], 1 }

</bundles_post_ra>
